<compile_context>
chip_gen: v5e
topology: v5e:2x2
jax: 0.10.0
libtpu: 0.0.40
codegen_flags: <defaults>
</compile_context>

<pallas_src>
import jax
import jax.numpy as jnp
from jax import lax
from jax.experimental import pallas as pl
from jax.experimental.pallas import tpu as pltpu

CLIP_MODEL = 5.0     # ClippedCtrl.clip_model
CLIP_SCORE = 3.0     # ScoreCtrl.clip_score
SCALE_SCORE = 0.7    # ScoreCtrl.scale_score


def _clip_norm(y, max_norm):
    """Rescale rows so their L2 norm over the last dim is <= max_norm (rsqrt form)."""
    sumsq = jnp.sum(y * y, axis=-1, keepdims=True)
    # rsqrt(0) = inf -> min(1, inf) = 1 -> zero rows pass through unchanged.
    scale = jnp.minimum(1.0, max_norm * lax.rsqrt(sumsq))
    return y * scale


def score_ctrl_kernel(t_ref, x_ref, w1x_ref, w2_ref, vec_ref, out_ref):
    t = t_ref[...]                        # (TB, 1)
    x = x_ref[...]                        # (TB, D)
    vec = vec_ref[...]                    # (8, W) packed small params, W = max(H, D)

    D = x_ref.shape[1]
    H = w1x_ref.shape[1]

    # Unpack the resident small-parameter slab (tiny static slices).
    w1t = vec[0:1, :H]                    # base_model layer-1 "t column"      (1, H)
    b1 = vec[1:2, :H]                     # base_model layer-1 bias            (1, H)
    ws1 = vec[2:3, :H]                    # score_model layer-1 weight (row)   (1, H)
    bs1 = vec[3:4, :H]                    # score_model layer-1 bias           (1, H)
    ws2r = vec[4:5, :H]                   # score_model layer-2 weight (row)   (1, H)
    b2 = vec[5:6, :D]                     # base_model layer-2 bias            (1, D)
    bs2 = vec[6:7, 0:1]                   # score_model layer-2 bias           (1, 1)

    # --- base_model(t, x): 2-layer tanh MLP on [t, x] -> (TB, D) ---
    # The t-column contribution is a VPU broadcast multiply (no concat, no MXU op).
    h = jnp.tanh(
        jnp.dot(x, w1x_ref[...], preferred_element_type=jnp.float32)
        + t * w1t
        + b1
    )
    ctrl_raw = jnp.dot(h, w2_ref[...], preferred_element_type=jnp.float32) + b2
    ctrl = _clip_norm(ctrl_raw, CLIP_MODEL)

    # --- target_score(x) = -x, norm-clipped and scaled ---
    # SCALE_SCORE * clip_norm(-x, CLIP_SCORE) == x * (-SCALE_SCORE * min(1, c*rsqrt(|x|^2)))
    # (norm(-x) == norm(x)); keep it as a (TB, 1) scale so the broadcast happens once.
    sumsq_x = jnp.sum(x * x, axis=-1, keepdims=True)
    score_scale = -SCALE_SCORE * jnp.minimum(1.0, CLIP_SCORE * lax.rsqrt(sumsq_x))

    # --- score_model(t, x): tiny 2-layer tanh MLP on t -> (TB, 1), pure VPU/XLU ---
    hs = jnp.tanh(t * ws1 + bs1)                                         # (TB, H)
    sm_raw = jnp.sum(hs * ws2r, axis=-1, keepdims=True) + bs2            # (TB, 1)
    # Row-norm clip of a (TB, 1) tensor == magnitude clamp.
    sm = jnp.clip(sm_raw, -CLIP_MODEL, CLIP_MODEL)

    # --- combine: fold the two (TB,1) factors first, then one (TB,D) mul + add ---
    out_ref[...] = ctrl + x * (score_scale * sm)


def _pick_tile(B, tb, *, min_tiles=8, min_tb=256):
    """Choose the batch tile.

    Big enough to amortize the ~0.35 us per-grid-step overhead, small enough to keep
    >= min_tiles grid steps when B allows it (v7x megacore sharding + pipelining),
    and a multiple of 8 (sublane rule) unless it covers the whole batch.
    """
    if B <= min_tb:
        return B                           # single full-batch tile (full-dim block is legal)
    cap = -(-B // min_tiles)               # cdiv(B, min_tiles)
    cap = -(-cap // 8) * 8                 # round up to a sublane multiple
    TB = max(min(tb, cap), min_tb)
    TB = min(TB, B)
    if TB != B:
        TB = max((TB // 8) * 8, 8)         # multiple of 8 for partial-block tiling
    return TB


def score_ctrl_forward(t, x, w1x, w2, vecs, *, tb=4096):
    """Batch-gridded pallas_call: t/x/out tiled over batch, weights resident in VMEM."""
    B, D = x.shape
    H = w1x.shape[1]
    W = vecs.shape[1]

    TB = _pick_tile(B, tb)
    grid = (pl.cdiv(B, TB),)

    def batch_spec(shape):
        return pl.BlockSpec(shape, lambda i: (i, 0))

    def const_spec(shape):
        return pl.BlockSpec(shape, lambda i: (0, 0))   # resident across grid steps

    return pl.pallas_call(
        score_ctrl_kernel,
        out_shape=jax.ShapeDtypeStruct((B, D), jnp.float32),
        grid=grid,
        in_specs=[
            batch_spec((TB, 1)),          # t
            batch_spec((TB, D)),          # x
            const_spec((D, H)),           # w1_x
            const_spec((H, D)),           # w2
            const_spec((8, W)),           # packed small params
        ],
        out_specs=batch_spec((TB, D)),
        compiler_params=pltpu.CompilerParams(
            dimension_semantics=("parallel",),   # v7x: shard batch tiles across both TCs
            vmem_limit_bytes=32 << 20,           # safe on v7x's 64 MiB physical VMEM
        ),
    )(t, x, w1x, w2, vecs)


def make_params(key, D, H):
    """Deterministic synthetic parameters in their natural (unpacked) layout."""
    ks = jax.random.split(key, 8)
    w1 = 0.3 * jax.random.normal(ks[0], (1 + D, H), jnp.float32)   # base_model layer 1
    w1t, w1x = w1[:1, :], w1[1:, :]                                # (1,H), (D,H)
    b1 = 0.1 * jax.random.normal(ks[1], (1, H), jnp.float32)
    w2 = 0.3 * jax.random.normal(ks[2], (H, D), jnp.float32)       # base_model layer 2
    b2 = 0.1 * jax.random.normal(ks[3], (1, D), jnp.float32)
    ws1 = 0.3 * jax.random.normal(ks[4], (1, H), jnp.float32)      # score_model layer 1
    bs1 = 0.1 * jax.random.normal(ks[5], (1, H), jnp.float32)
    ws2r = 0.3 * jax.random.normal(ks[6], (1, H), jnp.float32)     # score_model layer 2 (row)
    bs2 = 0.1 * jax.random.normal(ks[7], (1, 1), jnp.float32)
    return (w1t, w1x, b1, w2, b2, ws1, bs1, ws2r, bs2)


def pack_params(params):
    """Pack the seven tiny vector params into one (8, max(H, D)) resident slab."""
    w1t, w1x, b1, w2, b2, ws1, bs1, ws2r, bs2 = params
    D, H = w1x.shape
    W = max(H, D)

    def pad(v):
        return jnp.pad(v, ((0, 0), (0, W - v.shape[1])))

    vecs = jnp.concatenate(
        [pad(w1t), pad(b1), pad(ws1), pad(bs1), pad(ws2r), pad(b2), pad(bs2),
         jnp.zeros((1, W), jnp.float32)],
        axis=0,
    )  # (8, W)
    return w1x, w2, vecs


def score_ctrl_ref(t, x, params):
    """Pure-JAX reference of the same forward (original sqrt/where clip formulation)."""
    w1t, w1x, b1, w2, b2, ws1, bs1, ws2r, bs2 = params

    def clip_ref(y, max_norm):
        norm = jnp.sqrt(jnp.sum(y * y, axis=-1, keepdims=True))
        scale = jnp.where(norm > max_norm, max_norm / norm, 1.0)
        return y * scale

    h = jnp.tanh(x @ w1x + t @ w1t + b1)
    ctrl = clip_ref(h @ w2 + b2, CLIP_MODEL)
    score = SCALE_SCORE * clip_ref(-x, CLIP_SCORE)
    hs = jnp.tanh(t @ ws1 + bs1)
    sm = clip_ref(hs @ ws2r.T + bs2, CLIP_MODEL)
    return ctrl + score * sm


if __name__ == "__main__":
    # Small demo shapes.  B=256 runs as one full-batch tile; B=300 forces a partial
    # final tile (B % TB != 0), exercising the padded-row path flagged in review.
    # (At these shapes everything is launch-overhead-bound; the tiling/pipelining
    #  wins only show up at production batch sizes, where _pick_tile chooses TB≈4096.)
    D, H = 16, 32
    key = jax.random.PRNGKey(0)
    k_p = jax.random.fold_in(key, 7)
    params = make_params(k_p, D, H)
    kernel_params = pack_params(params)

    for B in (256, 300):
        k_t, k_x = jax.random.split(jax.random.fold_in(key, B))
        t = jax.random.uniform(k_t, (B, 1), jnp.float32)       # diffusion time in [0, 1)
        x = 2.0 * jax.random.normal(k_x, (B, D), jnp.float32)  # state

        out = score_ctrl_forward(t, x, *kernel_params)
        out = jax.block_until_ready(out)

        assert out.shape == (B, D) and out.dtype == jnp.float32
        ref = score_ctrl_ref(t, x, params)
        assert jnp.allclose(out, ref, atol=1e-4, rtol=1e-4), f"mismatch vs reference (B={B})"

    print("KERNEL_OK")
</pallas_src>

<mosaic_0001>
module attributes {stable_mosaic.version = 11 : i64} {
  func.func @score_ctrl_kernel(%arg0: i32, %arg1: memref<256x1xf32, #tpu.memory_space<vmem>>, %arg2: memref<256x16xf32, #tpu.memory_space<vmem>>, %arg3: memref<16x32xf32, #tpu.memory_space<vmem>>, %arg4: memref<32x16xf32, #tpu.memory_space<vmem>>, %arg5: memref<8x32xf32, #tpu.memory_space<vmem>>, %arg6: memref<256x16xf32, #tpu.memory_space<vmem>>) attributes {dimension_semantics = [#tpu.dimension_semantics<parallel>], iteration_bounds = array<i64: 1>, scalar_prefetch = 0 : i64, scratch_operands = 0 : i64, tpu.core_type = #tpu.core_type<tc>, window_params = [{transform_indices = @transform_0, window_bounds = array<i64: 256, 1>}, {transform_indices = @transform_1, window_bounds = array<i64: 256, 16>}, {pipeline_mode = #tpu.pipeline_mode<synchronous>, transform_indices = @transform_2, window_bounds = array<i64: 16, 32>}, {pipeline_mode = #tpu.pipeline_mode<synchronous>, transform_indices = @transform_3, window_bounds = array<i64: 32, 16>}, {pipeline_mode = #tpu.pipeline_mode<synchronous>, transform_indices = @transform_4, window_bounds = array<i64: 8, 32>}, {transform_indices = @transform_5, window_bounds = array<i64: 256, 16>}]} {
    %c0 = arith.constant 0 : index
    %c0_0 = arith.constant 0 : index
    %0 = vector.load %arg1[%c0, %c0_0] : memref<256x1xf32, #tpu.memory_space<vmem>>, vector<256x1xf32>
    %c0_1 = arith.constant 0 : index
    %c0_2 = arith.constant 0 : index
    %1 = vector.load %arg2[%c0_1, %c0_2] : memref<256x16xf32, #tpu.memory_space<vmem>>, vector<256x16xf32>
    %c0_3 = arith.constant 0 : index
    %c0_4 = arith.constant 0 : index
    %2 = vector.load %arg5[%c0_3, %c0_4] : memref<8x32xf32, #tpu.memory_space<vmem>>, vector<8x32xf32>
    %3 = vector.extract_strided_slice %2 {offsets = [0, 0], sizes = [1, 32], strides = [1, 1]} : vector<8x32xf32> to vector<1x32xf32>
    %4 = vector.extract_strided_slice %2 {offsets = [1, 0], sizes = [1, 32], strides = [1, 1]} : vector<8x32xf32> to vector<1x32xf32>
    %5 = vector.extract_strided_slice %2 {offsets = [2, 0], sizes = [1, 32], strides = [1, 1]} : vector<8x32xf32> to vector<1x32xf32>
    %6 = vector.extract_strided_slice %2 {offsets = [3, 0], sizes = [1, 32], strides = [1, 1]} : vector<8x32xf32> to vector<1x32xf32>
    %7 = vector.extract_strided_slice %2 {offsets = [4, 0], sizes = [1, 32], strides = [1, 1]} : vector<8x32xf32> to vector<1x32xf32>
    %8 = vector.extract_strided_slice %2 {offsets = [5, 0], sizes = [1, 16], strides = [1, 1]} : vector<8x32xf32> to vector<1x16xf32>
    %9 = vector.extract_strided_slice %2 {offsets = [6, 0], sizes = [1, 1], strides = [1, 1]} : vector<8x32xf32> to vector<1x1xf32>
    %c0_5 = arith.constant 0 : index
    %c0_6 = arith.constant 0 : index
    %10 = vector.load %arg3[%c0_5, %c0_6] : memref<16x32xf32, #tpu.memory_space<vmem>>, vector<16x32xf32>
    %cst = arith.constant dense<0.000000e+00> : vector<256x32xf32>
    %11 = tpu.matmul %1, %10, %cst {dimension_numbers = #tpu.dot_dimension_numbers<[1], [0], [0], [1], [0, 0, 1, 1], [], []>} : vector<256x16xf32>, vector<16x32xf32>, vector<256x32xf32> -> vector<256x32xf32>
    %12 = vector.broadcast %0 : vector<256x1xf32> to vector<256x32xf32>
    %13 = vector.broadcast %3 : vector<1x32xf32> to vector<256x32xf32>
    %14 = arith.mulf %12, %13 : vector<256x32xf32>
    %15 = arith.addf %11, %14 : vector<256x32xf32>
    %16 = vector.broadcast %4 : vector<1x32xf32> to vector<256x32xf32>
    %17 = arith.addf %15, %16 : vector<256x32xf32>
    %18 = math.tanh %17 : vector<256x32xf32>
    %c0_7 = arith.constant 0 : index
    %c0_8 = arith.constant 0 : index
    %19 = vector.load %arg4[%c0_7, %c0_8] : memref<32x16xf32, #tpu.memory_space<vmem>>, vector<32x16xf32>
    %cst_9 = arith.constant dense<0.000000e+00> : vector<256x16xf32>
    %20 = tpu.matmul %18, %19, %cst_9 {dimension_numbers = #tpu.dot_dimension_numbers<[1], [0], [0], [1], [0, 0, 1, 1], [], []>} : vector<256x32xf32>, vector<32x16xf32>, vector<256x16xf32> -> vector<256x16xf32>
    %21 = vector.broadcast %8 : vector<1x16xf32> to vector<256x16xf32>
    %22 = arith.addf %20, %21 : vector<256x16xf32>
    %23 = arith.mulf %22, %22 : vector<256x16xf32>
    %cst_10 = arith.constant dense<0.000000e+00> : vector<256xf32>
    %24 = vector.multi_reduction <add>, %23, %cst_10 [1] : vector<256x16xf32> to vector<256xf32>
    %25 = vector.shape_cast %24 : vector<256xf32> to vector<256x1xf32>
    %26 = math.rsqrt %25 : vector<256x1xf32>
    %cst_11 = arith.constant 5.000000e+00 : f32
    %27 = vector.broadcast %cst_11 : f32 to vector<256x1xf32>
    %28 = arith.mulf %27, %26 : vector<256x1xf32>
    %cst_12 = arith.constant 1.000000e+00 : f32
    %29 = vector.broadcast %cst_12 : f32 to vector<256x1xf32>
    %30 = arith.minimumf %29, %28 : vector<256x1xf32>
    %31 = vector.broadcast %30 : vector<256x1xf32> to vector<256x16xf32>
    %32 = arith.mulf %22, %31 : vector<256x16xf32>
    %33 = arith.mulf %1, %1 : vector<256x16xf32>
    %cst_13 = arith.constant dense<0.000000e+00> : vector<256xf32>
    %34 = vector.multi_reduction <add>, %33, %cst_13 [1] : vector<256x16xf32> to vector<256xf32>
    %35 = vector.shape_cast %34 : vector<256xf32> to vector<256x1xf32>
    %36 = math.rsqrt %35 : vector<256x1xf32>
    %cst_14 = arith.constant 3.000000e+00 : f32
    %37 = vector.broadcast %cst_14 : f32 to vector<256x1xf32>
    %38 = arith.mulf %37, %36 : vector<256x1xf32>
    %cst_15 = arith.constant 1.000000e+00 : f32
    %39 = vector.broadcast %cst_15 : f32 to vector<256x1xf32>
    %40 = arith.minimumf %39, %38 : vector<256x1xf32>
    %cst_16 = arith.constant -0.699999988 : f32
    %41 = vector.broadcast %cst_16 : f32 to vector<256x1xf32>
    %42 = arith.mulf %41, %40 : vector<256x1xf32>
    %43 = vector.broadcast %0 : vector<256x1xf32> to vector<256x32xf32>
    %44 = vector.broadcast %5 : vector<1x32xf32> to vector<256x32xf32>
    %45 = arith.mulf %43, %44 : vector<256x32xf32>
    %46 = vector.broadcast %6 : vector<1x32xf32> to vector<256x32xf32>
    %47 = arith.addf %45, %46 : vector<256x32xf32>
    %48 = math.tanh %47 : vector<256x32xf32>
    %49 = vector.broadcast %7 : vector<1x32xf32> to vector<256x32xf32>
    %50 = arith.mulf %48, %49 : vector<256x32xf32>
    %cst_17 = arith.constant dense<0.000000e+00> : vector<256xf32>
    %51 = vector.multi_reduction <add>, %50, %cst_17 [1] : vector<256x32xf32> to vector<256xf32>
    %52 = vector.shape_cast %51 : vector<256xf32> to vector<256x1xf32>
    %53 = vector.broadcast %9 : vector<1x1xf32> to vector<256x1xf32>
    %54 = arith.addf %52, %53 : vector<256x1xf32>
    %cst_18 = arith.constant -5.000000e+00 : f32
    %cst_19 = arith.constant 5.000000e+00 : f32
    %55 = vector.broadcast %cst_18 : f32 to vector<256x1xf32>
    %56 = arith.maximumf %55, %54 : vector<256x1xf32>
    %57 = vector.broadcast %cst_19 : f32 to vector<256x1xf32>
    %58 = arith.minimumf %57, %56 : vector<256x1xf32>
    %59 = arith.mulf %42, %58 : vector<256x1xf32>
    %60 = vector.broadcast %59 : vector<256x1xf32> to vector<256x16xf32>
    %61 = arith.mulf %1, %60 : vector<256x16xf32>
    %62 = arith.addf %32, %61 : vector<256x16xf32>
    %c0_20 = arith.constant 0 : index
    %c0_21 = arith.constant 0 : index
    %63 = vector.load %arg6[%c0_20, %c0_21] : memref<256x16xf32, #tpu.memory_space<vmem>>, vector<256x16xf32>
    tpu.vector_store %arg6[%c0_20, %c0_21], %62 {strides = array<i32>} : memref<256x16xf32, #tpu.memory_space<vmem>>, vector<256x16xf32>,
    return
  }
  func.func @transform_0(%arg0: i32) -> (i32, i32) {
    %c0_i32 = arith.constant 0 : i32
    %c0_i32_0 = arith.constant 0 : i32
    return %arg0, %c0_i32 : i32, i32
  }
  func.func @transform_1(%arg0: i32) -> (i32, i32) {
    %c0_i32 = arith.constant 0 : i32
    %c0_i32_0 = arith.constant 0 : i32
    return %arg0, %c0_i32 : i32, i32
  }
  func.func @transform_2(%arg0: i32) -> (i32, i32) {
    %c0_i32 = arith.constant 0 : i32
    %c0_i32_0 = arith.constant 0 : i32
    %c0_i32_1 = arith.constant 0 : i32
    return %c0_i32, %c0_i32_0 : i32, i32
  }
  func.func @transform_3(%arg0: i32) -> (i32, i32) {
    %c0_i32 = arith.constant 0 : i32
    %c0_i32_0 = arith.constant 0 : i32
    %c0_i32_1 = arith.constant 0 : i32
    return %c0_i32, %c0_i32_0 : i32, i32
  }
  func.func @transform_4(%arg0: i32) -> (i32, i32) {
    %c0_i32 = arith.constant 0 : i32
    %c0_i32_0 = arith.constant 0 : i32
    %c0_i32_1 = arith.constant 0 : i32
    return %c0_i32, %c0_i32_0 : i32, i32
  }
  func.func @transform_5(%arg0: i32) -> (i32, i32) {
    %c0_i32 = arith.constant 0 : i32
    %c0_i32_0 = arith.constant 0 : i32
    return %arg0, %c0_i32 : i32, i32
  }
}

</mosaic_0001>

<bundles_post_ra>
// kernel: tpu_custom_call.1
= control target key start
LH: loop header
LB: loop body
LE: loop exit
PB: predicated region body
PF: predicated region fallthrough
CT: control target
= control target key end

     0   :  { %v2869_v0 = vmov 0   ;;  %vm280_vm0 = vcmask 130048   ;;  %vm560_vm1 = vcmask 261120   ;;  %s5285_s2 = inlined_call_operand.vmem [shape: f32[16,32], index: 2, kind: input, shape index: {}]   ;;  %s5286_s0 = inlined_call_operand.vmem [shape: f32[256,1], index: 0, kind: input, shape index: {}]   ;;  %s5287_s1 = inlined_call_operand.vmem [shape: f32[256,16], index: 1, kind: input, shape index: {}]   ;;  %s5288_s3 = inlined_call_operand.vmem [shape: f32[32,16], index: 3, kind: input, shape index: {}]   ;;  %s5289_s4 = inlined_call_operand.vmem [shape: f32[8,32], index: 4, kind: input, shape index: {}]   ;;  %s5290_s5 = inlined_call_operand.vmem [shape: f32[256,16], index: 5, kind: output, shape index: {}]  }
   0x1   :  { %2579 = vset.pattern.permute.xlu2 %v2869_v0  ;;  %2578 = vset.pattern.permute.xlu1 %v2869_v0  ;;  %v86_v1 = vld [vmem:[%s5285_s2 + $0x8] sm:$0xff]  ;;  %v24_v2 = vld [vmem:[%s5286_s0 + $0x20] sm:$0xff]  ;;  %v22_v3 = vld [vmem:[%s5286_s0 + $0x10] sm:$0xff] }
   0x2   :  { %2577 = vset.pattern.permute.xlu0 %v2869_v0  ;;  %391 = vmatpush.msra.mxu0 %v86_v1  ;;  %v20_v4 = vld [vmem:[%s5286_s0] sm:$0xff]  ;;  %v2923_v7 = vld [vmem:[%s5287_s1 + $0x88] sm:$0xff]  ;;  %v23_v9 = vld [vmem:[%s5286_s0 + $0x18] sm:$0xff] }
   0x3   :  { %v85_v5 = vld [vmem:[%s5285_s2] sm:$0xff]  ;;  %2570 = vmatpush.msra.mxu3 %v86_v1  ;;  %109 = vperm.xlu2 %2579, %v24_v2   ;;  %v25_v8 = vld [vmem:[%s5286_s0 + $0x28] sm:$0xff]  ;;  %v2946_v12 = vld [vmem:[%s5287_s1 + $0x90] sm:$0xff] }
   0x4   :  { %v2918_v6 = vld [vmem:[%s5287_s1] sm:$0xff]  ;;  %99 = vperm.xlu1 %2578, %v22_v3   ;;  %89 = vperm.xlu0 %2577, %v20_v4   ;;  %v21_v10 = vld [vmem:[%s5286_s0 + $0x8] sm:$0xff]  ;;  %v27_v14 = vld [vmem:[%s5286_s0 + $0x38] sm:$0xff] }
   0x5   :  { %392 = vmatpush.msra.mxu0 %v85_v5  ;;  %2571 = vmatpush.msra.mxu3 %v85_v5  ;;  %v2941_v11 = vld [vmem:[%s5287_s1 + $0x8] sm:$0xff]  ;;  %v28_v13 = vld [vmem:[%s5286_s0 + $0x40] sm:$0xff]  ;;  %v26_v15 = vld [vmem:[%s5286_s0 + $0x30] sm:$0xff] }
   0x6   :  { %2474 = vmatmul.msk.f32.vlgmr.msra.gmra.mxu0 %vm280_vm0, %v2918_v6  ;;  %2491 = vmatmul.msk.f32.vlgmr.msra.gmra.mxu3 %vm280_vm0, %v2923_v7  ;;  %v2964_v16 = vld [vmem:[%s5287_s1 + $0x10] sm:$0xff]  ;;  %v2969_v17 = vld [vmem:[%s5287_s1 + $0x98] sm:$0xff]  ;;  %v29_v20 = vld [vmem:[%s5286_s0 + $0x48] sm:$0xff] }
   0x7   :  { %v31_v18 = vld [vmem:[%s5286_s0 + $0x58] sm:$0xff]  ;;  %v30_v19 = vld [vmem:[%s5286_s0 + $0x50] sm:$0xff]  ;;  %v2992_v22 = vld [vmem:[%s5287_s1 + $0xa0] sm:$0xff]  ;;  %v1316_v1 = vmul.f32 %v2964_v16, %v2964_v16 }
   0x8   :  { %v2987_v21 = vld [vmem:[%s5287_s1 + $0x18] sm:$0xff]  ;;  %v34_v23 = vld [vmem:[%s5286_s0 + $0x70] sm:$0xff]  ;;  %v33_v24 = vld [vmem:[%s5286_s0 + $0x68] sm:$0xff] }
   0x9   :  { %v32_v25 = vld [vmem:[%s5286_s0 + $0x60] sm:$0xff]  ;;  %v3015_v27 = vld [vmem:[%s5287_s1 + $0xa8] sm:$0xff]  ;;  %v35_v30 = vld [vmem:[%s5286_s0 + $0x78] sm:$0xff]  ;;  %v1352_v4 = vsel %vm280_vm0, %v1316_v1, 0.0 }
   0xa   :  { %v3010_v26 = vld [vmem:[%s5287_s1 + $0x20] sm:$0xff]  ;;  %v37_v28 = vld [vmem:[%s5286_s0 + $0x88] sm:$0xff]  ;;  %v3038_v32 = vld [vmem:[%s5287_s1 + $0xb0] sm:$0xff] }
   0xb   :  { %114 = vperm.xlu2 %2579, %v25_v8   ;;  %v36_v29 = vld [vmem:[%s5286_s0 + $0x80] sm:$0xff]  ;;  %v3033_v31 = vld [vmem:[%s5287_s1 + $0x28] sm:$0xff]  ;;  %v39_v34 = vld [vmem:[%s5286_s0 + $0x98] sm:$0xff] }
   0xc   :  { %104 = vperm.xlu1 %2578, %v23_v9   ;;  %94 = vperm.xlu0 %2577, %v21_v10   ;;  %v40_v33 = vld [vmem:[%s5286_s0 + $0xa0] sm:$0xff]  ;;  %v38_v35 = vld [vmem:[%s5286_s0 + $0x90] sm:$0xff]  ;;  %v3061_v37 = vld [vmem:[%s5287_s1 + $0xb8] sm:$0xff]  ;;  %v1319_v9 = vmul.f32 %v3033_v31, %v3033_v31  ;;  %v1315_v10 = vmul.f32 %v2941_v11, %v2941_v11 }
   0xd   :  { %v3056_v36 = vld [vmem:[%s5287_s1 + $0x30] sm:$0xff]  ;;  %v43_v38 = vld [vmem:[%s5286_s0 + $0xb8] sm:$0xff]  ;;  %v41_v40 = vld [vmem:[%s5286_s0 + $0xa8] sm:$0xff] }
   0xe   :  { %2475 = vmatmul.msk.f32.gmra.mxu0 %vm280_vm0, %v2941_v11  ;;  %2492 = vmatmul.msk.f32.gmra.mxu3 %vm280_vm0, %v2946_v12  ;;  %v42_v39 = vld [vmem:[%s5286_s0 + $0xb0] sm:$0xff]  ;;  %v3079_v41 = vld [vmem:[%s5287_s1 + $0x38] sm:$0xff]  ;;  %v3084_v42 = vld [vmem:[%s5287_s1 + $0xc0] sm:$0xff] }
   0xf   :  { %v46_v43 = vld [vmem:[%s5286_s0 + $0xd0] sm:$0xff]  ;;  %v45_v44 = vld [vmem:[%s5286_s0 + $0xc8] sm:$0xff]  ;;  %v44_v45 = vld [vmem:[%s5286_s0 + $0xc0] sm:$0xff] }
  0x10   :  { %v3102_v46 = vld [vmem:[%s5287_s1 + $0x40] sm:$0xff]  ;;  %v3107_v47 = vld [vmem:[%s5287_s1 + $0xc8] sm:$0xff]  ;;  %v47_v50 = vld [vmem:[%s5286_s0 + $0xd8] sm:$0xff] }
  0x11   :  { %v49_v48 = vld [vmem:[%s5286_s0 + $0xe8] sm:$0xff]  ;;  %v48_v49 = vld [vmem:[%s5286_s0 + $0xe0] sm:$0xff]  ;;  %v3130_v52 = vld [vmem:[%s5287_s1 + $0xd0] sm:$0xff] }
  0x12   :  { %v3125_v51 = vld [vmem:[%s5287_s1 + $0x48] sm:$0xff]  ;;  %v51_v53 = vld [vmem:[%s5286_s0 + $0xf8] sm:$0xff]  ;;  %v50_v54 = vld [vmem:[%s5286_s0 + $0xf0] sm:$0xff] }
  0x13   :  { %129 = vperm.xlu2 %2579, %v28_v13   ;;  %v3145_v55 = vld [vmem:[%s5287_s1 + $0x50] sm:$0xff]  ;;  %v3150_v56 = vld [vmem:[%s5287_s1 + $0xd8] sm:$0xff]  ;;  %v3162_v58 = vld [vmem:[%s5287_s1 + $0xe0] sm:$0xff]  ;;  %v1314_v13 = vmul.f32 %v2918_v6, %v2918_v6  ;;  %v1322_v6 = vmul.f32 %v3102_v46, %v3102_v46  ;;  %v1323_v1 = vmul.f32 %v3125_v51, %v3125_v51 }
  0x14   :  { %124 = vperm.xlu1 %2578, %v27_v14   ;;  %119 = vperm.xlu0 %2577, %v26_v15   ;;  %v63_v57 = vld [vmem:[%s5287_s1 + $0x58] sm:$0xff]  ;;  %v3170_v59 = vld [vmem:[%s5287_s1 + $0x60] sm:$0xff]  ;;  %v3175_v60 = vld [vmem:[%s5287_s1 + $0xe8] sm:$0xff]  ;;  %v1361_v14 = vsel %vm280_vm0, %v1319_v9, 0.0 }
  0x15   :  { %v558_v61 = vld [vmem:[%s5288_s3 + $0x18] sm:$0xff]  ;;  %v3187_v62 = vld [vmem:[%s5287_s1 + $0x68] sm:$0xff]  ;;  %v3192_v63 = vld [vmem:[%s5287_s1 + $0xf0] sm:$0xff]  ;;  %v1373_v9 = vsel %vm280_vm0, %v1323_v1, 0.0 }
  0x16   :  { %2476 = vmatmul.msk.f32.gmra.mxu0 %vm280_vm0, %v2964_v16  ;;  %2493 = vmatmul.msk.f32.gmra.mxu3 %vm280_vm0, %v2969_v17  ;;  %v557_v0 = vld [vmem:[%s5288_s3 + $0x10] sm:$0xff]  ;;  %v556_v2 = vld [vmem:[%s5288_s3 + $0x8] sm:$0xff]  ;;  %v555_v3 = vld [vmem:[%s5288_s3] sm:$0xff]  ;;  %v1349_v16 = vsel %vm280_vm0, %v1315_v10, 0.0 }
  0x17   :  { %669 = vmatpush.msra.mxu1 %v558_v61  ;;  %2572 = vmatpush.msra.mxu2 %v558_v61  ;;  %v66_v5 = vld [vmem:[%s5287_s1 + $0x70] sm:$0xff]  ;;  %v3216_v8 = vld [vmem:[%s5287_s1 + $0xf8] sm:$0xff]  ;;  %v3231_v15 = vld [vmem:[%s5289_s4] sm:$0xff] }
  0x18   :  { %v3243_v11 = vperm.slane %v3231_v15, 0 }
  0x19   :  { %670 = vmatpush.msra.mxu1 %v557_v0  ;;  %2573 = vmatpush.msra.mxu2 %v557_v0  ;;  %v1324_v0 = vmul.f32 %v3145_v55, %v3145_v55 }
  0x1b   :  { %144 = vperm.xlu2 %2579, %v31_v18   ;;  %671 = vmatpush.msra.mxu1 %v556_v2  ;;  %v1346_v18 = vsel %vm280_vm0, %v1314_v13, 0.0  ;;  %v1331_v13 = vmul.f32 %v2923_v7, %v2923_v7 }
  0x1c   :  { %139 = vperm.xlu1 %2578, %v30_v19   ;;  %134 = vperm.xlu0 %2577, %v29_v20   ;;  %v3238_v19 = vld [vmem:[%s5287_s1 + $0x78] sm:$0xff] }
  0x1d   :  { %2574 = vmatpush.msra.mxu2 %v556_v2  ;;  %672 = vmatpush.msra.mxu1 %v555_v3  ;;  %v1397_v7 = vsel %vm280_vm0, %v1331_v13, 0.0  ;;  %v1340_v13 = vmul.f32 %v3130_v52, %v3130_v52 }
  0x1e   :  { %2477 = vmatmul.msk.f32.gmra.mxu0 %vm280_vm0, %v2987_v21  ;;  %2494 = vmatmul.msk.f32.gmra.mxu3 %vm280_vm0, %v2992_v22 }
  0x1f   :  { %2575 = vmatpush.msra.mxu2 %v555_v3 }
  0x23   :  { %159 = vperm.xlu2 %2579, %v34_v23   ;;  %v1318_v23 = vmul.f32 %v3010_v26, %v3010_v26 }
  0x24   :  { %154 = vperm.xlu1 %2578, %v33_v24   ;;  %149 = vperm.xlu0 %2577, %v32_v25   ;;  %v1317_v24 = vmul.f32 %v2987_v21, %v2987_v21  ;;  %v68_v21 = vld [vmem:[%s5287_s1 + $0x80] sm:$0xff] }
  0x26   :  { %2478 = vmatmul.msk.f32.gmra.mxu0 %vm280_vm0, %v3010_v26  ;;  %2495 = vmatmul.msk.f32.gmra.mxu3 %vm280_vm0, %v3015_v27 }
  0x2b   :  { %174 = vperm.xlu2 %2579, %v37_v28   ;;  %v1370_v28 = vsel %vm280_vm0, %v1322_v6, 0.0 }
  0x2c   :  { %169 = vperm.xlu1 %2578, %v36_v29   ;;  %164 = vperm.xlu0 %2577, %v35_v30   ;;  %v3257_v29 = vperm.slane %v3231_v15, 1 }
  0x2e   :  { %2479 = vmatmul.msk.f32.gmra.mxu0 %vm280_vm0, %v3033_v31  ;;  %2496 = vmatmul.msk.f32.gmra.mxu3 %vm280_vm0, %v3038_v32 }
  0x33   :  { %189 = vperm.xlu2 %2579, %v40_v33   ;;  %v1358_v33 = vsel %vm280_vm0, %v1318_v23, 0.0 }
  0x34   :  { %184 = vperm.xlu1 %2578, %v39_v34   ;;  %179 = vperm.xlu0 %2577, %v38_v35   ;;  %v1355_v34 = vsel %vm280_vm0, %v1317_v24, 0.0 }
  0x36   :  { %2480 = vmatmul.msk.f32.gmra.mxu0 %vm280_vm0, %v3056_v36  ;;  %2497 = vmatmul.msk.f32.gmra.mxu3 %vm280_vm0, %v3061_v37 }
  0x3b   :  { %204 = vperm.xlu2 %2579, %v43_v38   ;;  %v1325_v38 = vmul.f32 %v63_v57, %v63_v57 }
  0x3c   :  { %199 = vperm.xlu1 %2578, %v42_v39   ;;  %194 = vperm.xlu0 %2577, %v41_v40   ;;  %v1321_v40 = vmul.f32 %v3079_v41, %v3079_v41 }
  0x3e   :  { %2481 = vmatmul.msk.f32.gmra.mxu0 %vm280_vm0, %v3079_v41  ;;  %2498 = vmatmul.msk.f32.gmra.mxu3 %vm280_vm0, %v3084_v42  ;;  %v1328_v41 = vmul.f32 %v66_v5, %v66_v5 }
  0x40   :  { %v1388_v2 = vsel %vm280_vm0, %v1328_v41, 0.0 }
  0x43   :  { %219 = vperm.xlu2 %2579, %v46_v43   ;;  %v1320_v43 = vmul.f32 %v3056_v36, %v3056_v36 }
  0x44   :  { %214 = vperm.xlu1 %2578, %v45_v44   ;;  %209 = vperm.xlu0 %2577, %v44_v45   ;;  %v1379_v45 = vsel %vm280_vm0, %v1325_v38, 0.0  ;;  %v1329_v38 = vmul.f32 %v3238_v19, %v3238_v19 }
  0x46   :  { %2482 = vmatmul.msk.f32.gmra.mxu0 %vm280_vm0, %v3102_v46  ;;  %2499 = vmatmul.msk.f32.gmra.mxu3 %vm280_vm0, %v3107_v47 }
  0x4b   :  { %234 = vperm.xlu2 %2579, %v49_v48  }
  0x4c   :  { %229 = vperm.xlu1 %2578, %v48_v49   ;;  %224 = vperm.xlu0 %2577, %v47_v50   ;;  %v1367_v49 = vsel %vm280_vm0, %v1321_v40, 0.0  ;;  %v1364_v50 = vsel %vm280_vm0, %v1320_v43, 0.0 }
  0x4e   :  { %2483 = vmatmul.msk.f32.gmra.mxu0 %vm280_vm0, %v3125_v51  ;;  %2500 = vmatmul.msk.f32.gmra.mxu3 %vm280_vm0, %v3130_v52  ;;  %v1424_v52 = vsel %vm280_vm0, %v1340_v13, 0.0 }
  0x54   :  { %244 = vperm.xlu1 %2578, %v51_v53   ;;  %239 = vperm.xlu0 %2577, %v50_v54  }
  0x56   :  { %2484 = vmatmul.msk.f32.gmra.mxu0 %vm280_vm0, %v3145_v55  ;;  %2501 = vmatmul.msk.f32.gmra.mxu3 %vm280_vm0, %v3150_v56 }
  0x5d   :  { %v3259_v30 = vpop.permute.xlu2 %109 }
  0x5e   :  { %2485 = vmatmul.msk.f32.gmra.mxu0 %vm280_vm0, %v63_v57  ;;  %2502 = vmatmul.msk.f32.gmra.mxu3 %vm280_vm0, %v3162_v58 }
  0x65   :  { %v3281_v54 = vpop.permute.xlu2 %114 }
  0x66   :  { %2486 = vmatmul.msk.f32.gmra.mxu0 %vm280_vm0, %v3170_v59  ;;  %2503 = vmatmul.msk.f32.gmra.mxu3 %vm280_vm0, %v3175_v60  ;;  %v253_v1 = vmul.f32 %v3243_v11, %v3281_v54 }
  0x6d   :  { %v3299_v51 = vpop.permute.xlu2 %129 }
  0x6e   :  { %2487 = vmatmul.msk.f32.gmra.mxu0 %vm280_vm0, %v3187_v62  ;;  %2504 = vmatmul.msk.f32.gmra.mxu3 %vm280_vm0, %v3192_v63 }
  0x74   :  { %1353 = vadd.xlane.f32.xlu2 %v1352_v4 }
  0x76   :  { %2488 = vmatmul.msk.f32.gmra.mxu0 %vm280_vm0, %v66_v5  ;;  %2505 = vmatmul.msk.f32.gmra.mxu3 %vm280_vm0, %v3216_v8  ;;  %v3245_v20 = vpop.permute.xlu0 %89  ;;  %v3263_v35 = vpop.permute.xlu1 %99  ;;  %v1376_v5 = vsel %vm280_vm0, %v1324_v0, 0.0 }
  0x77   :  { %v248_v25 = vmul.f32 %v3243_v11, %v3245_v20  ;;  %v250_v3 = vmul.f32 %v3243_v11, %v3263_v35 }
  0x7c   :  { %1362 = vadd.xlane.f32.xlu2 %v1361_v14 }
  0x7e   :  { %1350 = vadd.xlane.f32.xlu1 %v1349_v16  ;;  %1347 = vadd.xlane.f32.xlu0 %v1346_v18  ;;  %v3274_v44 = vpop.permute.xlu0 %94  ;;  %v3283_v36 = vpop.permute.xlu1 %104  ;;  %v1327_v16 = vmul.f32 %v3187_v62, %v3187_v62  ;;  %v1326_v18 = vmul.f32 %v3170_v59, %v3170_v59  ;;  %v1334_v59 = vmul.f32 %v2992_v22, %v2992_v22 }
  0x7f   :  { %2489 = vmatmul.msk.f32.gmra.mxu0 %vm280_vm0, %v3238_v19  ;;  %v249_v46 = vmul.f32 %v3243_v11, %v3274_v44  ;;  %v251_v24 = vmul.f32 %v3243_v11, %v3283_v36  ;;  %v252_v22 = vmul.f32 %v3243_v11, %v3259_v30 }
  0x80   :  { %v1406_v40 = vsel %vm280_vm0, %v1334_v59, 0.0 }
  0x83   :  { %v394_v31 = vpop.f32.mrf.mxu0 }
  0x84   :  { %v395_v26 = vadd.f32 %v394_v31, %v248_v25  ;;  %1371 = vadd.xlane.f32.xlu2 %v1370_v28  ;;  %v1385_v28 = vsel %vm280_vm0, %v1327_v16, 0.0  ;;  %v1382_v31 = vsel %vm280_vm0, %v1326_v18, 0.0  ;;  %v1336_v18 = vmul.f32 %v3038_v32, %v3038_v32 }
  0x86   :  { %v491_v39 = vadd.f32 %v3257_v29, %v395_v26  ;;  %1359 = vadd.xlane.f32.xlu1 %v1358_v33  ;;  %1356 = vadd.xlane.f32.xlu0 %v1355_v34  ;;  %v3306_v6 = vpop.permute.xlu1 %124  ;;  %v3308_v23 = vpop.permute.xlu0 %119  ;;  %v1330_v26 = vmul.f32 %v68_v21, %v68_v21 }
  0x87   :  { %2490 = vmatmul.msk.f32.gmra.mxu0 %vm280_vm0, %v68_v21 }
  0x88   :  { %2580 = vtanh.f32 %v491_v39  ;;  %v3321_v39 = vpop.permute.xlu2 %144  ;;  %v1394_v21 = vsel %vm280_vm0, %v1330_v26, 0.0 }
  0x89   :  { %v3324_v43 = vpop.f32.mrf.mxu3 }
  0x8b   :  { %v397_v48 = vpop.f32.mrf.mxu0 }
  0x8c   :  { %v398_v53 = vadd.f32 %v397_v48, %v249_v46  ;;  %1380 = vadd.xlane.f32.xlu2 %v1379_v45 }
  0x8e   :  { %v2581_v57 = vpop.eup %2580  ;;  %v492_v61 = vadd.f32 %v3257_v29, %v398_v53  ;;  %1368 = vadd.xlane.f32.xlu1 %v1367_v49  ;;  %1365 = vadd.xlane.f32.xlu0 %v1364_v50  ;;  %v3326_v45 = vpop.permute.xlu1 %139  ;;  %v1391_v49 = vsel %vm280_vm0, %v1329_v38, 0.0  ;;  %v1337_v50 = vmul.f32 %v3061_v37, %v3061_v37 }
  0x8f   :  { %2506 = vmatmul.msk.f32.vlgmr.msra.gmra.mxu1 %vm560_vm1, %v2581_v57  ;;  %v3330_v46 = vpop.permute.xlu0 %134  ;;  %v1333_v57 = vmul.f32 %v2969_v17, %v2969_v17 }
  0x90   :  { %2582 = vtanh.f32 %v492_v61  ;;  %v1332_v61 = vmul.f32 %v2946_v12, %v2946_v12  ;;  %v1415_v0 = vsel %vm280_vm0, %v1337_v50, 0.0  ;;  %v3345_v37 = vpop.permute.xlu2 %159 }
  0x91   :  { %v3352_v17 = vpop.f32.mrf.mxu3 }
  0x93   :  { %v400_v4 = vpop.f32.mrf.mxu0 }
  0x94   :  { %v401_v10 = vadd.f32 %v400_v4, %v250_v3  ;;  %1389 = vadd.xlane.f32.xlu2 %v1388_v2  ;;  %v1403_v3 = vsel %vm280_vm0, %v1333_v57, 0.0  ;;  %v1400_v4 = vsel %vm280_vm0, %v1332_v61, 0.0 }
  0x96   :  { %v2583_v55 = vpop.eup %2582  ;;  %v493_v14 = vadd.f32 %v3257_v29, %v401_v10  ;;  %1377 = vadd.xlane.f32.xlu1 %v1376_v5  ;;  %1374 = vadd.xlane.f32.xlu0 %v1373_v9  ;;  %v3350_v5 = vperm.slane %v3231_v15, 2  ;;  %v3354_v9 = vpop.permute.xlu1 %154 }
  0x97   :  { %2507 = vmatmul.msk.f32.gmra.mxu1 %vm560_vm1, %v2583_v55  ;;  %v3356_v10 = vpop.permute.xlu0 %149 }
  0x98   :  { %2584 = vtanh.f32 %v493_v14  ;;  %v1859_v14 = vmul.f32 %v3350_v5, %v3245_v20  ;;  %v3377_v59 = vpop.permute.xlu2 %174 }
  0x99   :  { %v3383_v26 = vpop.f32.mrf.mxu3 }
  0x9b   :  { %v403_v25 = vpop.f32.mrf.mxu0 }
  0x9c   :  { %v404_v33 = vadd.f32 %v403_v25, %v251_v24  ;;  %1398 = vadd.xlane.f32.xlu2 %v1397_v7  ;;  %v1335_v7 = vmul.f32 %v3015_v27, %v3015_v27  ;;  %v3369_v24 = vperm.slane %v3231_v15, 3  ;;  %v254_v25 = vmul.f32 %v3243_v11, %v3308_v23 }
  0x9d   :  { %v1343_v27 = vmul.f32 %v3175_v60, %v3175_v60  ;;  %v1339_v60 = vmul.f32 %v3107_v47, %v3107_v47  ;;  %v1861_v47 = vmul.f32 %v3350_v5, %v3263_v35 }
  0x9e   :  { %v2585_v62 = vpop.eup %2584  ;;  %v494_v34 = vadd.f32 %v3257_v29, %v404_v33  ;;  %1386 = vadd.xlane.f32.xlu1 %v1385_v28  ;;  %1383 = vadd.xlane.f32.xlu0 %v1382_v31  ;;  %v1892_v20 = vadd.f32 %v3369_v24, %v1859_v14  ;;  %v1412_v31 = vsel %vm280_vm0, %v1336_v18, 0.0  ;;  %v1409_v33 = vsel %vm280_vm0, %v1335_v7, 0.0  ;;  %v3385_v38 = vpop.permute.xlu1 %169 }
  0x9f   :  { %2508 = vmatmul.msk.f32.gmra.mxu1 %vm560_vm1, %v2585_v62  ;;  %v1421_v50 = vsel %vm280_vm0, %v1339_v60, 0.0 }
  0xa0   :  { %2586 = vtanh.f32 %v494_v34  ;;  %v1862_v34 = vmul.f32 %v3350_v5, %v3283_v36  ;;  %v1433_v36 = vsel %vm280_vm0, %v1343_v27, 0.0 }
  0xa3   :  { %v406_v48 = vpop.f32.mrf.mxu0 }
  0xa4   :  { %v407_v19 = vadd.f32 %v406_v48, %v252_v22  ;;  %1407 = vadd.xlane.f32.xlu2 %v1406_v40  ;;  %v3388_v22 = vpop.permute.xlu0 %164  ;;  %v1338_v48 = vmul.f32 %v3084_v42, %v3084_v42  ;;  %v3404_v42 = vperm.slane %v3231_v15, 4 }
  0xa6   :  { %v2587_v53 = vpop.eup %2586  ;;  %v495_v41 = vadd.f32 %v3257_v29, %v407_v19  ;;  %1395 = vadd.xlane.f32.xlu1 %v1394_v21  ;;  %1392 = vadd.xlane.f32.xlu0 %v1391_v49  ;;  %v1895_v21 = vadd.f32 %v3369_v24, %v1862_v34  ;;  %v255_v49 = vmul.f32 %v3243_v11, %v3306_v6  ;;  %v3421_v13 = vpop.permute.xlu1 %184 }
  0xa7   :  { %2509 = vmatmul.msk.f32.gmra.mxu1 %vm560_vm1, %v2587_v53  ;;  %v1418_v53 = vsel %vm280_vm0, %v1338_v48, 0.0  ;;  %v1344_v34 = vmul.f32 %v3192_v63, %v3192_v63 }
  0xa8   :  { %2588 = vtanh.f32 %v495_v41 }
  0xab   :  { %v409_v2 = vpop.f32.mrf.mxu0 }
  0xac   :  { %v410_v12 = vadd.f32 %v409_v2, %v253_v1  ;;  %1416 = vadd.xlane.f32.xlu2 %v1415_v0  ;;  %v1865_v0 = vmul.f32 %v3350_v5, %v3308_v23  ;;  %v1860_v2 = vmul.f32 %v3350_v5, %v3274_v44  ;;  %v3419_v23 = vpop.f32.mrf.mxu3  ;;  %v3424_v44 = vpop.permute.xlu0 %179 }
  0xae   :  { %v2589_v55 = vpop.eup %2588  ;;  %v496_v16 = vadd.f32 %v3257_v29, %v410_v12  ;;  %1404 = vadd.xlane.f32.xlu1 %v1403_v3  ;;  %1401 = vadd.xlane.f32.xlu0 %v1400_v4  ;;  %v3411_v3 = vpop.permute.xlu2 %189  ;;  %v1342_v4 = vmul.f32 %v3162_v58, %v3162_v58  ;;  %v1341_v12 = vmul.f32 %v3150_v56, %v3150_v56 }
  0xaf   :  { %2510 = vmatmul.msk.f32.gmra.mxu1 %vm560_vm1, %v2589_v55  ;;  %v1894_v55 = vadd.f32 %v3369_v24, %v1861_v47  ;;  %v1898_v14 = vadd.f32 %v3369_v24, %v1865_v0  ;;  %v1893_v18 = vadd.f32 %v3369_v24, %v1860_v2 }
  0xb0   :  { %2590 = vtanh.f32 %v496_v16  ;;  %v256_v16 = vmul.f32 %v3243_v11, %v3299_v51  ;;  %v1430_v56 = vsel %vm280_vm0, %v1342_v4, 0.0 }
  0xb1   :  { %2592 = vtanh.f32 %v1892_v20 }
  0xb3   :  { %v412_v28 = vpop.f32.mrf.mxu0 }
  0xb4   :  { %v413_v32 = vadd.f32 %v412_v28, %v254_v25  ;;  %1425 = vadd.xlane.f32.xlu2 %v1424_v52  ;;  %v1427_v52 = vsel %vm280_vm0, %v1341_v12, 0.0  ;;  %v1863_v28 = vmul.f32 %v3350_v5, %v3259_v30  ;;  %v1345_v30 = vmul.f32 %v3216_v8, %v3216_v8  ;;  %v3450_v48 = vpop.f32.mrf.mxu3 }
  0xb6   :  { %v2591_v62 = vpop.eup %2590  ;;  %v497_v40 = vadd.f32 %v3257_v29, %v413_v32  ;;  %1413 = vadd.xlane.f32.xlu1 %v1412_v31  ;;  %1410 = vadd.xlane.f32.xlu0 %v1409_v33  ;;  %v1864_v33 = vmul.f32 %v3350_v5, %v3281_v54  ;;  %v1868_v32 = vmul.f32 %v3350_v5, %v3330_v46 }
  0xb7   :  { %2511 = vmatmul.msk.f32.gmra.mxu1 %vm560_vm1, %v2591_v62  ;;  %v2593_v41 = vpop.eup %2592  ;;  %v1896_v54 = vadd.f32 %v3369_v24, %v1863_v28 }
  0xb8   :  { %2594 = vtanh.f32 %v497_v40  ;;  %v1957_v35 = vmul.f32 %v2593_v41, %v3404_v42  ;;  %v3447_v40 = vpop.permute.xlu2 %204  ;;  %v1901_v60 = vadd.f32 %v3369_v24, %v1868_v32  ;;  %v1897_v8 = vadd.f32 %v3369_v24, %v1864_v33 }
  0xb9   :  { %2596 = vtanh.f32 %v1895_v21  ;;  %v257_v21 = vmul.f32 %v3243_v11, %v3330_v46  ;;  %v1436_v41 = vsel %vm280_vm0, %v1344_v34, 0.0  ;;  %v1867_v46 = vmul.f32 %v3350_v5, %v3299_v51 }
  0xba   :  { %v1989_v7 = vsel %vm560_vm1, %v1957_v35, 0.0  ;;  %v1866_v35 = vmul.f32 %v3350_v5, %v3306_v6  ;;  %v1874_v34 = vmul.f32 %v3350_v5, %v3388_v22 }
  0xbb   :  { %v415_v19 = vpop.f32.mrf.mxu0  ;;  %v1900_v51 = vadd.f32 %v3369_v24, %v1867_v46 }
  0xbc   :  { %v416_v57 = vadd.f32 %v415_v19, %v255_v49  ;;  %1434 = vadd.xlane.f32.xlu2 %v1433_v36  ;;  %v3452_v36 = vpop.permute.xlu1 %199  ;;  %v3457_v19 = vpop.permute.xlu0 %194 }
  0xbe   :  { %v2595_v61 = vpop.eup %2594  ;;  %v498_v1 = vadd.f32 %v3257_v29, %v416_v57  ;;  %1422 = vadd.xlane.f32.xlu1 %v1421_v50  ;;  %1419 = vadd.xlane.f32.xlu0 %v1418_v53  ;;  %v1439_v53 = vsel %vm280_vm0, %v1345_v30, 0.0 }
  0xbf   :  { %2512 = vmatmul.msk.f32.gmra.mxu1 %vm560_vm1, %v2595_v61  ;;  %v2597_v20 = vpop.eup %2596 }
  0xc0   :  { %2598 = vtanh.f32 %v498_v1  ;;  %v1960_v62 = vmul.f32 %v2597_v20, %v3404_v42  ;;  %v1871_v1 = vmul.f32 %v3350_v5, %v3356_v10  ;;  %v3481_v20 = vpop.f32.mrf.mxu3 }
  0xc1   :  { %2600 = vtanh.f32 %v1894_v55 }
  0xc2   :  { %2602 = vtanh.f32 %v1898_v14  ;;  %v1998_v50 = vsel %vm560_vm1, %v1960_v62, 0.0  ;;  %v1904_v14 = vadd.f32 %v3369_v24, %v1871_v1  ;;  %v1873_v1 = vmul.f32 %v3350_v5, %v3345_v37 }
  0xc3   :  { %v418_v58 = vpop.f32.mrf.mxu0  ;;  %2604 = vtanh.f32 %v1893_v18 }
  0xc4   :  { %v419_v25 = vadd.f32 %v418_v58, %v256_v16  ;;  %1990 = vadd.xlane.f32.xlu2 %v1989_v7  ;;  %v258_v16 = vmul.f32 %v3243_v11, %v3326_v45  ;;  %v1899_v58 = vadd.f32 %v3369_v24, %v1866_v35  ;;  %v3485_v33 = vpop.permute.xlu1 %214  ;;  %v3487_v32 = vpop.permute.xlu0 %209 }
  0xc6   :  { %v2599_v31 = vpop.eup %2598  ;;  %v499_v27 = vadd.f32 %v3257_v29, %v419_v25  ;;  %1431 = vadd.xlane.f32.xlu1 %v1430_v56  ;;  %1428 = vadd.xlane.f32.xlu0 %v1427_v52  ;;  %v3479_v52 = vpop.permute.xlu2 %219 }
  0xc7   :  { %2513 = vmatmul.msk.f32.gmra.mxu1 %vm560_vm1, %v2599_v31  ;;  %v2601_v49 = vpop.eup %2600  ;;  %v1870_v31 = vmul.f32 %v3350_v5, %v3321_v39 }
  0xc8   :  { %2606 = vtanh.f32 %v499_v27  ;;  %v2603_v57 = vpop.eup %2602  ;;  %v1959_v12 = vmul.f32 %v2601_v49, %v3404_v42 }
  0xc9   :  { %v2605_v61 = vpop.eup %2604  ;;  %2608 = vtanh.f32 %v1896_v54  ;;  %v1963_v4 = vmul.f32 %v2603_v57, %v3404_v42  ;;  %v1903_v49 = vadd.f32 %v3369_v24, %v1870_v31 }
  0xca   :  { %2610 = vtanh.f32 %v1901_v60  ;;  %v1958_v55 = vmul.f32 %v2605_v61, %v3404_v42  ;;  %v1995_v27 = vsel %vm560_vm1, %v1959_v12, 0.0  ;;  %v1869_v60 = vmul.f32 %v3350_v5, %v3326_v45  ;;  %v3514_v12 = vpop.f32.mrf.mxu3 }
  0xcb   :  { %v421_v63 = vpop.f32.mrf.mxu0  ;;  %2612 = vtanh.f32 %v1897_v8  ;;  %v2007_v7 = vsel %vm560_vm1, %v1963_v4, 0.0 }
  0xcc   :  { %v422_v47 = vadd.f32 %v421_v63, %v257_v21  ;;  %1999 = vadd.xlane.f32.xlu2 %v1998_v50  ;;  %v1992_v62 = vsel %vm560_vm1, %v1958_v55, 0.0  ;;  %v1907_v50 = vadd.f32 %v3369_v24, %v1874_v34  ;;  %v1902_v57 = vadd.f32 %v3369_v24, %v1869_v60 }
  0xce   :  { %v2607_v0 = vpop.eup %2606  ;;  %v500_v2 = vadd.f32 %v3257_v29, %v422_v47  ;;  %1440 = vadd.xlane.f32.xlu1 %v1439_v53  ;;  %1437 = vadd.xlane.f32.xlu0 %v1436_v41  ;;  %v259_v53 = vmul.f32 %v3243_v11, %v3321_v39  ;;  %v3510_v39 = vpop.permute.xlu2 %234 }
  0xcf   :  { %2514 = vmatmul.msk.f32.gmra.mxu1 %vm560_vm1, %v2607_v0  ;;  %v2609_v18 = vpop.eup %2608 }
  0xd0   :  { %2614 = vtanh.f32 %v500_v2  ;;  %v2611_v56 = vpop.eup %2610  ;;  %v1961_v63 = vmul.f32 %v2609_v18, %v3404_v42  ;;  %v3521_v18 = vpop.permute.xlu0 %224 }
  0xd1   :  { %v2613_v28 = vpop.eup %2612  ;;  %2616 = vtanh.f32 %v1900_v51  ;;  %v1966_v21 = vmul.f32 %v2611_v56, %v3404_v42  ;;  %v1877_v51 = vmul.f32 %v3350_v5, %v3424_v44 }
  0xd2   :  { %2618 = vtanh.f32 %v1904_v14  ;;  %v1962_v8 = vmul.f32 %v2613_v28, %v3404_v42  ;;  %v2001_v35 = vsel %vm560_vm1, %v1961_v63, 0.0  ;;  %v1872_v14 = vmul.f32 %v3350_v5, %v3354_v9 }
  0xd3   :  { %v424_v6 = vpop.f32.mrf.mxu0  ;;  %2620 = vtanh.f32 %v1899_v58  ;;  %v2016_v47 = vsel %vm560_vm1, %v1966_v21, 0.0  ;;  %v260_v28 = vmul.f32 %v3243_v11, %v3356_v10  ;;  %v1876_v21 = vmul.f32 %v3350_v5, %v3377_v59 }
  0xd4   :  { %v425_v25 = vadd.f32 %v424_v6, %v258_v16  ;;  %2008 = vadd.xlane.f32.xlu2 %v2007_v7  ;;  %v2004_v2 = vsel %vm560_vm1, %v1962_v8, 0.0  ;;  %v3519_v16 = vpop.permute.xlu1 %229  ;;  %v1906_v6 = vadd.f32 %v3369_v24, %v1873_v1  ;;  %v1880_v10 = vmul.f32 %v3350_v5, %v3457_v19 }
  0xd6   :  { %v2615_v30 = vpop.eup %2614  ;;  %v501_v54 = vadd.f32 %v3257_v29, %v425_v25  ;;  %1996 = vadd.xlane.f32.xlu1 %v1995_v27  ;;  %1993 = vadd.xlane.f32.xlu0 %v1992_v62  ;;  %v1910_v25 = vadd.f32 %v3369_v24, %v1877_v51  ;;  %v1905_v27 = vadd.f32 %v3369_v24, %v1872_v14 }
  0xd7   :  { %2515 = vmatmul.msk.f32.gmra.mxu1 %vm560_vm1, %v2615_v30  ;;  %v2617_v41 = vpop.eup %2616 }
  0xd8   :  { %2622 = vtanh.f32 %v501_v54  ;;  %v2619_v61 = vpop.eup %2618  ;;  %v1965_v7 = vmul.f32 %v2617_v41, %v3404_v42 }
  0xd9   :  { %v2621_v0 = vpop.eup %2620  ;;  %2624 = vtanh.f32 %v1903_v49  ;;  %v1969_v58 = vmul.f32 %v2619_v61, %v3404_v42 }
  0xda   :  { %2626 = vtanh.f32 %v1907_v50  ;;  %v1964_v56 = vmul.f32 %v2621_v0, %v3404_v42  ;;  %v2013_v49 = vsel %vm560_vm1, %v1965_v7, 0.0 }
  0xdb   :  { %v427_v45 = vpop.f32.mrf.mxu0  ;;  %2628 = vtanh.f32 %v1902_v57  ;;  %v2025_v30 = vsel %vm560_vm1, %v1969_v58, 0.0 }
  0xdc   :  { %v428_v46 = vadd.f32 %v427_v45, %v259_v53  ;;  %2017 = vadd.xlane.f32.xlu2 %v2016_v47  ;;  %v2010_v8 = vsel %vm560_vm1, %v1964_v56, 0.0  ;;  %v1875_v53 = vmul.f32 %v3350_v5, %v3385_v38  ;;  %v3546_v45 = vpop.f32.mrf.mxu3  ;;  %v1909_v47 = vadd.f32 %v3369_v24, %v1876_v21  ;;  %v3549_v61 = vpop.permute.xlu1 %244 }
  0xdd   :  { %v1879_v56 = vmul.f32 %v3350_v5, %v3411_v3 }
  0xde   :  { %v2623_v4 = vpop.eup %2622  ;;  %v502_v55 = vadd.f32 %v3257_v29, %v428_v46  ;;  %2005 = vadd.xlane.f32.xlu1 %v2004_v2  ;;  %2002 = vadd.xlane.f32.xlu0 %v2001_v35  ;;  %v3551_v46 = vpop.permute.xlu0 %239  ;;  %v261_v2 = vmul.f32 %v3243_v11, %v3354_v9  ;;  %v1913_v35 = vadd.f32 %v3369_v24, %v1880_v10 }
  0xdf   :  { %2516 = vmatmul.msk.f32.gmra.mxu1 %vm560_vm1, %v2623_v4  ;;  %v2625_v31 = vpop.eup %2624  ;;  %v1908_v51 = vadd.f32 %v3369_v24, %v1875_v53 }
  0xe0   :  { %2630 = vtanh.f32 %v502_v55  ;;  %v2627_v34 = vpop.eup %2626  ;;  %v1968_v0 = vmul.f32 %v2625_v31, %v3404_v42  ;;  %v1883_v31 = vmul.f32 %v3350_v5, %v3487_v32 }
  0xe1   :  { %v2629_v60 = vpop.eup %2628  ;;  %2632 = vtanh.f32 %v1906_v6  ;;  %v1972_v57 = vmul.f32 %v2627_v34, %v3404_v42 }
  0xe2   :  { %2634 = vtanh.f32 %v1910_v25  ;;  %v1967_v1 = vmul.f32 %v2629_v60, %v3404_v42  ;;  %v2022_v25 = vsel %vm560_vm1, %v1968_v0, 0.0  ;;  %v1916_v10 = vadd.f32 %v3369_v24, %v1883_v31 }
  0xe3   :  { %v430_v62 = vpop.f32.mrf.mxu0  ;;  %2636 = vtanh.f32 %v1905_v27  ;;  %v2034_v14 = vsel %vm560_vm1, %v1972_v57, 0.0 }
  0xe4   :  { %v431_v54 = vadd.f32 %v430_v62, %v260_v28  ;;  %2026 = vadd.xlane.f32.xlu2 %v2025_v30  ;;  %v2019_v9 = vsel %vm560_vm1, %v1967_v1, 0.0  ;;  %v1878_v62 = vmul.f32 %v3350_v5, %v3421_v13 }
  0xe6   :  { %v2631_v63 = vpop.eup %2630  ;;  %v503_v50 = vadd.f32 %v3257_v29, %v431_v54  ;;  %2014 = vadd.xlane.f32.xlu1 %v2013_v49  ;;  %2011 = vadd.xlane.f32.xlu0 %v2010_v8  ;;  %v1912_v54 = vadd.f32 %v3369_v24, %v1879_v56  ;;  %v1911_v57 = vadd.f32 %v3369_v24, %v1878_v62 }
  0xe7   :  { %v3542_v41 = vpop.xlane.xlu2 %1353  ;;  %2517 = vmatmul.msk.f32.gmra.mxu1 %vm560_vm1, %v2631_v63  ;;  %v2633_v4 = vpop.eup %2632  ;;  %v262_v63 = vmul.f32 %v3243_v11, %v3345_v37  ;;  %v263_v62 = vmul.f32 %v3243_v11, %v3388_v22 }
  0xe8   :  { %2638 = vtanh.f32 %v503_v50  ;;  %v2635_v58 = vpop.eup %2634  ;;  %v1971_v49 = vmul.f32 %v2633_v4, %v3404_v42  ;;  %v3583_v50 = vpop.f32.mrf.mxu3  ;;  %vm1468_vm2 = vweird.f32 %v3542_v41 }
  0xe9   :  { %v2637_v7 = vpop.eup %2636  ;;  %2640 = vtanh.f32 %v1909_v47  ;;  %v1975_v34 = vmul.f32 %v2635_v58, %v3404_v42 }
  0xea   :  { %2642 = vtanh.f32 %v1913_v35  ;;  %v1970_v8 = vmul.f32 %v2637_v7, %v3404_v42  ;;  %v2031_v4 = vsel %vm560_vm1, %v1971_v49, 0.0  ;;  %v1881_v7 = vmul.f32 %v3350_v5, %v3452_v36 }
  0xeb   :  { %v433_v55 = vpop.f32.mrf.mxu0  ;;  %2644 = vtanh.f32 %v1908_v51  ;;  %v2043_v0 = vsel %vm560_vm1, %v1975_v34, 0.0 }
  0xec   :  { %v434_v6 = vadd.f32 %v433_v55, %v261_v2  ;;  %2035 = vadd.xlane.f32.xlu2 %v2034_v14  ;;  %v2028_v51 = vsel %vm560_vm1, %v1970_v8, 0.0  ;;  %v1882_v14 = vmul.f32 %v3350_v5, %v3447_v40  ;;  %v1914_v49 = vadd.f32 %v3369_v24, %v1881_v7 }
  0xee   :  { %v2639_v28 = vpop.eup %2638  ;;  %v504_v27 = vadd.f32 %v3257_v29, %v434_v6  ;;  %2023 = vadd.xlane.f32.xlu1 %v2022_v25  ;;  %2020 = vadd.xlane.f32.xlu0 %v2019_v9 }
  0xef   :  { %v3569_v30 = vpop.xlane.xlu2 %1362  ;;  %2518 = vmatmul.msk.f32.gmra.mxu1 %vm560_vm1, %v2639_v28  ;;  %v2641_v53 = vpop.eup %2640 }
  0xf0   :  { %5319 = vst [vmem:[#allocation2_spill] sm:$0xff] %v3569_v30  ;;  %2646 = vtanh.f32 %v504_v27  ;;  %v2643_v1 = vpop.eup %2642  ;;  %v1974_v9 = vmul.f32 %v2641_v53, %v3404_v42  ;;  %v1915_v27 = vadd.f32 %v3369_v24, %v1882_v14  ;;  %v3609_v8 = vpop.f32.mrf.mxu3  ;;  %v264_v14 = vmul.f32 %v3243_v11, %v3385_v38 }
  0xf1   :  { %v3574_v60 = vpop.xlane.xlu1 %1350  ;;  %v3576_v21 = vpop.xlane.xlu0 %1347  ;;  %2648 = vtanh.f32 %v1912_v54  ;;  %v1978_v6 = vmul.f32 %v2643_v1, %v3404_v42 }
  0xf2   :  { %v2645_v35 = vpop.eup %2644  ;;  %2650 = vtanh.f32 %v1916_v10  ;;  %v2040_v53 = vsel %vm560_vm1, %v1974_v9, 0.0  ;;  %vm1448_vm5 = vweird.f32 %v3576_v21  ;;  %vm1458_vm7 = vweird.f32 %v3574_v60 }
  0xf3   :  { %v436_v47 = vpop.f32.mrf.mxu0  ;;  %2652 = vtanh.f32 %v1911_v57  ;;  %v1973_v28 = vmul.f32 %v2645_v35, %v3404_v42  ;;  %v2052_v34 = vsel %vm560_vm1, %v1978_v6, 0.0  ;;  %v1885_v35 = vmul.f32 %v3350_v5, %v3479_v52 }
  0xf4   :  { %v437_v2 = vadd.f32 %v436_v47, %v262_v63  ;;  %2044 = vadd.xlane.f32.xlu2 %v2043_v0 }
  0xf5   :  { %v2037_v47 = vsel %vm560_vm1, %v1973_v28, 0.0  ;;  %v1918_v7 = vadd.f32 %v3369_v24, %v1885_v35  ;;  %v267_v35 = vmul.f32 %v3243_v11, %v3421_v13 }
  0xf6   :  { %v2647_v37 = vpop.eup %2646  ;;  %v505_v55 = vadd.f32 %v3257_v29, %v437_v2  ;;  %2032 = vadd.xlane.f32.xlu1 %v2031_v4  ;;  %2029 = vadd.xlane.f32.xlu0 %v2028_v51 }
  0xf7   :  { %v3592_v58 = vpop.xlane.xlu2 %1371  ;;  %2519 = vmatmul.msk.f32.gmra.mxu1 %vm560_vm1, %v2647_v37  ;;  %v2649_v31 = vpop.eup %2648 }
  0xf8   :  { %5320 = vst [vmem:[#allocation3_spill] sm:$0xff] %v3592_v58  ;;  %2654 = vtanh.f32 %v505_v55  ;;  %v2651_v54 = vpop.eup %2650  ;;  %v1977_v37 = vmul.f32 %v2649_v31, %v3404_v42 }
  0xf9   :  { %v3598_v56 = vpop.xlane.xlu1 %1359  ;;  %v3600_v25 = vpop.xlane.xlu0 %1356  ;;  %2656 = vtanh.f32 %v1915_v27  ;;  %v1981_v2 = vmul.f32 %v2651_v54, %v3404_v42  ;;  %v265_v27 = vmul.f32 %v3243_v11, %v3377_v59  ;;  %v1886_v59 = vmul.f32 %v3350_v5, %v3521_v18 }
  0xfa   :  { %v2653_v10 = vpop.eup %2652  ;;  %2658 = vtanh.f32 %v1914_v49  ;;  %v3634_v49 = vpop.f32.mrf.mxu3  ;;  %vm1478_vm11 = vweird.f32 %v3600_v25 }
  0xfb   :  { %v1976_v55 = vmul.f32 %v2653_v10, %v3404_v42  ;;  %v2061_v6 = vsel %vm560_vm1, %v1981_v2, 0.0  ;;  %v446_v38 = vadd.f32 %v3324_v43, %v265_v27  ;;  %v1888_v2 = vmul.f32 %v3350_v5, %v3510_v39 }
  0xfc   :  { %v439_v63 = vpop.f32.mrf.mxu0  ;;  %2053 = vadd.xlane.f32.xlu2 %v2052_v34  ;;  %v2049_v34 = vsel %vm560_vm1, %v1977_v37, 0.0  ;;  %v3656_v37 = vperm.slane %v3231_v15, 5 }
  0xfd   :  { %v440_v57 = vadd.f32 %v439_v63, %v263_v62  ;;  %v2046_v31 = vsel %vm560_vm1, %v1976_v55, 0.0  ;;  %v1921_v15 = vadd.f32 %v3369_v24, %v1888_v2  ;;  %v1887_v2 = vmul.f32 %v3350_v5, %v3519_v16 }
  0xfe   :  { %v2655_v0 = vpop.eup %2654  ;;  %2041 = vadd.xlane.f32.xlu1 %v2040_v53  ;;  %2038 = vadd.xlane.f32.xlu0 %v2037_v47  ;;  %v268_v53 = vmul.f32 %v3243_v11, %v3411_v3  ;;  %5322 = vst [vmem:[#allocation5_spill] sm:$0xff] %v3656_v37  ;;  %v508_v3 = vadd.f32 %v3257_v29, %v446_v38 }
  0xff   :  { %v506_v22 = vadd.f32 %v3257_v29, %v440_v57  ;;  %v3614_v1 = vpop.xlane.xlu2 %1380  ;;  %2520 = vmatmul.msk.f32.gmra.mxu1 %vm560_vm1, %v2655_v0  ;;  %v2657_v28 = vpop.eup %2656 }
 0x100   :  { %v2659_v54 = vpop.eup %2658  ;;  %v455_v55 = vadd.f32 %v3419_v23, %v268_v53 }
 0x101   :  { %v3620_v4 = vpop.xlane.xlu1 %1368  ;;  %v3622_v51 = vpop.xlane.xlu0 %1365  ;;  %2660 = vtanh.f32 %v506_v22  ;;  %v1980_v22 = vmul.f32 %v2657_v28, %v3404_v42  ;;  %v1979_v43 = vmul.f32 %v2659_v54, %v3404_v42 }
 0x102   :  { %5321 = vst [vmem:[#allocation4_spill] sm:$0xff] %v3620_v4  ;;  %2662 = vtanh.f32 %v1918_v7  ;;  %v1919_v7 = vadd.f32 %v3369_v24, %v1886_v59  ;;  %v1889_v59 = vmul.f32 %v3350_v5, %v3551_v46  ;;  %vm1508_vm12 = vweird.f32 %v3622_v51 }
 0x103   :  { %v2058_v13 = vsel %vm560_vm1, %v1980_v22, 0.0  ;;  %v2055_v28 = vsel %vm560_vm1, %v1979_v43, 0.0 }
 0x104   :  { %v442_v9 = vpop.f32.mrf.mxu0  ;;  %2062 = vadd.xlane.f32.xlu2 %v2061_v6  ;;  %v1884_v6 = vmul.f32 %v3350_v5, %v3485_v33 }
 0x105   :  { %v443_v62 = vadd.f32 %v442_v9, %v264_v14  ;;  %v266_v14 = vmul.f32 %v3243_v11, %v3424_v44 }
 0x106   :  { %2050 = vadd.xlane.f32.xlu1 %v2049_v34  ;;  %2047 = vadd.xlane.f32.xlu0 %v2046_v31  ;;  %v511_v34 = vadd.f32 %v3257_v29, %v455_v55  ;;  %v1917_v38 = vadd.f32 %v3369_v24, %v1884_v6  ;;  %v1890_v55 = vmul.f32 %v3350_v5, %v3549_v61 }
 0x107   :  { %v507_v63 = vadd.f32 %v3257_v29, %v443_v62  ;;  %v3638_v10 = vpop.xlane.xlu2 %1389  ;;  %v2661_v57 = vpop.eup %2660  ;;  %v452_v62 = vadd.f32 %v3383_v26, %v267_v35  ;;  %v449_v54 = vadd.f32 %v3352_v17, %v266_v14  ;;  %v269_v26 = vmul.f32 %v3243_v11, %v3457_v19 }
 0x108   :  { %2521 = vmatmul.msk.f32.gmra.mxu1 %vm560_vm1, %v2661_v57  ;;  %v2663_v27 = vpop.eup %2662  ;;  %v270_v19 = vmul.f32 %v3243_v11, %v3452_v36  ;;  %v271_v35 = vmul.f32 %v3243_v11, %v3447_v40  ;;  %v1922_v36 = vadd.f32 %v3369_v24, %v1889_v59  ;;  %v272_v5 = vmul.f32 %v3243_v11, %v3487_v32 }
 0x109   :  { %2664 = vtanh.f32 %v507_v63  ;;  %v3644_v47 = vpop.xlane.xlu1 %1377  ;;  %v3646_v0 = vpop.xlane.xlu0 %1374  ;;  %v1983_v17 = vmul.f32 %v2663_v27, %v3404_v42  ;;  %v510_v22 = vadd.f32 %v3257_v29, %v452_v62 }
 0x10a   :  { %2666 = vtanh.f32 %v508_v3  ;;  %v3677_v63 = vpop.f32.mrf.mxu3  ;;  %v509_v3 = vadd.f32 %v3257_v29, %v449_v54 }
 0x10b   :  { %2668 = vtanh.f32 %v1919_v7  ;;  %v458_v7 = vadd.f32 %v3450_v48, %v269_v26  ;;  %v464_v48 = vadd.f32 %v3514_v12, %v271_v35  ;;  %v467_v26 = vadd.f32 %v3546_v45, %v272_v5 }
 0x10c   :  { %v674_v9 = vpop.f32.mrf.mxu1  ;;  %2670 = vrsqrt.f32 %v3542_v41  ;;  %v277_v5 = vmul.f32 %v3243_v11, %v3510_v39 }
 0x10d   :  { %v3670_v23 = vadd.f32 %v674_v9, %v3656_v37  ;;  %2672 = vtanh.f32 %v1921_v15  ;;  %v461_v9 = vadd.f32 %v3481_v20, %v270_v19  ;;  %v1920_v20 = vadd.f32 %v3369_v24, %v1887_v2 }
 0x10e   :  { %2059 = vadd.xlane.f32.xlu1 %v2058_v13  ;;  %2056 = vadd.xlane.f32.xlu0 %v2055_v28  ;;  %2674 = vtanh.f32 %v511_v34  ;;  %v2067_v13 = vsel %vm560_vm1, %v1983_v17, 0.0  ;;  %v1923_v34 = vadd.f32 %v3369_v24, %v1890_v55  ;;  %v512_v32 = vadd.f32 %v3257_v29, %v458_v7 }
 0x10f   :  { %5323 = vst [vmem:[#allocation6_spill] sm:$0xff] %v3670_v23  ;;  %v2665_v44 = vpop.eup %2664  ;;  %v3673_v31 = vpop.xlane.xlu2 %1398  ;;  %v770_v43 = vmul.f32 %v3670_v23, %v3670_v23  ;;  %2676 = vtanh.f32 %v1917_v38  ;;  %v513_v12 = vadd.f32 %v3257_v29, %v461_v9  ;;  %v273_v24 = vmul.f32 %v3243_v11, %v3485_v33 }
 0x110   :  { %2522 = vmatmul.msk.f32.vlgmr.msra.gmra.mxu2 %vm560_vm1, %v2665_v44  ;;  %v2667_v6 = vpop.eup %2666  ;;  %2678 = vtanh.f32 %v510_v22  ;;  %v514_v45 = vadd.f32 %v3257_v29, %v464_v48  ;;  %v274_v55 = vmul.f32 %v3243_v11, %v3479_v52  ;;  %v515_v9 = vadd.f32 %v3257_v29, %v467_v26 }
 0x111   :  { %v3685_v57 = vpop.xlane.xlu1 %1386  ;;  %v3687_v53 = vpop.xlane.xlu0 %1383  ;;  %v802_v40 = vsel %vm280_vm0, %v770_v43, 0.0  ;;  %2680 = vrsqrt.f32 %v3576_v21  ;;  %v470_v33 = vadd.f32 %v3583_v50, %v273_v24 }
 0x112   :  { %v2669_v28 = vpop.eup %2668  ;;  %803 = vadd.xlane.f32.xlu2 %v802_v40  ;;  %2682 = vtanh.f32 %v509_v3  ;;  %v3736_v19 = vpop.f32.mrf.mxu3  ;;  %v473_v48 = vadd.f32 %v3609_v8, %v274_v55 }
 0x113   :  { %v3710_v15 = vpop.eup %2670  ;;  %2684 = vtanh.f32 %v1922_v36  ;;  %v1984_v2 = vmul.f32 %v2669_v28, %v3404_v42 }
 0x114   :  { %v677_v14 = vpop.f32.mrf.mxu1  ;;  %v2673_v44 = vpop.eup %2672  ;;  %v1463_v43 = vmul.f32 %v3710_v15, %v3542_v41  ;;  %2686 = vrsqrt.f32 %v3574_v60  ;;  %vm1469_vm3 = vweird.f32 %v3710_v15 }
 0x115   :  { %v3708_v27 = vadd.f32 %v677_v14, %v3656_v37  ;;  %v3723_v38 = vpop.eup %2674  ;;  %2688 = vtanh.f32 %v1920_v20  ;;  %v1986_v35 = vmul.f32 %v2673_v44, %v3404_v42  ;;  %v2070_v50 = vsel %vm560_vm1, %v1984_v2, 0.0  ;;  %vm3851_vm4 = vmor %vm1468_vm2, %vm1469_vm3 }
 0x116   :  { %2068 = vadd.xlane.f32.xlu1 %v2067_v13  ;;  %v2677_v22 = vpop.eup %2676  ;;  %2690 = vtanh.f32 %v1923_v34  ;;  %v1464_v52 = vmul.f32 %v3710_v15, %v1463_v43  ;;  %vm1538_vm3 = vweird.f32 %v3646_v0 }
 0x117   :  { %5324 = vst [vmem:[#allocation7_spill] sm:$0xff] %v3708_v27  ;;  %v3717_v62 = vpop.xlane.xlu2 %1407  ;;  %v771_v54 = vmul.f32 %v3708_v27, %v3708_v27  ;;  %v3742_v3 = vpop.eup %2678  ;;  %2692 = vtanh.f32 %v512_v32  ;;  %v1982_v13 = vmul.f32 %v2677_v22, %v3404_v42  ;;  %v3763_v44 = vsel %vm560_vm1, %v1986_v35, 0.0 }
 0x118   :  { %2523 = vmatmul.msk.f32.gmra.mxu2 %vm560_vm1, %v2667_v6  ;;  %v3748_v7 = vpop.eup %2680  ;;  %2694 = vtanh.f32 %v513_v12  ;;  %v516_v32 = vadd.f32 %v3257_v29, %v470_v33  ;;  %v276_v12 = vmul.f32 %v3243_v11, %v3519_v16  ;;  %v517_v16 = vadd.f32 %v3257_v29, %v473_v48 }
 0x119   :  { %v3728_v59 = vpop.xlane.xlu1 %1395  ;;  %v3730_v17 = vpop.xlane.xlu0 %1392  ;;  %v805_v14 = vsel %vm280_vm0, %v771_v54, 0.0  ;;  %2696 = vtanh.f32 %v514_v45  ;;  %v275_v54 = vmul.f32 %v3243_v11, %v3521_v18  ;;  %v1443_v39 = vmul.f32 %v3748_v7, %v3576_v21 }
 0x11a   :  { %806 = vadd.xlane.f32.xlu0 %v805_v14  ;;  %v2683_v28 = vpop.eup %2682  ;;  %2071 = vadd.xlane.f32.xlu2 %v2070_v50  ;;  %2698 = vrsqrt.f32 %v3569_v30  ;;  %v2064_v24 = vsel %vm560_vm1, %v1982_v13, 0.0  ;;  %v1465_v45 = vmul.f32 0.5, %v1464_v52  ;;  %v479_v33 = vadd.f32 %v3677_v63, %v276_v12  ;;  %v484_v13 = vpop.f32.mrf.mxu3 }
 0x11b   :  { %v2685_v40 = vpop.eup %2684  ;;  %2700 = vtanh.f32 %v515_v9  ;;  %v476_v2 = vadd.f32 %v3634_v49, %v275_v54  ;;  %v278_v49 = vmul.f32 %v3243_v11, %v3551_v46  ;;  %v1444_v9 = vmul.f32 %v3748_v7, %v1443_v39 }
 0x11c   :  { %v680_v6 = vpop.f32.mrf.mxu1  ;;  %v3765_v34 = vpop.eup %2686  ;;  %2702 = vrsqrt.f32 %v3622_v51  ;;  %v1987_v35 = vmul.f32 %v2685_v40, %v3404_v42  ;;  %v519_v12 = vadd.f32 %v3257_v29, %v479_v33  ;;  %vm1449_vm6 = vweird.f32 %v3748_v7 }
 0x11d   :  { %v3752_v36 = vadd.f32 %v680_v6, %v3656_v37  ;;  %v2689_v8 = vpop.eup %2688  ;;  %v1453_v14 = vmul.f32 %v3765_v34, %v3574_v60  ;;  %2704 = vrsqrt.f32 %v3600_v25  ;;  %v518_v54 = vadd.f32 %v3257_v29, %v476_v2  ;;  %vm3905_vm9 = vmor %vm1448_vm5, %vm1449_vm6 }
 0x11e   :  { %v2691_v43 = vpop.eup %2690  ;;  %2706 = vtanh.f32 %v516_v32  ;;  %v1985_v52 = vmul.f32 %v2689_v8, %v3404_v42  ;;  %v1466_v32 = vsub.f32 1.5, %v1465_v45  ;;  %v2079_v39 = vsel %vm560_vm1, %v1987_v35, 0.0 }
 0x11f   :  { %5325 = vst [vmem:[#allocation8_spill] sm:$0xff] %v3752_v36  ;;  %v3760_v20 = vpop.xlane.xlu2 %1416  ;;  %v772_v18 = vmul.f32 %v3752_v36, %v3752_v36  ;;  %v3786_v55 = vpop.eup %2692  ;;  %2708 = vrsqrt.f32 %v3592_v58  ;;  %v1988_v48 = vmul.f32 %v2691_v43, %v3404_v42  ;;  %v1445_v2 = vmul.f32 0.5, %v1444_v9 }
 0x120   :  { %2524 = vmatmul.msk.f32.gmra.mxu2 %vm560_vm1, %v2683_v28  ;;  %v3793_v6 = vpop.eup %2694  ;;  %2710 = vrsqrt.f32 %v3598_v56  ;;  %vm1459_vm8 = vweird.f32 %v3765_v34  ;;  %vm1568_vm6 = vweird.f32 %v3687_v53 }
 0x121   :  { %v3776_v26 = vpop.xlane.xlu1 %1404  ;;  %v3778_v22 = vpop.xlane.xlu0 %1401  ;;  %v808_v63 = vsel %vm280_vm0, %v772_v18, 0.0  ;;  %2712 = vtanh.f32 %v517_v16  ;;  %v482_v18 = vadd.f32 %v3736_v19, %v277_v5  ;;  %v279_v19 = vmul.f32 %v3243_v11, %v3549_v61  ;;  %vm3929_vm10 = vmor %vm1458_vm7, %vm1459_vm8 }
 0x122   :  { %v3799_v50 = vpop.eup %2696  ;;  %2065 = vadd.xlane.f32.xlu0 %v2064_v24  ;;  %809 = vadd.xlane.f32.xlu1 %v808_v63  ;;  %v1454_v24 = vmul.f32 %v3765_v34, %v1453_v14  ;;  %v485_v16 = vadd.f32 %v484_v13, %v278_v49  ;;  %2714 = vrsqrt.f32 %v3646_v0  ;;  %v3843_v63 = vsel %vm560_vm1, %v1988_v48, 0.0  ;;  %v487_v23 = vpop.f32.mrf.mxu3 }
 0x123   :  { %v3807_v46 = vpop.eup %2698  ;;  %2080 = vadd.xlane.f32.xlu2 %v2079_v39  ;;  %2716 = vtanh.f32 %v518_v54  ;;  %v520_v49 = vadd.f32 %v3257_v29, %v482_v18  ;;  %v1446_v48 = vsub.f32 1.5, %v1445_v2  ;;  %vm1558_vm8 = vweird.f32 %v3614_v1 }
 0x124   :  { %v683_v28 = vpop.f32.mrf.mxu1  ;;  %5327 = vst [vmem:[#allocation10_spill] sm:$0xff] %v3807_v46  ;;  %v3812_v8 = vpop.eup %2700  ;;  %v1493_v5 = vmul.f32 %v3807_v46, %v3569_v30  ;;  %2718 = vtanh.f32 %v519_v12  ;;  %v1455_v13 = vmul.f32 0.5, %v1454_v24  ;;  %v521_v18 = vadd.f32 %v3257_v29, %v485_v16 }
 0x125   :  { %v3804_v40 = vadd.f32 %v683_v28, %v3656_v37  ;;  %v3819_v43 = vpop.eup %2702  ;;  %v2073_v28 = vsel %vm560_vm1, %v1985_v52, 0.0  ;;  %2720 = vrsqrt.f32 %v3614_v1 }
 0x126   :  { %v3827_v35 = vpop.eup %2704  ;;  %v1503_v52 = vmul.f32 %v3819_v43, %v3622_v51  ;;  %2722 = vrsqrt.f32 %v3620_v4  ;;  %v1456_v16 = vsub.f32 1.5, %v1455_v13  ;;  %vm1509_vm13 = vweird.f32 %v3819_v43 }
 0x127   :  { %5326 = vst [vmem:[#allocation9_spill] sm:$0xff] %v3804_v40  ;;  %v3817_v42 = vpop.xlane.xlu2 %1425  ;;  %v773_v45 = vmul.f32 %v3804_v40, %v3804_v40  ;;  %v3838_v9 = vpop.eup %2706  ;;  %v1494_v40 = vmul.f32 %v3807_v46, %v1493_v5  ;;  %2724 = vrsqrt.f32 %v3638_v10  ;;  %vm1479_vm14 = vweird.f32 %v3827_v35  ;;  %vm4003_vm15 = vmor %vm1508_vm12, %vm1509_vm13 }
 0x128   :  { %2525 = vmatmul.msk.f32.gmra.mxu2 %vm560_vm1, %v3742_v3  ;;  %v1467_v3 = vmul.f32 %v3710_v15, %v1466_v32  ;;  %v3845_v11 = vpop.eup %2708  ;;  %v1473_v32 = vmul.f32 %v3827_v35, %v3600_v25  ;;  %2726 = vrsqrt.f32 %v3644_v47  ;;  %v1457_v21 = vmul.f32 %v3765_v34, %v1456_v16  ;;  %vm4016_vm2 = vmor %vm1478_vm11, %vm1479_vm14 }
 0x129   :  { %v3834_v33 = vpop.xlane.xlu1 %1413  ;;  %v3836_v14 = vpop.xlane.xlu0 %1410  ;;  %5328 = vst [vmem:[#allocation11_spill] sm:$0xff] %v3845_v11  ;;  %v811_v41 = vsel %vm280_vm0, %v773_v45, 0.0  ;;  %v1523_v2 = vmul.f32 %v3845_v11, %v3592_v58  ;;  %v1495_v13 = vmul.f32 0.5, %v1494_v40  ;;  %2728 = vrsqrt.f32 %v3687_v53 }
 0x12a   :  { %v3858_v54 = vpop.eup %2710  ;;  %2074 = vadd.xlane.f32.xlu0 %v2073_v28  ;;  %2077 = vadd.xlane.f32.xlu1 %v3763_v44  ;;  %v1471_v45 = vsel %vm3851_vm4, %v3710_v15, %v1467_v3  ;;  %v1447_v44 = vmul.f32 %v3748_v7, %v1446_v48  ;;  %v1474_v61 = vmul.f32 %v3827_v35, %v1473_v32  ;;  %2730 = vtanh.f32 %v520_v49 }
 0x12b   :  { %v3864_v12 = vpop.eup %2712  ;;  %v1483_v28 = vmul.f32 %v3858_v54, %v3598_v56  ;;  %812 = vadd.xlane.f32.xlu2 %v811_v41  ;;  %v488_v48 = vadd.f32 %v487_v23, %v279_v19  ;;  %v1524_v41 = vmul.f32 %v3845_v11, %v1523_v2  ;;  %2732 = vtanh.f32 %v521_v18 }
 0x12c   :  { %v686_v39 = vpop.f32.mrf.mxu1  ;;  %v3880_v5 = vpop.eup %2714  ;;  %v1451_v16 = vsel %vm3905_vm9, %v3748_v7, %v1447_v44  ;;  %2734 = vrsqrt.f32 %v3673_v31  ;;  %vm1598_vm13 = vweird.f32 %v3730_v17  ;;  %vm1588_vm14 = vweird.f32 %v3638_v10 }
 0x12d   :  { %v3870_v24 = vadd.f32 %v686_v39, %v3656_v37  ;;  %v1504_v39 = vmul.f32 %v3819_v43, %v1503_v52  ;;  %v3888_v27 = vpop.eup %2716  ;;  %v1533_v40 = vmul.f32 %v3880_v5, %v3646_v0  ;;  %v1484_v23 = vmul.f32 %v3858_v54, %v1483_v28 }
 0x12e   :  { %v3897_v3 = vpop.eup %2718  ;;  %v3941_v60 = vadd.f32 %v3257_v29, %v488_v48  ;;  %v1461_v48 = vsel %vm3929_vm10, %v3765_v34, %v1457_v21  ;;  %2736 = vrsqrt.f32 %v3730_v17  ;;  %vm1539_vm4 = vweird.f32 %v3880_v5 }
 0x12f   :  { %5331 = vst [vmem:[#allocation12_spill] sm:$0xff] %v3870_v24  ;;  %v3886_v36 = vpop.xlane.xlu2 %1434  ;;  %v774_v15 = vmul.f32 %v3870_v24, %v3870_v24  ;;  %v3917_v24 = vmul.f32 3.0, %v1471_v45  ;;  %v3919_v58 = vpop.eup %2720  ;;  %v1505_v19 = vmul.f32 0.5, %v1504_v39  ;;  %v1475_v45 = vmul.f32 0.5, %v1474_v61  ;;  %vm4065_vm5 = vmor %vm1538_vm3, %vm1539_vm4 }
 0x130   :  { %5332 = vst [vmem:[#allocation13_spill] sm:$0xff] %v3886_v36  ;;  %2526 = vmatmul.msk.f32.gmra.mxu2 %vm560_vm1, %v3723_v38  ;;  %v3923_v36 = vpop.eup %2722  ;;  %v1496_v39 = vsub.f32 1.5, %v1495_v13  ;;  %v1534_v7 = vmul.f32 %v3880_v5, %v1533_v40  ;;  %v3954_v13 = vmul.f32 0.5, %v1484_v23  ;;  %v1553_v40 = vmul.f32 %v3919_v58, %v3614_v1 }
 0x131   :  { %5333 = vst [vmem:[#allocation14_spill] sm:$0xff] %v3897_v3  ;;  %v3909_v38 = vpop.xlane.xlu1 %1422  ;;  %v3911_v32 = vpop.xlane.xlu0 %1419  ;;  %v814_v11 = vsel %vm280_vm0, %v774_v15, 0.0  ;;  %v3949_v15 = vmul.f32 0.5, %v1524_v41  ;;  %v1506_v52 = vsub.f32 1.5, %v1505_v19  ;;  %v1513_v23 = vmul.f32 %v3923_v36, %v3620_v4 }
 0x132   :  { %5336 = vst [vmem:[#allocation15_spill] sm:$0xff] %v3909_v38  ;;  %v3937_v28 = vpop.eup %2724  ;;  %2083 = vadd.xlane.f32.xlu0 %v3843_v63  ;;  %v3958_v63 = vmul.f32 3.0, %v1451_v16  ;;  %v1535_v44 = vmul.f32 0.5, %v1534_v7  ;;  %2738 = vrsqrt.f32 %v3685_v57  ;;  %vm1559_vm9 = vweird.f32 %v3919_v58 }
 0x133   :  { %5337 = vst [vmem:[#allocation16_spill] sm:$0xff] %v3923_v36  ;;  %v3947_v61 = vpop.eup %2726  ;;  %815 = vadd.xlane.f32.xlu2 %v814_v11  ;;  %v1583_v19 = vmul.f32 %v3937_v28, %v3638_v10  ;;  %2740 = vrsqrt.f32 %v3717_v62  ;;  %vm1548_vm10 = vweird.f32 %v3644_v47  ;;  %vm1578_vm3 = vweird.f32 %v3685_v57 }
 0x134   :  { %v689_v49 = vpop.f32.mrf.mxu1  ;;  %5340 = vst [vmem:[#allocation17_spill] sm:$0xff] %v3941_v60  ;;  %v3963_v41 = vpop.eup %2728  ;;  %v1543_v34 = vmul.f32 %v3947_v61, %v3644_v47  ;;  %v1507_v60 = vmul.f32 %v3819_v43, %v1506_v52  ;;  %v1794_v52 = vmin.f32 %v3958_v63, 1.0  ;;  %2742 = vrsqrt.f32 %v3778_v22 }
 0x135   :  { %v3945_v18 = vadd.f32 %v689_v49, %v3656_v37  ;;  %5342 = vst [vmem:[#allocation19_spill] sm:$0xff] %v3949_v15  ;;  %v1476_v49 = vsub.f32 1.5, %v1475_v45  ;;  %v3972_v11 = vpop.eup %2730  ;;  %v1514_v15 = vmul.f32 %v3923_v36, %v1513_v23  ;;  %2744 = vrsqrt.f32 %v3728_v59 }
 0x136   :  { %5343 = vst [vmem:[#allocation20_spill] sm:$0xff] %v3972_v11  ;;  %v3985_v16 = vpop.eup %2732  ;;  %v1763_v11 = vmul.f32 3.0, %v1461_v48  ;;  %v1584_v48 = vmul.f32 %v3937_v28, %v1583_v19  ;;  %v4073_v51 = vmul.f32 -0.7, %v1794_v52  ;;  %2746 = vrsqrt.f32 %v3776_v26 }
 0x137   :  { %5341 = vst [vmem:[#allocation18_spill] sm:$0xff] %v3945_v18  ;;  %v3956_v29 = vpop.xlane.xlu2 %1990  ;;  %v775_v45 = vmul.f32 %v3945_v18, %v3945_v18  ;;  %v1486_v18 = vsub.f32 1.5, %v3954_v13  ;;  %v1544_v13 = vmul.f32 %v3947_v61, %v1543_v34  ;;  %v4025_v23 = vpop.eup %2734  ;;  %vm1569_vm7 = vweird.f32 %v3963_v41 }
 0x138   :  { %2527 = vmatmul.msk.f32.gmra.mxu2 %vm560_vm1, %v3786_v55  ;;  %5346 = vst [vmem:[#allocation23_spill] sm:$0xff] %v3985_v16  ;;  %v3988_v55 = vmul.f32 %v3807_v46, %v1496_v39  ;;  %v1477_v16 = vmul.f32 %v3827_v35, %v1476_v49  ;;  %v1554_v39 = vmul.f32 %v3919_v58, %v1553_v40  ;;  %v1536_v40 = vsub.f32 1.5, %v1535_v44  ;;  %vm4129_vm12 = vmor %vm1568_vm6, %vm1569_vm7 }
 0x139   :  { %v3979_v21 = vpop.xlane.xlu1 %1431  ;;  %v3981_v2 = vpop.xlane.xlu0 %1428  ;;  %v817_v49 = vsel %vm280_vm0, %v775_v45, 0.0  ;;  %v1511_v44 = vsel %vm4003_vm15, %v3819_v43, %v1507_v60  ;;  %v1795_v34 = vmin.f32 %v1763_v11, 1.0  ;;  %v4046_v7 = vmul.f32 0.5, %v1544_v13  ;;  %vm4201_vm6 = vmor %vm1558_vm8, %vm1559_vm9 }
 0x13a   :  { %5344 = vst [vmem:[#allocation21_spill] sm:$0xff] %v3979_v21  ;;  %v1563_v21 = vmul.f32 %v3963_v41, %v3687_v53  ;;  %818 = vadd.xlane.f32.xlu0 %v817_v49  ;;  %v4034_v45 = vpop.eup %2736  ;;  %v1555_v36 = vmul.f32 0.5, %v1554_v39  ;;  %v4044_v49 = vmul.f32 0.5, %v1584_v48  ;;  %v1481_v43 = vsel %vm4016_vm2, %v3827_v35, %v1477_v16 }
 0x13b   :  { %5345 = vst [vmem:[#allocation22_spill] sm:$0xff] %v3981_v2  ;;  %v4056_v39 = vmul.f32 %v3858_v54, %v1486_v18  ;;  %v1613_v35 = vmul.f32 %v4025_v23, %v3673_v31  ;;  %v1593_v18 = vmul.f32 %v4034_v45, %v3730_v17  ;;  %2748 = vrsqrt.f32 %v3836_v14 }
 0x13c   :  { %5347 = vst [vmem:[#allocation24_spill] sm:$0xff] %v3988_v55  ;;  %v692_v4 = vpop.f32.mrf.mxu1  ;;  %v1564_v19 = vmul.f32 %v3963_v41, %v1563_v21  ;;  %v4042_v21 = vmul.f32 0.5, %v1514_v15  ;;  %v5357_v15 = vmin.f32 %v3917_v24, 1.0  ;;  %v1556_v24 = vsub.f32 1.5, %v1555_v36  ;;  %v2836_v36 = vld [vmem:[%s5289_s4] sm:$0xff] }
 0x13d   :  { %v4023_v63 = vadd.f32 %v692_v4, %v3656_v37  ;;  %5356 = vst [vmem:[#allocation29_spill] sm:$0xff] %v4056_v39  ;;  %v1586_v39 = vsub.f32 1.5, %v4044_v49  ;;  %2750 = vrsqrt.f32 %v3760_v20  ;;  %vm1549_vm11 = vweird.f32 %v3947_v61 }
 0x13e   :  { %5353 = vst [vmem:[#allocation26_spill] sm:$0xff] %v4042_v21  ;;  %v4061_v48 = vmul.f32 -0.7, %v5357_v15  ;;  %v1565_v16 = vmul.f32 0.5, %v1564_v19  ;;  %v1827_v15 = vmul.f32 -0.7, %v1795_v34  ;;  %2752 = vrsqrt.f32 %v3911_v32 }
 0x13f   :  { %5352 = vst [vmem:[#allocation25_spill] sm:$0xff] %v4023_v63  ;;  %v4029_v25 = vpop.xlane.xlu2 %1999  ;;  %v776_v4 = vmul.f32 %v4023_v63, %v4023_v63  ;;  %v1768_v63 = vmul.f32 3.0, %v1511_v44  ;;  %v4077_v44 = vmul.f32 3.0, %v1481_v43  ;;  %v1546_v19 = vsub.f32 1.5, %v4046_v7 }
 0x140   :  { %2528 = vmatmul.msk.f32.gmra.mxu2 %vm560_vm1, %v3793_v6  ;;  %v1537_v6 = vmul.f32 %v3880_v5, %v1536_v40  ;;  %v4075_v40 = vpop.eup %2738  ;;  %v4092_v34 = vperm.slane %v2836_v36, 6  ;;  %v1614_v7 = vmul.f32 %v4025_v23, %v1613_v35  ;;  %v1566_v43 = vsub.f32 1.5, %v1565_v16 }
 0x141   :  { %v4051_v60 = vpop.xlane.xlu1 %1440  ;;  %v4053_v11 = vpop.xlane.xlu0 %1437  ;;  %v820_v0 = vsel %vm280_vm0, %v776_v4, 0.0  ;;  %v1800_v4 = vmin.f32 %v1768_v63, 1.0  ;;  %v1573_v21 = vmul.f32 %v4075_v40, %v3685_v57  ;;  %v1797_v53 = vmin.f32 %v4077_v44, 1.0 }
 0x142   :  { %5354 = vst [vmem:[#allocation27_spill] sm:$0xff] %v4051_v60  ;;  %v4080_v60 = vpop.eup %2740  ;;  %821 = vadd.xlane.f32.xlu1 %v820_v0  ;;  %v1541_v49 = vsel %vm4065_vm5, %v3880_v5, %v1537_v6  ;;  %v1594_v0 = vmul.f32 %v4034_v45, %v1593_v18  ;;  %v1615_v3 = vmul.f32 0.5, %v1614_v7  ;;  %vm1589_vm15 = vweird.f32 %v3937_v28 }
 0x143   :  { %5355 = vst [vmem:[#allocation28_spill] sm:$0xff] %v4053_v11  ;;  %v4086_v52 = vpop.eup %2742  ;;  %v1643_v5 = vmul.f32 %v4080_v60, %v3717_v62  ;;  %v1771_v16 = vmul.f32 3.0, %v1541_v49  ;;  %v1832_v18 = vmul.f32 -0.7, %v1800_v4  ;;  %v4117_v11 = vmul.f32 %v3919_v58, %v1556_v24 }
 0x144   :  { %v1623_v6 = vmul.f32 %v4086_v52, %v3778_v22  ;;  %v1567_v49 = vmul.f32 %v3963_v41, %v1566_v43  ;;  %v1595_v37 = vmul.f32 0.5, %v1594_v0  ;;  %v4122_v38 = vpop.eup %2744  ;;  %v1574_v4 = vmul.f32 %v4075_v40, %v1573_v21 }
 0x145   :  { %v4135_v7 = vpop.eup %2746  ;;  %v4138_v43 = vmul.f32 %v3937_v28, %v1586_v39  ;;  %v4141_v0 = vmul.f32 %v3947_v61, %v1546_v19  ;;  %v1644_v21 = vmul.f32 %v4080_v60, %v1643_v5  ;;  %v1603_v39 = vmul.f32 %v4122_v38, %v3728_v59 }
 0x146   :  { %v4145_v46 = vpop.eup %2748  ;;  %v1624_v30 = vmul.f32 %v4086_v52, %v1623_v6  ;;  %v1571_v44 = vsel %vm4129_vm12, %v3963_v41, %v1567_v49  ;;  %v1616_v5 = vsub.f32 1.5, %v1615_v3  ;;  %v1575_v2 = vmul.f32 0.5, %v1574_v4  ;;  %vm4214_vm12 = vmor %vm1548_vm10, %vm1549_vm11 }
 0x147   :  { %v2009_v55 = vpop.xlane.xlu2 %2008  ;;  %vm1599_vm2 = vweird.f32 %v4034_v45  ;;  %v1633_v3 = vmul.f32 %v4135_v7, %v3776_v26  ;;  %v1653_v41 = vmul.f32 %v4145_v46, %v3836_v14  ;;  %v1774_v4 = vmul.f32 3.0, %v1571_v44 }
 0x148   :  { %v2092_v63 = vadd.f32 %v4092_v34, %v2009_v55  ;;  %2529 = vmatmul.msk.f32.gmra.mxu2 %vm560_vm1, %v3799_v50  ;;  %vm1579_vm4 = vweird.f32 %v4075_v40  ;;  %vm4187_vm5 = vmor %vm1598_vm13, %vm1599_vm2  ;;  %v1576_v17 = vsub.f32 1.5, %v1575_v2  ;;  %vm1628_vm7 = vweird.f32 %v3778_v22 }
 0x149   :  { %v1997_v13 = vpop.xlane.xlu1 %1996  ;;  %v1994_v35 = vpop.xlane.xlu0 %1993  ;;  %2754 = vrsqrt.f32 %v3817_v42  ;;  %v1806_v2 = vmin.f32 %v1774_v4, 1.0  ;;  %vm1629_vm8 = vweird.f32 %v4086_v52  ;;  %vm1618_vm9 = vweird.f32 %v3673_v31 }
 0x14a   :  { %v2544_v55 = vclamps-f32 %v2092_v63, 5.0  ;;  %v2088_v36 = vadd.f32 %v4092_v34, %v1997_v13  ;;  %v2087_v50 = vadd.f32 %v4092_v34, %v1994_v35  ;;  %v1604_v63 = vmul.f32 %v4122_v38, %v1603_v39  ;;  %vm4257_vm2 = vmor %vm1628_vm7, %vm1629_vm8 }
 0x14b   :  { %v1634_v39 = vmul.f32 %v4135_v7, %v1633_v3  ;;  %2756 = vrsqrt.f32 %v3834_v33  ;;  %vm1619_vm10 = vweird.f32 %v4025_v23  ;;  %vm1608_vm11 = vweird.f32 %v3728_v59 }
 0x14c   :  { %v4133_v24 = vmul.f32 %v2544_v55, %v1832_v18  ;;  %v2540_v13 = vclamps-f32 %v2088_v36, 5.0  ;;  %v2539_v35 = vclamps-f32 %v2087_v50, 5.0  ;;  %v1803_v36 = vmin.f32 %v1771_v16, 1.0  ;;  %v4149_v50 = vpop.eup %2750  ;;  %vm4336_vm8 = vmor %vm1618_vm9, %vm1619_vm10 }
 0x14d   :  { %vm1609_vm13 = vweird.f32 %v4122_v38  ;;  %vm1638_vm7 = vweird.f32 %v3776_v26  ;;  %vm1488_vm9 = vweird.f32 %v3598_v56  ;;  %vm1489_vm10 = vweird.f32 %v3858_v54 }
 0x14e   :  { %5362 = vst [vmem:[#allocation30_spill] sm:$0xff] %v4133_v24  ;;  %v2184_v18 = vmul.f32 %v2540_v13, %v4061_v48  ;;  %v2183_v55 = vmul.f32 %v2539_v35, %v1827_v15  ;;  %v1596_v24 = vsub.f32 1.5, %v1595_v37  ;;  %v4163_v37 = vmul.f32 0.5, %v1644_v21 }
 0x14f   :  { %v2018_v19 = vpop.xlane.xlu2 %2017  ;;  %v1835_v16 = vmul.f32 -0.7, %v1803_v36  ;;  %v1673_v35 = vmul.f32 %v4149_v50, %v3760_v20  ;;  %v4181_v21 = vmul.f32 %v4025_v23, %v1616_v5  ;;  %v4220_v5 = vmul.f32 0.5, %v1604_v63 }
 0x150   :  { %v2095_v48 = vadd.f32 %v4092_v34, %v2018_v19  ;;  %2530 = vmatmul.msk.f32.gmra.mxu2 %vm560_vm1, %v3812_v8  ;;  %2221 = vperm.xlu2 %2579, %v2183_v55   ;;  %v1625_v8 = vmul.f32 0.5, %v1624_v30  ;;  %v1597_v13 = vmul.f32 %v4034_v45, %v1596_v24  ;;  %v4193_v55 = vmul.f32 -0.7, %v1797_v53 }
 0x151   :  { %v4170_v15 = vpop.xlane.xlu1 %2005  ;;  %v4172_v6 = vpop.xlane.xlu0 %2002  ;;  %2226 = vperm.xlu0 %2577, %v2184_v18   ;;  %v2086_v18 = vadd.f32 %v4092_v34, %v3956_v29  ;;  %v1654_v19 = vmul.f32 %v4145_v46, %v1653_v41  ;;  %v1646_v1 = vsub.f32 1.5, %v4163_v37  ;;  %v1577_v30 = vmul.f32 %v4075_v40, %v1576_v17 }
 0x152   :  { %v2547_v49 = vclamps-f32 %v2095_v48, 5.0  ;;  %v4208_v29 = vpop.eup %2752  ;;  %v1626_v44 = vsub.f32 1.5, %v1625_v8  ;;  %v1674_v48 = vmul.f32 %v4149_v50, %v1673_v35  ;;  %v1601_v47 = vsel %vm4187_vm5, %v4034_v45, %v1597_v13  ;;  %vm4269_vm5 = vmor %vm1588_vm14, %vm1589_vm15 }
 0x153   :  { %v2538_v41 = vclamps-f32 %v2086_v18, 5.0  ;;  %v1561_v8 = vsel %vm4201_vm6, %v3919_v58, %v4117_v11  ;;  %v1683_v4 = vmul.f32 %v4208_v29, %v3911_v32  ;;  %v1838_v11 = vmul.f32 -0.7, %v1806_v2  ;;  %v4263_v36 = vpop.eup %2754  ;;  %vm4285_vm6 = vmor %vm1578_vm3, %vm1579_vm4 }
 0x154   :  { %v4195_v24 = vmul.f32 %v2547_v49, %v1835_v16  ;;  %v4235_v16 = vmul.f32 0.5, %v1634_v39  ;;  %v1655_v49 = vmul.f32 0.5, %v1654_v19  ;;  %v1627_v58 = vmul.f32 %v4086_v52, %v1626_v44 }
 0x155   :  { %v1777_v35 = vmul.f32 3.0, %v1601_v47  ;;  %v1773_v18 = vmul.f32 3.0, %v1561_v8  ;;  %v4274_v22 = vmul.f32 %v4080_v60, %v1646_v1  ;;  %v2182_v39 = vmul.f32 %v2538_v41, %v4073_v51 }
 0x156   :  { %v1606_v44 = vsub.f32 1.5, %v4220_v5  ;;  %v1656_v2 = vsub.f32 1.5, %v1655_v49  ;;  %vm1658_vm14 = vweird.f32 %v3836_v14  ;;  %v1684_v51 = vmul.f32 %v4208_v29, %v1683_v4 }
 0x157   :  { %v2027_v3 = vpop.xlane.xlu2 %2026  ;;  %v4292_v1 = vmul.f32 0.5, %v1674_v48  ;;  %v1809_v47 = vmin.f32 %v1777_v35, 1.0  ;;  %v1631_v57 = vsel %vm4257_vm2, %v4086_v52, %v1627_v58  ;;  %v1703_v41 = vmul.f32 %v4263_v36, %v3817_v42 }
 0x158   :  { %v2098_v37 = vadd.f32 %v4092_v34, %v2027_v3  ;;  %2531 = vmatmul.msk.f32.gmra.mxu2 %vm560_vm1, %v3838_v9  ;;  %v1551_v9 = vsel %vm4214_vm12, %v3947_v61, %v4141_v0  ;;  %v2089_v0 = vadd.f32 %v4092_v34, %v4029_v25  ;;  %v4279_v25 = vpop.eup %2756  ;;  %v1636_v3 = vsub.f32 1.5, %v4235_v16 }
 0x159   :  { %v4239_v45 = vpop.xlane.xlu1 %2014  ;;  %v4241_v63 = vpop.xlane.xlu0 %2011  ;;  %v1772_v53 = vmul.f32 3.0, %v1551_v9  ;;  %vm1659_vm15 = vweird.f32 %v4145_v46  ;;  %v1805_v8 = vmin.f32 %v1773_v18, 1.0  ;;  %vm1648_vm3 = vweird.f32 %v3717_v62 }
 0x15a   :  { %v2550_v13 = vclamps-f32 %v2098_v37, 5.0  ;;  %v2541_v5 = vclamps-f32 %v2089_v0, 5.0  ;;  %vm1649_vm4 = vweird.f32 %v4080_v60  ;;  %v1591_v52 = vsel %vm4269_vm5, %v3937_v28, %v4138_v43  ;;  %vm4323_vm12 = vmor %vm1658_vm14, %vm1659_vm15 }
 0x15b   :  { %2216 = vperm.xlu1 %2578, %v2182_v39   ;;  %v1804_v16 = vmin.f32 %v1772_v53, 1.0  ;;  %v1581_v49 = vsel %vm4285_vm6, %v4075_v40, %v1577_v30  ;;  %v1663_v4 = vmul.f32 %v4279_v25, %v3834_v33  ;;  %v1657_v9 = vmul.f32 %v4145_v46, %v1656_v2  ;;  %v4328_v39 = vpop.f32.mrf.mxu1  ;;  %vm4350_vm5 = vmor %vm1608_vm11, %vm1609_vm13 }
 0x15c   :  { %v4277_v19 = vmul.f32 %v2550_v13, %v1838_v11  ;;  %v1685_v58 = vmul.f32 0.5, %v1684_v51  ;;  %v1780_v35 = vmul.f32 3.0, %v1631_v57  ;;  %v2185_v43 = vmul.f32 %v2541_v5, %v4193_v55  ;;  %vm4386_vm15 = vmor %vm1648_vm3, %vm1649_vm4  ;;  %v5388_v5 = vld [vmem:[#allocation2_spill] sm:$0xff] }
 0x15d   :  { %v1837_v30 = vmul.f32 -0.7, %v1805_v8  ;;  %v1776_v18 = vmul.f32 3.0, %v1591_v52  ;;  %v1775_v17 = vmul.f32 3.0, %v1581_v49  ;;  %v1836_v2 = vmul.f32 -0.7, %v1804_v16 }
 0x15e   :  { %v1607_v55 = vmul.f32 %v4122_v38, %v1606_v44  ;;  %v4343_v57 = vmul.f32 %v4135_v7, %v1636_v3  ;;  %vm1639_vm2 = vweird.f32 %v4135_v7  ;;  %v1812_v44 = vmin.f32 %v1780_v35, 1.0 }
 0x15f   :  { %v2036_v37 = vpop.xlane.xlu2 %2035  ;;  %v1704_v59 = vmul.f32 %v4263_v36, %v1703_v41  ;;  %v1686_v3 = vsub.f32 1.5, %v1685_v58  ;;  %v1807_v16 = vmin.f32 %v1775_v17, 1.0  ;;  %v1664_v52 = vmul.f32 %v4279_v25, %v1663_v4  ;;  %v5381_v41 = vld [vmem:[#allocation22_spill] sm:$0xff]  ;;  %vm4405_vm3 = vmor %vm1638_vm7, %vm1639_vm2 }
 0x160   :  { %v2101_v48 = vadd.f32 %v4092_v34, %v2036_v37  ;;  %2532 = vmatmul.msk.f32.gmra.mxu2 %vm560_vm1, %v3864_v12  ;;  %v1841_v12 = vmul.f32 -0.7, %v1809_v47  ;;  %v1676_v47 = vsub.f32 1.5, %v4292_v1  ;;  %v1661_v1 = vsel %vm4323_vm12, %v4145_v46, %v1657_v9 }
 0x161   :  { %v2024_v11 = vpop.xlane.xlu1 %2023  ;;  %v2021_v13 = vpop.xlane.xlu0 %2020  ;;  %vm1688_vm11 = vweird.f32 %v3911_v32  ;;  %v1621_v46 = vsel %vm4336_vm8, %v4025_v23, %v4181_v21  ;;  %vm1689_vm13 = vweird.f32 %v4208_v29  ;;  %2758 = vrsqrt.f32 %v5381_v41 }
 0x162   :  { %v2553_v61 = vclamps-f32 %v2101_v48, 5.0  ;;  %v2097_v0 = vadd.f32 %v4092_v34, %v2024_v11  ;;  %v2096_v28 = vadd.f32 %v4092_v34, %v2021_v13  ;;  %v1808_v48 = vmin.f32 %v1776_v18, 1.0  ;;  %vm4395_vm12 = vmor %vm1688_vm11, %vm1689_vm13  ;;  %v5397_v18 = vld [vmem:[#allocation28_spill] sm:$0xff] }
 0x163   :  { %2231 = vperm.xlu1 %2578, %v2185_v43   ;;  %v1783_v11 = vmul.f32 3.0, %v1661_v1  ;;  %v1611_v4 = vsel %vm4350_vm5, %v4122_v38, %v1607_v55  ;;  %vm1678_vm6 = vweird.f32 %v3760_v20  ;;  %vm1679_vm14 = vweird.f32 %v4149_v50  ;;  %v5390_v1 = vld [vmem:[#allocation15_spill] sm:$0xff]  ;;  %vm4448_vm5 = vmor %vm1488_vm9, %vm1489_vm10 }
 0x164   :  { %v4330_v53 = vmul.f32 %v2553_v61, %v1841_v12  ;;  %v2549_v10 = vclamps-f32 %v2097_v0, 5.0  ;;  %v2548_v51 = vclamps-f32 %v2096_v28, 5.0  ;;  %v1687_v38 = vmul.f32 %v4208_v29, %v1686_v3  ;;  %vm4465_vm9 = vmor %vm1678_vm6, %vm1679_vm14 }
 0x165   :  { %v1840_v12 = vmul.f32 -0.7, %v1808_v48  ;;  %v1839_v61 = vmul.f32 -0.7, %v1807_v16  ;;  %v1779_v0 = vmul.f32 3.0, %v1621_v46  ;;  %v1705_v17 = vmul.f32 0.5, %v1704_v59 }
 0x166   :  { %v4354_v31 = vmul.f32 %v2549_v10, %v1837_v30  ;;  %v4356_v37 = vmul.f32 %v2548_v51, %v1836_v2  ;;  %v1778_v30 = vmul.f32 3.0, %v1611_v4  ;;  %v1665_v10 = vmul.f32 0.5, %v1664_v52  ;;  %v698_v51 = vpop.f32.mrf.mxu1  ;;  %v5391_v59 = vld [vmem:[#allocation5_spill] sm:$0xff]  ;;  %v5392_v52 = vld [vmem:[#allocation14_spill] sm:$0xff] }
 0x167   :  { %v2045_v8 = vpop.xlane.xlu2 %2044  ;;  %vm1668_vm4 = vweird.f32 %v3834_v33  ;;  %v1815_v32 = vmin.f32 %v1783_v11, 1.0  ;;  %v4411_v2 = vmul.f32 %v4149_v50, %v1676_v47  ;;  %vm1669_vm8 = vweird.f32 %v4279_v25  ;;  %v4418_v26 = vpop.eup %2758 }
 0x168   :  { %v2104_v49 = vadd.f32 %v4092_v34, %v2045_v8  ;;  %2533 = vmatmul.msk.f32.gmra.mxu2 %vm560_vm1, %v3888_v27  ;;  %v1844_v27 = vmul.f32 -0.7, %v1812_v44  ;;  %vm1498_vm7 = vweird.f32 %v5388_v5  ;;  %v5389_v44 = vld [vmem:[#allocation10_spill] sm:$0xff]  ;;  %2760 = vrsqrt.f32 %v5390_v1  ;;  %vm4482_vm13 = vmor %vm1668_vm4, %vm1669_vm8 }
 0x169   :  { %v2033_v9 = vpop.xlane.xlu1 %2032  ;;  %v2030_v58 = vpop.xlane.xlu0 %2029  ;;  %vm1499_vm2 = vweird.f32 %v5389_v44  ;;  %v4425_v3 = vadd.f32 %v4328_v39, %v5391_v59  ;;  %v1811_v8 = vmin.f32 %v1779_v0, 1.0  ;;  %v1691_v48 = vsel %vm4395_vm12, %v4208_v29, %v1687_v38 }
 0x16a   :  { %v2556_v13 = vclamps-f32 %v2104_v49, 5.0  ;;  %v2100_v35 = vadd.f32 %v4092_v34, %v2033_v9  ;;  %v2099_v23 = vadd.f32 %v4092_v34, %v2030_v58  ;;  %v1810_v49 = vmin.f32 %v1778_v30, 1.0  ;;  %vm4515_vm6 = vmor %vm1498_vm7, %vm1499_vm2 }
 0x16b   :  { %v1651_v46 = vsel %vm4386_vm15, %v4080_v60, %v4274_v22  ;;  %v1641_v39 = vsel %vm4405_vm3, %v4135_v7, %v4343_v57  ;;  %v1706_v9 = vsub.f32 1.5, %v1705_v17  ;;  %v1666_v58 = vsub.f32 1.5, %v1665_v10  ;;  %v5398_v17 = vld [vmem:[#allocation29_spill] sm:$0xff] }
 0x16c   :  { %v4399_v40 = vmul.f32 %v2556_v13, %v1844_v27  ;;  %v2552_v62 = vclamps-f32 %v2100_v35, 5.0  ;;  %v2551_v43 = vclamps-f32 %v2099_v23, 5.0  ;;  %v4442_v29 = vadd.f32 %v698_v51, %v5391_v59 }
 0x16d   :  { %v1847_v11 = vmul.f32 -0.7, %v1815_v32  ;;  %vm1708_vm11 = vweird.f32 %v3817_v42  ;;  %v1786_v57 = vmul.f32 3.0, %v1691_v48  ;;  %v1843_v35 = vmul.f32 -0.7, %v1811_v8  ;;  %v5401_v8 = vld [vmem:[#allocation13_spill] sm:$0xff] }
 0x16e   :  { %v4414_v14 = vmul.f32 %v2552_v62, %v1840_v12  ;;  %v4416_v55 = vmul.f32 %v2551_v43, %v1839_v61  ;;  %v1782_v23 = vmul.f32 3.0, %v1651_v46  ;;  %v777_v21 = vmul.f32 %v4425_v3, %v4425_v3  ;;  %v4459_v28 = vpop.eup %2760  ;;  %v5402_v46 = vld [vmem:[#allocation20_spill] sm:$0xff] }
 0x16f   :  { %v2054_v47 = vpop.xlane.xlu2 %2053  ;;  %v1781_v38 = vmul.f32 3.0, %v1641_v39  ;;  %v1842_v61 = vmul.f32 -0.7, %v1810_v49  ;;  %v1667_v43 = vmul.f32 %v4279_v25, %v1666_v58  ;;  %v1713_v30 = vmul.f32 %v4418_v26, %v5381_v41 }
 0x170   :  { %v2107_v16 = vadd.f32 %v4092_v34, %v2054_v47  ;;  %2534 = vmatmul.msk.f32.gmra.mxu2 %vm560_vm1, %v5392_v52  ;;  %2762 = vrsqrt.f32 %v5397_v18  ;;  %v1491_v10 = vsel %vm4448_vm5, %v3858_v54, %v5398_v17  ;;  %vm1709_vm10 = vweird.f32 %v4263_v36  ;;  %v5421_v17 = vld [vmem:[#allocation27_spill] sm:$0xff] }
 0x171   :  { %v2042_v4 = vpop.xlane.xlu1 %2041  ;;  %v2039_v27 = vpop.xlane.xlu0 %2038  ;;  %v1818_v47 = vmin.f32 %v1786_v57, 1.0  ;;  %2764 = vrsqrt.f32 %v5401_v8  ;;  %v1813_v54 = vmin.f32 %v1781_v38, 1.0  ;;  %v778_v52 = vmul.f32 %v4442_v29, %v4442_v29  ;;  %vm4534_vm12 = vmor %vm1708_vm11, %vm1709_vm10 }
 0x172   :  { %v2559_v60 = vclamps-f32 %v2107_v16, 5.0  ;;  %v2103_v7 = vadd.f32 %v4092_v34, %v2042_v4  ;;  %v2102_v22 = vadd.f32 %v4092_v34, %v2039_v27  ;;  %v1814_v16 = vmin.f32 %v1782_v23, 1.0  ;;  %v5403_v4 = vld [vmem:[#allocation21_spill] sm:$0xff] }
 0x173   :  { %v4494_v49 = vmul.f32 %v4263_v36, %v1706_v9  ;;  %v823_v39 = vsel %vm280_vm0, %v777_v21, 0.0  ;;  %v1681_v58 = vsel %vm4465_vm9, %v4149_v50, %v4411_v2  ;;  %2766 = vrsqrt.f32 %v5403_v4  ;;  %v5406_v2 = vld [vmem:[#allocation3_spill] sm:$0xff] }
 0x174   :  { %v4457_v12 = vmul.f32 %v2559_v60, %v1847_v11  ;;  %v2555_v56 = vclamps-f32 %v2103_v7, 5.0  ;;  %v2554_v0 = vclamps-f32 %v2102_v22, 5.0  ;;  %v1693_v11 = vmul.f32 %v4459_v28, %v5390_v1  ;;  %v5407_v7 = vld [vmem:[#allocation11_spill] sm:$0xff] }
 0x175   :  { %v1714_v9 = vmul.f32 %v4418_v26, %v1713_v30  ;;  %v1671_v60 = vsel %vm4482_vm13, %v4279_v25, %v1667_v43  ;;  %vm1528_vm14 = vweird.f32 %v5406_v2  ;;  %vm1529_vm15 = vweird.f32 %v5407_v7 }
 0x176   :  { %v4486_v32 = vmul.f32 %v2555_v56, %v1843_v35  ;;  %v4488_v51 = vmul.f32 %v2554_v0, %v1842_v61  ;;  %v1850_v22 = vmul.f32 -0.7, %v1818_v47  ;;  %v4523_v21 = vpop.eup %2762  ;;  %v1846_v25 = vmul.f32 -0.7, %v1814_v16  ;;  %vm4588_vm5 = vmor %vm1528_vm14, %vm1529_vm15 }
 0x177   :  { %v2063_v48 = vpop.xlane.xlu2 %2062  ;;  %v1845_v38 = vmul.f32 -0.7, %v1813_v54  ;;  %v826_v5 = vsel %vm280_vm0, %v778_v52, 0.0  ;;  %v1785_v56 = vmul.f32 3.0, %v1681_v58  ;;  %v1784_v43 = vmul.f32 3.0, %v1671_v60  ;;  %v4528_v30 = vpop.eup %2764  ;;  %v5411_v52 = vld [vmem:[#allocation17_spill] sm:$0xff] }
 0x178   :  { %v2110_v33 = vadd.f32 %v4092_v34, %v2063_v48  ;;  %2535 = vmatmul.msk.f32.gmra.mxu2 %vm560_vm1, %v5402_v46  ;;  %v1694_v20 = vmul.f32 %v4459_v28, %v1693_v11  ;;  %v1715_v47 = vmul.f32 0.5, %v1714_v9  ;;  %v5410_v48 = vld [vmem:[#allocation24_spill] sm:$0xff]  ;;  %v1766_v54 = vmul.f32 3.0, %v1491_v10  ;;  %v5412_v58 = vld [vmem:[#allocation19_spill] sm:$0xff] }
 0x179   :  { %v2051_v27 = vpop.xlane.xlu1 %2050  ;;  %824 = vadd.xlane.f32.xlu2 %v823_v39  ;;  %v2048_v13 = vpop.xlane.xlu0 %2047  ;;  %v1501_v16 = vsel %vm4515_vm6, %v5389_v44, %v5410_v48  ;;  %2768 = vtanh.f32 %v5411_v52  ;;  %v5413_v11 = vsub.f32 1.5, %v5412_v58  ;;  %v5416_v44 = vld [vmem:[#allocation16_spill] sm:$0xff]  ;;  %vm1718_vm7 = vweird.f32 %v5381_v41 }
 0x17a   :  { %v2562_v57 = vclamps-f32 %v2110_v33, 5.0  ;;  %v2106_v35 = vadd.f32 %v4092_v34, %v2051_v27  ;;  %v2105_v23 = vadd.f32 %v4092_v34, %v2048_v13  ;;  %v1743_v33 = vmul.f32 %v4523_v21, %v5397_v18  ;;  %v4550_v39 = vpop.eup %2766  ;;  %v5414_v27 = vld [vmem:[#allocation26_spill] sm:$0xff]  ;;  %v5417_v60 = vld [vmem:[#allocation4_spill] sm:$0xff] }
 0x17b   :  { %827 = vadd.xlane.f32.xlu0 %v826_v5  ;;  %v4555_v9 = vmul.f32 %v5407_v7, %v5413_v11  ;;  %v5415_v13 = vsub.f32 1.5, %v5414_v27  ;;  %vm1518_vm3 = vweird.f32 %v5417_v60  ;;  %vm1519_vm4 = vweird.f32 %v5416_v44 }
 0x17c   :  { %v4526_v61 = vmul.f32 %v2562_v57, %v1850_v22  ;;  %v2558_v0 = vclamps-f32 %v2106_v35, 5.0  ;;  %v2557_v62 = vclamps-f32 %v2105_v23, 5.0  ;;  %v4562_v50 = vmul.f32 3.0, %v1501_v16  ;;  %v5418_v22 = vld [vmem:[#allocation23_spill] sm:$0xff]  ;;  %vm4572_vm8 = vmor %vm1518_vm3, %vm1519_vm4 }
 0x17d   :  { %v1517_v10 = vmul.f32 %v5416_v44, %v5415_v13  ;;  %v1817_v57 = vmin.f32 %v1785_v56, 1.0  ;;  %v1816_v35 = vmin.f32 %v1784_v43, 1.0  ;;  %v1711_v23 = vsel %vm4534_vm12, %v4263_v36, %v4494_v49 }
 0x17e   :  { %v4546_v46 = vmul.f32 %v2558_v0, %v1846_v25  ;;  %v4548_v42 = vmul.f32 %v2557_v62, %v1845_v38  ;;  %v1733_v25 = vmul.f32 %v4528_v30, %v5401_v8  ;;  %v1695_v38 = vmul.f32 0.5, %v1694_v20 }
 0x17f   :  { %v1716_v5 = vsub.f32 1.5, %v1715_v47  ;;  %v1798_v0 = vmin.f32 %v1766_v54, 1.0  ;;  %v1744_v56 = vmul.f32 %v4523_v21, %v1743_v33  ;;  %v1723_v49 = vmul.f32 %v4550_v39, %v5403_v4  ;;  %v2769_v47 = vpop.eup %2768  ;;  %v701_v54 = vpop.f32.mrf.mxu1 }
 0x180   :  { %2536 = vmatmul.msk.f32.gmra.mxu2 %vm560_vm1, %v5418_v22  ;;  %vm1719_vm2 = vweird.f32 %v4418_v26  ;;  %2770 = vrsqrt.f32 %v5421_v17  ;;  %v1788_v20 = vmul.f32 3.0, %v1711_v23  ;;  %v1849_v52 = vmul.f32 -0.7, %v1817_v57 }
 0x181   :  { %v2060_v62 = vpop.xlane.xlu1 %2059  ;;  %v2057_v48 = vpop.xlane.xlu0 %2056  ;;  %v1848_v11 = vmul.f32 -0.7, %v1816_v35  ;;  %v1734_v13 = vmul.f32 %v4528_v30, %v1733_v25  ;;  %v1696_v60 = vsub.f32 1.5, %v1695_v38  ;;  %v1717_v22 = vmul.f32 %v4418_v26, %v1716_v5  ;;  %vm4608_vm11 = vmor %vm1718_vm7, %vm1719_vm2 }
 0x182   :  { %v2109_v43 = vadd.f32 %v4092_v34, %v2060_v62  ;;  %v2108_v36 = vadd.f32 %v4092_v34, %v2057_v48  ;;  %v1521_v57 = vsel %vm4572_vm8, %v5416_v44, %v1517_v10  ;;  %v1745_v23 = vmul.f32 0.5, %v1744_v56 }
 0x183   :  { %v2090_v35 = vadd.f32 %v4092_v34, %v4172_v6  ;;  %v1724_v48 = vmul.f32 %v4550_v39, %v1723_v49  ;;  %v1799_v44 = vmin.f32 %v4562_v50, 1.0  ;;  %v2091_v10 = vadd.f32 %v4092_v34, %v4170_v15 }
 0x184   :  { %v2561_v58 = vclamps-f32 %v2109_v43, 5.0  ;;  %v2560_v27 = vclamps-f32 %v2108_v36, 5.0  ;;  %v4616_v6 = vadd.f32 %v701_v54, %v5391_v59  ;;  %vm1698_vm9 = vweird.f32 %v5390_v1 }
 0x185   :  { %v1830_v38 = vmul.f32 -0.7, %v1798_v0  ;;  %v1531_v41 = vsel %vm4588_vm5, %v5407_v7, %v4555_v9  ;;  %v1820_v5 = vmin.f32 %v1788_v20, 1.0  ;;  %v1735_v50 = vmul.f32 0.5, %v1734_v13  ;;  %v4628_v0 = vpop.xlane.xlu2 %803 }
 0x186   :  { %v4599_v62 = vmul.f32 %v2561_v58, %v1849_v52  ;;  %v4601_v2 = vmul.f32 %v2560_v27, %v1848_v11  ;;  %v4624_v16 = vpop.eup %2770  ;;  %v1697_v56 = vmul.f32 %v4459_v28, %v1696_v60  ;;  %vm1699_vm10 = vweird.f32 %v4459_v28 }
 0x187   :  { %v1769_v15 = vmul.f32 3.0, %v1521_v57  ;;  %v1746_v36 = vsub.f32 1.5, %v1745_v23  ;;  %v2542_v49 = vclamps-f32 %v2090_v35, 5.0  ;;  %v1721_v7 = vsel %vm4608_vm11, %v4418_v26, %v1717_v22  ;;  %vm4644_vm6 = vmor %vm1698_vm9, %vm1699_vm10 }
 0x188   :  { %2537 = vmatmul.msk.f32.gmra.mxu2 %vm560_vm1, %v2769_v47  ;;  %v1725_v9 = vmul.f32 0.5, %v1724_v48  ;;  %vm1748_vm1 = vweird.f32 %v5397_v18  ;;  %v2543_v20 = vclamps-f32 %v2091_v10, 5.0  ;;  %v779_v47 = vmul.f32 %v4616_v6, %v4616_v6 }
 0x189   :  { %v2069_v43 = vpop.xlane.xlu1 %2068  ;;  %v1753_v52 = vmul.f32 %v4624_v16, %v5421_v17  ;;  %vm1749_vm13 = vweird.f32 %v4523_v21  ;;  %v1852_v58 = vmul.f32 -0.7, %v1820_v5  ;;  %v1831_v27 = vmul.f32 -0.7, %v1799_v44 }
 0x18a   :  { %v2112_v54 = vadd.f32 %v4092_v34, %v2069_v43  ;;  %v1770_v33 = vmul.f32 3.0, %v1531_v41  ;;  %v1789_v13 = vmul.f32 3.0, %v1721_v7  ;;  %v1747_v60 = vmul.f32 %v4523_v21, %v1746_v36  ;;  %vm4655_vm14 = vmor %vm1748_vm1, %vm1749_vm13 }
 0x18b   :  { %v2186_v22 = vmul.f32 %v2542_v49, %v1830_v38  ;;  %v2093_v57 = vadd.f32 %v4092_v34, %v4241_v63  ;;  %v1736_v35 = vsub.f32 1.5, %v1735_v50  ;;  %v2187_v48 = vmul.f32 %v2543_v20, %v1831_v27 }
 0x18c   :  { %v2564_v11 = vclamps-f32 %v2112_v54, 5.0  ;;  %v2094_v25 = vadd.f32 %v4092_v34, %v4239_v45  ;;  %v829_v44 = vsel %vm280_vm0, %v779_v47, 0.0  ;;  %v1726_v10 = vsub.f32 1.5, %v1725_v9 }
 0x18d   :  { %v1754_v38 = vmul.f32 %v4624_v16, %v1753_v52  ;;  %v1801_v41 = vmin.f32 %v1769_v15, 1.0  ;;  %830 = vadd.xlane.f32.xlu1 %v829_v44  ;;  %v4663_v63 = vpop.xlane.xlu0 %806  ;;  %v1701_v18 = vsel %vm4644_vm6, %v4459_v28, %v1697_v56  ;;  %vm1738_vm15 = vweird.f32 %v5401_v8  ;;  %v2072_v15 = vpop.xlane.xlu2 %2071 }
 0x18e   :  { %v4651_v23 = vmul.f32 %v2564_v11, %v1852_v58  ;;  %v1802_v5 = vmin.f32 %v1770_v33, 1.0  ;;  %v1821_v50 = vmin.f32 %v1789_v13, 1.0  ;;  %2772 = vrsqrt.f32 %v4663_v63 }
 0x18f   :  { %2236 = vperm.xlu0 %2577, %v2186_v22   ;;  %vm1728_vm12 = vweird.f32 %v5403_v4  ;;  %vm1729_vm3 = vweird.f32 %v4550_v39  ;;  %v2545_v45 = vclamps-f32 %v2093_v57, 5.0  ;;  %v1751_v43 = vsel %vm4655_vm14, %v4523_v21, %v1747_v60 }
 0x190   :  { %vm1739_vm4 = vweird.f32 %v4528_v30  ;;  %v2546_v28 = vclamps-f32 %v2094_v25, 5.0  ;;  %v2113_v56 = vadd.f32 %v4092_v34, %v2072_v15  ;;  %v1787_v36 = vmul.f32 3.0, %v1701_v18  ;;  %vm4679_vm8 = vmor %vm1728_vm12, %vm1729_vm3 }
 0x191   :  { %2241 = vperm.xlu2 %2579, %v2187_v48   ;;  %v1737_v49 = vmul.f32 %v4528_v30, %v1736_v35  ;;  %v1727_v54 = vmul.f32 %v4550_v39, %v1726_v10  ;;  %v1755_v7 = vmul.f32 0.5, %v1754_v38  ;;  %v1833_v4 = vmul.f32 -0.7, %v1801_v41  ;;  %vm4685_vm7 = vmor %vm1738_vm15, %vm1739_vm4 }
 0x192   :  { %v1834_v20 = vmul.f32 -0.7, %v1802_v5  ;;  %v1853_v47 = vmul.f32 -0.7, %v1821_v50  ;;  %v2565_v52 = vclamps-f32 %v2113_v56, 5.0  ;;  %v1792_v21 = vmul.f32 3.0, %v1751_v43 }
 0x193   :  { %v2189_v11 = vmul.f32 %v2545_v45, %v1833_v4  ;;  %v1819_v13 = vmin.f32 %v1787_v36, 1.0  ;;  %v1756_v60 = vsub.f32 1.5, %v1755_v7  ;;  %v1731_v8 = vsel %vm4679_vm8, %v4550_v39, %v1727_v54 }
 0x194   :  { %v4689_v26 = vpop.eup %2772  ;;  %v2190_v27 = vmul.f32 %v2546_v28, %v1834_v20  ;;  %v4691_v33 = vmul.f32 %v2565_v52, %v1853_v47  ;;  %v1824_v1 = vmin.f32 %v1792_v21, 1.0  ;;  %v1741_v25 = vsel %vm4685_vm7, %v4528_v30, %v1737_v49 }
 0x195   :  { %v909_v22 = vmul.f32 %v4689_v26, %v4663_v63  ;;  %v2066_v57 = vpop.xlane.xlu0 %2065  ;;  %v4698_v35 = vpop.xlane.xlu1 %809  ;;  %vm1758_vm2 = vweird.f32 %v5421_v17  ;;  %vm1759_vm5 = vweird.f32 %v4624_v16  ;;  %v1851_v39 = vmul.f32 -0.7, %v1819_v13 }
 0x196   :  { %v2111_v48 = vadd.f32 %v4092_v34, %v2066_v57  ;;  %v2081_v10 = vpop.xlane.xlu2 %2080  ;;  %v1790_v18 = vmul.f32 3.0, %v1731_v8  ;;  %v1757_v5 = vmul.f32 %v4624_v16, %v1756_v60  ;;  %v1791_v45 = vmul.f32 3.0, %v1741_v25  ;;  %vm4709_vm11 = vmor %vm1758_vm2, %vm1759_vm5 }
 0x197   :  { %2251 = vperm.xlu0 %2577, %v2189_v11   ;;  %v910_v44 = vmul.f32 %v4689_v26, %v909_v22  ;;  %v2116_v38 = vadd.f32 %v4092_v34, %v2081_v10  ;;  %2774 = vrsqrt.f32 %v4698_v35  ;;  %v1856_v30 = vmul.f32 -0.7, %v1824_v1 }
 0x198   :  { %v2563_v41 = vclamps-f32 %v2111_v48, 5.0  ;;  %v1822_v56 = vmin.f32 %v1790_v18, 1.0  ;;  %v1823_v49 = vmin.f32 %v1791_v45, 1.0  ;;  %v1761_v7 = vsel %vm4709_vm11, %v4624_v16, %v1757_v5  ;;  %v704_v18 = vpop.f32.mrf.mxu1 }
 0x199   :  { %2256 = vperm.xlu2 %2579, %v2190_v27   ;;  %v911_v50 = vmul.f32 0.5, %v910_v44  ;;  %v2568_v17 = vclamps-f32 %v2116_v38, 5.0  ;;  %v1793_v11 = vmul.f32 3.0, %v1761_v7  ;;  %vm915_vm9 = vweird.f32 %v4689_v26  ;;  %v5436_v44 = vld [vmem:[#allocation30_spill] sm:$0xff] }
 0x19a   :  { %v4714_v43 = vmul.f32 %v2563_v41, %v1851_v39  ;;  %v1854_v21 = vmul.f32 -0.7, %v1822_v56  ;;  %v1855_v13 = vmul.f32 -0.7, %v1823_v49  ;;  %vm914_vm10 = vweird.f32 %v4663_v63 }
 0x19b   :  { %v4716_v28 = vmul.f32 %v2568_v17, %v1856_v30  ;;  %v912_v36 = vsub.f32 1.5, %v911_v50  ;;  %vm916_vm1 = vmor %vm914_vm10, %vm915_vm9  ;;  %v1825_v8 = vmin.f32 %v1793_v11, 1.0  ;;  %2776 = vrsqrt.f32 %v4628_v0  ;;  %v5437_v17 = vld [vmem:[#allocation7_spill] sm:$0xff] }
 0x19c   :  { %vm924_vm6 = vweird.f32 %v4698_v35  ;;  %vm904_vm12 = vweird.f32 %v4628_v0 }
 0x19d   :  { %v2075_v54 = vpop.xlane.xlu0 %2074  ;;  %v2078_v4 = vpop.xlane.xlu1 %2077  ;;  %v913_v27 = vmul.f32 %v4689_v26, %v912_v36  ;;  %v1857_v39 = vmul.f32 -0.7, %v1825_v8  ;;  %v2837_v36 = vld [vmem:[%s5287_s1 + $0x8] sm:$0xff] }
 0x19e   :  { %v2114_v9 = vadd.f32 %v4092_v34, %v2075_v54  ;;  %v2115_v20 = vadd.f32 %v4092_v34, %v2078_v4  ;;  %v4723_v47 = vpop.xlane.xlu2 %812  ;;  %v2775_v52 = vpop.eup %2774 }
 0x19f   :  { %v919_v16 = vmul.f32 %v2775_v52, %v4698_v35  ;;  %v917_v1 = vsel %vm916_vm1, %v4689_v26, %v913_v27  ;;  %2778 = vrsqrt.f32 %v4723_v47  ;;  %vm925_vm13 = vweird.f32 %v2775_v52 }
 0x1a0   :  { %v2566_v58 = vclamps-f32 %v2114_v9, 5.0  ;;  %v2567_v60 = vclamps-f32 %v2115_v20, 5.0  ;;  %v1219_v41 = vmul.f32 5.0, %v917_v1  ;;  %v707_v7 = vpop.f32.mrf.mxu1  ;;  %vm926_vm14 = vmor %vm924_vm6, %vm925_vm13  ;;  %vm934_vm8 = vweird.f32 %v4723_v47 }
 0x1a1   :  { %v920_v10 = vmul.f32 %v2775_v52, %v919_v16  ;;  %v2777_v45 = vpop.eup %2776 }
 0x1a2   :  { %v4727_v22 = vmul.f32 %v2566_v58, %v1854_v21  ;;  %v4731_v57 = vmul.f32 %v2567_v60, %v1855_v13  ;;  %v1251_v15 = vmin.f32 %v1219_v41, 1.0  ;;  %v4757_v21 = vadd.f32 %v707_v7, %v5391_v59 }
 0x1a3   :  { %v921_v50 = vmul.f32 0.5, %v920_v10  ;;  %vm905_vm15 = vweird.f32 %v2777_v45 }
 0x1a4   :  { %v1283_v56 = vmul.f32 %v1251_v15, %v5437_v17  ;;  %v781_v60 = vmul.f32 %v4757_v21, %v4757_v21  ;;  %vm906_vm3 = vmor %vm904_vm12, %vm905_vm15 }
 0x1a5   :  { %v2084_v48 = vpop.xlane.xlu0 %2083  ;;  %v922_v26 = vsub.f32 1.5, %v921_v50  ;;  %v2779_v20 = vpop.eup %2778 }
 0x1a6   :  { %v2117_v25 = vadd.f32 %v4092_v34, %v2084_v48  ;;  %2246 = vperm.xlu1 %2578, %v5436_v44   ;;  %v4737_v38 = vpop.xlane.xlu2 %815  ;;  %v899_v34 = vmul.f32 %v2777_v45, %v4628_v0  ;;  %v929_v27 = vmul.f32 %v2779_v20, %v4723_v47  ;;  %v835_v48 = vsel %vm280_vm0, %v781_v60, 0.0 }
 0x1a7   :  { %v923_v9 = vmul.f32 %v2775_v52, %v922_v26  ;;  %vm935_vm4 = vweird.f32 %v2779_v20  ;;  %vm944_vm10 = vweird.f32 %v4737_v38 }
 0x1a8   :  { %v2569_v63 = vclamps-f32 %v2117_v25, 5.0  ;;  %v900_v4 = vmul.f32 %v2777_v45, %v899_v34  ;;  %v930_v1 = vmul.f32 %v2779_v20, %v929_v27  ;;  %vm936_vm7 = vmor %vm934_vm8, %vm935_vm4 }
 0x1a9   :  { %v927_v11 = vsel %vm926_vm14, %v2775_v52, %v923_v9 }
 0x1aa   :  { %v4739_v5 = vmul.f32 %v2569_v63, %v1857_v39  ;;  %v901_v58 = vmul.f32 0.5, %v900_v4  ;;  %v1220_v35 = vmul.f32 5.0, %v927_v11  ;;  %v931_v52 = vmul.f32 0.5, %v930_v1  ;;  %v5438_v63 = vld [vmem:[#allocation8_spill] sm:$0xff]  ;;  %v2839_v4 = vld [vmem:[%s5287_s1] sm:$0xff] }
 0x1ac   :  { %v902_v8 = vsub.f32 1.5, %v901_v58  ;;  %v1252_v44 = vmin.f32 %v1220_v35, 1.0  ;;  %v932_v34 = vsub.f32 1.5, %v931_v52 }
 0x1ad   :  { %v4760_v13 = vpop.xlane.xlu0 %818 }
 0x1ae   :  { %2261 = vperm.xlu1 %2578, %v4195_v24   ;;  %v2222_v30 = vpop.permute.xlu2 %2221  ;;  %v4754_v24 = vadd.f32 %v704_v18, %v5391_v59  ;;  %v903_v10 = vmul.f32 %v2777_v45, %v902_v8  ;;  %v1284_v41 = vmul.f32 %v1252_v44, %v5438_v63  ;;  %v2838_v18 = vld [vmem:[%s5287_s1 + $0x10] sm:$0xff]  ;;  %v933_v17 = vmul.f32 %v2779_v20, %v932_v34  ;;  %v5440_v8 = vld [vmem:[#allocation9_spill] sm:$0xff] }
 0x1af   :  { %v2375_v49 = vmul.f32 %v2837_v36, %v2222_v30  ;;  %2780 = vrsqrt.f32 %v4760_v13  ;;  %vm954_vm5 = vweird.f32 %v4760_v13 }
 0x1b0   :  { %v780_v16 = vmul.f32 %v4754_v24, %v4754_v24  ;;  %v907_v15 = vsel %vm906_vm3, %v2777_v45, %v903_v10  ;;  %v937_v36 = vsel %vm936_vm7, %v2779_v20, %v933_v17  ;;  %v710_v45 = vpop.f32.mrf.mxu1  ;;  %2782 = vrsqrt.f32 %v4737_v38 }
 0x1b1   :  { %v2407_v54 = vadd.f32 %v2375_v49, %v1283_v56  ;;  %v1218_v0 = vmul.f32 5.0, %v907_v15  ;;  %v1221_v58 = vmul.f32 5.0, %v937_v36  ;;  %v4786_v11 = vadd.f32 %v710_v45, %v5391_v59 }
 0x1b2   :  { %v832_v25 = vsel %vm280_vm0, %v780_v16, 0.0 }
 0x1b3   :  { %2439 = vst.msk [vmem:[%s5290_s5 + $0x8] sm:$0xff] %vm280_vm0, %v2407_v54  ;;  %v1250_v56 = vmin.f32 %v1218_v0, 1.0  ;;  %v5439_v54 = vld [vmem:[#allocation6_spill] sm:$0xff]  ;;  %v1253_v20 = vmin.f32 %v1221_v58, 1.0  ;;  %v782_v16 = vmul.f32 %v4786_v11, %v4786_v11 }
 0x1b5   :  { %v4773_v30 = vpop.xlane.xlu1 %821  ;;  %v1282_v7 = vmul.f32 %v1250_v56, %v5439_v54  ;;  %v2781_v27 = vpop.eup %2780  ;;  %v1285_v1 = vmul.f32 %v1253_v20, %v5440_v8  ;;  %v838_v10 = vsel %vm280_vm0, %v782_v16, 0.0 }
 0x1b6   :  { %v949_v60 = vmul.f32 %v2781_v27, %v4760_v13  ;;  %vm955_vm2 = vweird.f32 %v2781_v27  ;;  %vm964_vm8 = vweird.f32 %v4773_v30 }
 0x1b7   :  { %vm956_vm11 = vmor %vm954_vm5, %vm955_vm2 }
 0x1b8   :  { %v950_v44 = vmul.f32 %v2781_v27, %v949_v60  ;;  %v713_v56 = vpop.f32.mrf.mxu1 }
 0x1c1   :  { %836 = vadd.xlane.f32.xlu0 %v835_v48  ;;  %v2840_v48 = vld [vmem:[%s5287_s1 + $0x18] sm:$0xff] }
 0x1c2   :  { %833 = vadd.xlane.f32.xlu2 %v832_v25 }
 0x1c3   :  { %v2227_v39 = vpop.permute.xlu0 %2226 }
 0x1c4   :  { %v2376_v50 = vmul.f32 %v2838_v18, %v2227_v39  ;;  %v2783_v39 = vpop.eup %2782 }
 0x1c5   :  { %vm945_vm9 = vweird.f32 %v2783_v39 }
 0x1c6   :  { %v2408_v26 = vadd.f32 %v2376_v50, %v1284_v41  ;;  %v939_v41 = vmul.f32 %v2783_v39, %v4737_v38  ;;  %vm946_vm1 = vmor %vm944_vm10, %vm945_vm9 }
 0x1c8   :  { %2440 = vst.msk [vmem:[%s5290_s5 + $0x10] sm:$0xff] %vm280_vm0, %v2408_v26 }
 0x1cd   :  { %v2217_v49 = vpop.permute.xlu1 %2216 }
 0x1ce   :  { %v2374_v9 = vmul.f32 %v2839_v4, %v2217_v49  ;;  %v5441_v49 = vld [vmem:[#allocation18_spill] sm:$0xff] }
 0x1d0   :  { %v2406_v47 = vadd.f32 %v2374_v9, %v1282_v7  ;;  %v2841_v7 = vld [vmem:[%s5287_s1 + $0x28] sm:$0xff] }
 0x1d2   :  { %2438 = vst.msk [vmem:[%s5290_s5] sm:$0xff] %vm280_vm0, %v2406_v47 }
 0x1d5   :  { %2266 = vperm.xlu0 %2577, %v4356_v37   ;;  %v2232_v35 = vpop.permute.xlu1 %2231  ;;  %v951_v37 = vmul.f32 0.5, %v950_v44 }
 0x1d6   :  { %v2377_v25 = vmul.f32 %v2840_v48, %v2232_v35  ;;  %v716_v48 = vpop.f32.mrf.mxu1 }
 0x1d7   :  { %v952_v63 = vsub.f32 1.5, %v951_v37 }
 0x1d8   :  { %v2409_v52 = vadd.f32 %v2377_v25, %v1285_v1  ;;  %839 = vadd.xlane.f32.xlu1 %v838_v10  ;;  %v4828_v10 = vadd.f32 %v716_v48, %v5391_v59 }
 0x1d9   :  { %v953_v18 = vmul.f32 %v2781_v27, %v952_v63 }
 0x1da   :  { %2271 = vperm.xlu2 %2579, %v4354_v31   ;;  %2441 = vst.msk [vmem:[%s5290_s5 + $0x18] sm:$0xff] %vm280_vm0, %v2409_v52  ;;  %v940_v31 = vmul.f32 %v2783_v39, %v939_v41 }
 0x1db   :  { %v957_v50 = vsel %vm956_vm11, %v2781_v27, %v953_v18  ;;  %v4838_v18 = vadd.f32 %v713_v56, %v5391_v59 }
 0x1dc   :  { %v941_v15 = vmul.f32 0.5, %v940_v31  ;;  %v1223_v26 = vmul.f32 5.0, %v957_v50 }
 0x1dd   :  { %2281 = vperm.xlu0 %2577, %v4416_v55  }
 0x1de   :  { %v942_v17 = vsub.f32 1.5, %v941_v15  ;;  %v1255_v55 = vmin.f32 %v1223_v26, 1.0 }
 0x1e0   :  { %v1287_v54 = vmul.f32 %v1255_v55, %v5441_v49 }
 0x1e2   :  { %2286 = vperm.xlu2 %2579, %v4414_v14   ;;  %v943_v14 = vmul.f32 %v2783_v39, %v942_v17 }
 0x1e4   :  { %v947_v20 = vsel %vm946_vm1, %v2783_v39, %v943_v14 }
 0x1e5   :  { %v1222_v1 = vmul.f32 5.0, %v947_v20 }
 0x1e7   :  { %v1254_v39 = vmin.f32 %v1222_v1, 1.0 }
 0x1ec   :  { %v825_v34 = vpop.xlane.xlu2 %824 }
 0x1ed   :  { %2784 = vrsqrt.f32 %v825_v34  ;;  %vm974_vm14 = vweird.f32 %v825_v34 }
 0x1ee   :  { %v828_v0 = vpop.xlane.xlu0 %827 }
 0x1ef   :  { %2786 = vrsqrt.f32 %v828_v0  ;;  %vm984_vm12 = vweird.f32 %v828_v0 }
 0x1f0   :  { %2788 = vrsqrt.f32 %v4773_v30 }
 0x1f1   :  { %2276 = vperm.xlu1 %2578, %v4277_v19  }
 0x1f3   :  { %v2785_v36 = vpop.eup %2784 }
 0x1f4   :  { %v969_v45 = vmul.f32 %v2785_v36, %v825_v34  ;;  %v2242_v13 = vpop.permute.xlu2 %2241  ;;  %vm975_vm13 = vweird.f32 %v2785_v36  ;;  %v5444_v34 = vld [vmem:[#allocation12_spill] sm:$0xff] }
 0x1f5   :  { %v2379_v4 = vmul.f32 %v2841_v7, %v2242_v13  ;;  %v2787_v9 = vpop.eup %2786  ;;  %vm4830_vm15 = vmor %vm974_vm14, %vm975_vm13  ;;  %v1286_v26 = vmul.f32 %v1254_v39, %v5444_v34  ;;  %v2845_v34 = vld [vmem:[%s5287_s1 + $0x30] sm:$0xff] }
 0x1f6   :  { %v970_v58 = vmul.f32 %v2785_v36, %v969_v45  ;;  %v979_v27 = vmul.f32 %v2787_v9, %v828_v0  ;;  %v4822_v19 = vpop.eup %2788  ;;  %vm985_vm6 = vweird.f32 %v2787_v9  ;;  %v2842_v0 = vld [vmem:[%s5287_s1 + $0x20] sm:$0xff] }
 0x1f7   :  { %v2411_v47 = vadd.f32 %v2379_v4, %v1287_v54  ;;  %v959_v38 = vmul.f32 %v4822_v19, %v4773_v30  ;;  %vm986_vm3 = vmor %vm984_vm12, %vm985_vm6  ;;  %v2843_v54 = vld [vmem:[%s5287_s1 + $0x40] sm:$0xff]  ;;  %v783_v4 = vmul.f32 %v4838_v18, %v4838_v18  ;;  %vm965_vm4 = vweird.f32 %v4822_v19 }
 0x1f8   :  { %v971_v60 = vmul.f32 0.5, %v970_v58  ;;  %v980_v16 = vmul.f32 %v2787_v9, %v979_v27  ;;  %vm966_vm7 = vmor %vm964_vm8, %vm965_vm4 }
 0x1f9   :  { %2443 = vst.msk [vmem:[%s5290_s5 + $0x28] sm:$0xff] %vm280_vm0, %v2411_v47  ;;  %2291 = vperm.xlu1 %2578, %v4330_v53   ;;  %v960_v53 = vmul.f32 %v4822_v19, %v959_v38 }
 0x1fa   :  { %v972_v35 = vsub.f32 1.5, %v971_v60  ;;  %v981_v8 = vmul.f32 0.5, %v980_v16  ;;  %v841_v60 = vsel %vm280_vm0, %v783_v4, 0.0 }
 0x1fb   :  { %v961_v13 = vmul.f32 0.5, %v960_v53 }
 0x1fc   :  { %v973_v25 = vmul.f32 %v2785_v36, %v972_v35  ;;  %v982_v44 = vsub.f32 1.5, %v981_v8  ;;  %v2257_v15 = vpop.permute.xlu2 %2256  ;;  %v2844_v8 = vld [vmem:[%s5287_s1 + $0x38] sm:$0xff] }
 0x1fd   :  { %v2382_v7 = vmul.f32 %v2843_v54, %v2257_v15  ;;  %v962_v47 = vsub.f32 1.5, %v961_v13 }
 0x1fe   :  { %v983_v37 = vmul.f32 %v2787_v9, %v982_v44  ;;  %v977_v63 = vsel %vm4830_vm15, %v2785_v36, %v973_v25  ;;  %v784_v36 = vmul.f32 %v4828_v10, %v4828_v10 }
 0x1ff   :  { %v1225_v14 = vmul.f32 5.0, %v977_v63  ;;  %v963_v48 = vmul.f32 %v4822_v19, %v962_v47 }
 0x200   :  { %v987_v41 = vsel %vm986_vm3, %v2787_v9, %v983_v37  ;;  %v831_v55 = vpop.xlane.xlu1 %830  ;;  %v844_v9 = vsel %vm280_vm0, %v784_v36, 0.0 }
 0x201   :  { %v1226_v31 = vmul.f32 5.0, %v987_v41  ;;  %v2237_v50 = vpop.permute.xlu0 %2236  ;;  %2790 = vrsqrt.f32 %v831_v55  ;;  %v1257_v58 = vmin.f32 %v1225_v14, 1.0  ;;  %vm994_vm5 = vweird.f32 %v831_v55  ;;  %v719_v41 = vpop.f32.mrf.mxu1 }
 0x202   :  { %v2378_v17 = vmul.f32 %v2842_v0, %v2237_v50  ;;  %v5445_v50 = vld [vmem:[#allocation25_spill] sm:$0xff]  ;;  %v4880_v0 = vadd.f32 %v719_v41, %v5391_v59 }
 0x203   :  { %v1258_v45 = vmin.f32 %v1226_v31, 1.0  ;;  %v1289_v35 = vmul.f32 %v1257_v58, %v4425_v3  ;;  %v967_v3 = vsel %vm966_vm7, %v4822_v19, %v963_v48  ;;  %v722_v31 = vpop.f32.mrf.mxu2 }
 0x204   :  { %v2410_v56 = vadd.f32 %v2378_v17, %v1286_v26  ;;  %v1224_v37 = vmul.f32 5.0, %v967_v3  ;;  %v785_v36 = vmul.f32 %v4880_v0, %v4880_v0 }
 0x205   :  { %v1290_v49 = vmul.f32 %v1258_v45, %v4442_v29 }
 0x206   :  { %2442 = vst.msk [vmem:[%s5290_s5 + $0x20] sm:$0xff] %vm280_vm0, %v2410_v56  ;;  %v1256_v63 = vmin.f32 %v1224_v37, 1.0 }
 0x207   :  { %v2414_v27 = vadd.f32 %v2382_v7, %v1290_v49  ;;  %845 = vadd.xlane.f32.xlu0 %v844_v9  ;;  %v2791_v29 = vpop.eup %2790  ;;  %v847_v49 = vsel %vm280_vm0, %v785_v36, 0.0 }
 0x208   :  { %v989_v16 = vmul.f32 %v2791_v29, %v831_v55  ;;  %vm995_vm2 = vweird.f32 %v2791_v29  ;;  %v1288_v15 = vmul.f32 %v1256_v63, %v5445_v50  ;;  %v2847_v63 = vld [vmem:[%s5287_s1 + $0x58] sm:$0xff] }
 0x209   :  { %2446 = vst.msk [vmem:[%s5290_s5 + $0x40] sm:$0xff] %vm280_vm0, %v2414_v27  ;;  %v2252_v20 = vpop.permute.xlu0 %2251  ;;  %vm996_vm11 = vmor %vm994_vm5, %vm995_vm2 }
 0x20a   :  { %v2381_v1 = vmul.f32 %v2844_v8, %v2252_v20  ;;  %v990_v25 = vmul.f32 %v2791_v29, %v989_v16 }
 0x20b   :  { %842 = vadd.xlane.f32.xlu2 %v841_v60  ;;  %v725_v56 = vpop.f32.mrf.mxu2 }
 0x20c   :  { %v2413_v38 = vadd.f32 %v2381_v1, %v1289_v35  ;;  %v991_v44 = vmul.f32 0.5, %v990_v25  ;;  %v4917_v41 = vadd.f32 %v725_v56, %v5391_v59 }
 0x20e   :  { %2445 = vst.msk [vmem:[%s5290_s5 + $0x38] sm:$0xff] %vm280_vm0, %v2413_v38  ;;  %v992_v52 = vsub.f32 1.5, %v991_v44 }
 0x210   :  { %v993_v39 = vmul.f32 %v2791_v29, %v992_v52  ;;  %v4910_v52 = vadd.f32 %v722_v31, %v5391_v59  ;;  %v2848_v31 = vld [vmem:[%s5287_s1 + $0x50] sm:$0xff] }
 0x212   :  { %v997_v53 = vsel %vm996_vm11, %v2791_v29, %v993_v39 }
 0x213   :  { %v1227_v19 = vmul.f32 5.0, %v997_v53 }
 0x215   :  { %v1259_v55 = vmin.f32 %v1227_v19, 1.0 }
 0x217   :  { %v1291_v45 = vmul.f32 %v1259_v55, %v4616_v6 }
 0x218   :  { %v2247_v30 = vpop.permute.xlu1 %2246 }
 0x219   :  { %v2380_v26 = vmul.f32 %v2845_v34, %v2247_v30 }
 0x21b   :  { %2296 = vperm.xlu0 %2577, %v4488_v51   ;;  %v2412_v17 = vadd.f32 %v2380_v26, %v1288_v15  ;;  %v2846_v51 = vld [vmem:[%s5287_s1 + $0x48] sm:$0xff]  ;;  %v786_v26 = vmul.f32 %v4910_v52, %v4910_v52 }
 0x21d   :  { %2444 = vst.msk [vmem:[%s5290_s5 + $0x30] sm:$0xff] %vm280_vm0, %v2412_v17  ;;  %v850_v19 = vsel %vm280_vm0, %v786_v26, 0.0 }
 0x220   :  { %v2262_v14 = vpop.permute.xlu1 %2261 }
 0x221   :  { %v2383_v13 = vmul.f32 %v2846_v51, %v2262_v14 }
 0x223   :  { %2301 = vperm.xlu2 %2579, %v4486_v32   ;;  %2311 = vperm.xlu0 %2577, %v4548_v42   ;;  %v2415_v54 = vadd.f32 %v2383_v13, %v1291_v45  ;;  %v4901_v32 = vpop.f32.mrf.mxu2 }
 0x224   :  { %848 = vadd.xlane.f32.xlu1 %v847_v49 }
 0x225   :  { %2447 = vst.msk [vmem:[%s5290_s5 + $0x48] sm:$0xff] %vm280_vm0, %v2415_v54 }
 0x22b   :  { %2316 = vperm.xlu2 %2579, %v4546_v46   ;;  %2326 = vperm.xlu0 %2577, %v4601_v2   ;;  %v4903_v42 = vpop.f32.mrf.mxu2 }
 0x233   :  { %v4906_v60 = vpop.f32.mrf.mxu2 }
 0x234   :  { %v837_v6 = vpop.xlane.xlu0 %836 }
 0x235   :  { %v834_v7 = vpop.xlane.xlu2 %833  ;;  %2792 = vrsqrt.f32 %v837_v6  ;;  %vm1014_vm1 = vweird.f32 %v837_v6 }
 0x236   :  { %2794 = vrsqrt.f32 %v834_v7  ;;  %vm1004_vm6 = vweird.f32 %v834_v7 }
 0x23b   :  { %v2793_v4 = vpop.eup %2792 }
 0x23c   :  { %v2795_v9 = vpop.eup %2794  ;;  %v1009_v58 = vmul.f32 %v2793_v4, %v837_v6  ;;  %vm1015_vm9 = vweird.f32 %v2793_v4 }
 0x23d   :  { %v999_v27 = vmul.f32 %v2795_v9, %v834_v7  ;;  %2306 = vperm.xlu1 %2578, %v4399_v40   ;;  %vm1005_vm10 = vweird.f32 %v2795_v9  ;;  %vm1016_vm13 = vmor %vm1014_vm1, %vm1015_vm9  ;;  %v2272_v25 = vpop.permute.xlu2 %2271 }
 0x23e   :  { %v1010_v47 = vmul.f32 %v2793_v4, %v1009_v58  ;;  %vm1006_vm14 = vmor %vm1004_vm6, %vm1005_vm10  ;;  %v2385_v53 = vmul.f32 %v2847_v63, %v2272_v25 }
 0x23f   :  { %v1000_v29 = vmul.f32 %v2795_v9, %v999_v27 }
 0x240   :  { %v1011_v20 = vmul.f32 0.5, %v1010_v47 }
 0x241   :  { %v1001_v46 = vmul.f32 0.5, %v1000_v29 }
 0x242   :  { %v1012_v2 = vsub.f32 1.5, %v1011_v20 }
 0x243   :  { %v1002_v16 = vsub.f32 1.5, %v1001_v46 }
 0x244   :  { %v1013_v35 = vmul.f32 %v2793_v4, %v1012_v2 }
 0x245   :  { %v1003_v8 = vmul.f32 %v2795_v9, %v1002_v16  ;;  %2321 = vperm.xlu1 %2578, %v4457_v12   ;;  %v4919_v12 = vpop.f32.mrf.mxu2  ;;  %v2287_v46 = vpop.permute.xlu2 %2286 }
 0x246   :  { %v1017_v1 = vsel %vm1016_vm13, %v2793_v4, %v1013_v35 }
 0x247   :  { %v1007_v48 = vsel %vm1006_vm14, %v2795_v9, %v1003_v8  ;;  %v1229_v40 = vmul.f32 5.0, %v1017_v1  ;;  %v2267_v3 = vpop.permute.xlu0 %2266  ;;  %v2849_v9 = vld [vmem:[%s5287_s1 + $0x60] sm:$0xff] }
 0x248   :  { %v1228_v38 = vmul.f32 5.0, %v1007_v48  ;;  %v2384_v50 = vmul.f32 %v2848_v31, %v2267_v3 }
 0x249   :  { %v1261_v44 = vmin.f32 %v1229_v40, 1.0 }
 0x24a   :  { %v1260_v37 = vmin.f32 %v1228_v38, 1.0 }
 0x24b   :  { %v1293_v39 = vmul.f32 %v1261_v44, %v4757_v21  ;;  %v840_v34 = vpop.xlane.xlu1 %839 }
 0x24c   :  { %v1292_v30 = vmul.f32 %v1260_v37, %v4754_v24  ;;  %2796 = vrsqrt.f32 %v840_v34  ;;  %v787_v24 = vmul.f32 %v4917_v41, %v4917_v41  ;;  %vm1024_vm12 = vweird.f32 %v840_v34 }
 0x24d   :  { %v2417_v15 = vadd.f32 %v2385_v53, %v1293_v39  ;;  %2336 = vperm.xlu1 %2578, %v4526_v61   ;;  %v4940_v36 = vpop.f32.mrf.mxu2 }
 0x24e   :  { %v2416_v21 = vadd.f32 %v2384_v50, %v1292_v30  ;;  %v853_v17 = vsel %vm280_vm0, %v787_v24, 0.0  ;;  %v4976_v24 = vadd.f32 %v4906_v60, %v5391_v59 }
 0x24f   :  { %2449 = vst.msk [vmem:[%s5290_s5 + $0x58] sm:$0xff] %vm280_vm0, %v2417_v15  ;;  %v2282_v29 = vpop.permute.xlu0 %2281 }
 0x250   :  { %2448 = vst.msk [vmem:[%s5290_s5 + $0x50] sm:$0xff] %vm280_vm0, %v2416_v21 }
 0x252   :  { %v2797_v61 = vpop.eup %2796 }
 0x253   :  { %v1019_v55 = vmul.f32 %v2797_v61, %v840_v34  ;;  %vm1025_vm15 = vweird.f32 %v2797_v61  ;;  %v2850_v34 = vld [vmem:[%s5287_s1 + $0x70] sm:$0xff] }
 0x254   :  { %851 = vadd.xlane.f32.xlu2 %v850_v19  ;;  %vm1026_vm3 = vmor %vm1024_vm12, %vm1025_vm15  ;;  %v2388_v21 = vmul.f32 %v2850_v34, %v2287_v46 }
 0x255   :  { %854 = vadd.xlane.f32.xlu0 %v853_v17  ;;  %v1020_v14 = vmul.f32 %v2797_v61, %v1019_v55  ;;  %v4942_v49 = vpop.f32.mrf.mxu2  ;;  %v4980_v17 = vadd.f32 %v4903_v42, %v5391_v59 }
 0x257   :  { %v1021_v45 = vmul.f32 0.5, %v1020_v14  ;;  %v2851_v14 = vld [vmem:[%s5287_s1 + $0x68] sm:$0xff]  ;;  %v789_v42 = vmul.f32 %v4980_v17, %v4980_v17 }
 0x259   :  { %v1022_v51 = vsub.f32 1.5, %v1021_v45  ;;  %v2387_v45 = vmul.f32 %v2851_v14, %v2282_v29 }
 0x25b   :  { %v1023_v13 = vmul.f32 %v2797_v61, %v1022_v51 }
 0x25d   :  { %v1027_v56 = vsel %vm1026_vm3, %v2797_v61, %v1023_v13  ;;  %v4949_v47 = vpop.f32.mrf.mxu2 }
 0x25e   :  { %v1230_v54 = vmul.f32 5.0, %v1027_v56  ;;  %v5005_v56 = vadd.f32 %v4940_v36, %v5391_v59 }
 0x260   :  { %v1262_v6 = vmin.f32 %v1230_v54, 1.0  ;;  %v859_v54 = vsel %vm280_vm0, %v789_v42, 0.0 }
 0x262   :  { %v1294_v4 = vmul.f32 %v1262_v6, %v4786_v11  ;;  %v4958_v11 = vadd.f32 %v4901_v32, %v5391_v59 }
 0x263   :  { %v2277_v7 = vpop.permute.xlu1 %2276 }
 0x264   :  { %v2386_v58 = vmul.f32 %v2849_v9, %v2277_v7  ;;  %v792_v9 = vmul.f32 %v5005_v56, %v5005_v56 }
 0x265   :  { %v4964_v20 = vpop.f32.mrf.mxu2 }
 0x266   :  { %v2418_v27 = vadd.f32 %v2386_v58, %v1294_v4  ;;  %v5018_v29 = vadd.f32 %v4964_v20, %v5391_v59 }
 0x268   :  { %2450 = vst.msk [vmem:[%s5290_s5 + $0x60] sm:$0xff] %vm280_vm0, %v2418_v27 }
 0x269   :  { %2341 = vperm.xlu0 %2577, %v4714_v43   ;;  %v788_v43 = vmul.f32 %v4958_v11, %v4958_v11 }
 0x26b   :  { %v856_v2 = vsel %vm280_vm0, %v788_v43, 0.0  ;;  %v2292_v50 = vpop.permute.xlu1 %2291  ;;  %v868_v43 = vsel %vm280_vm0, %v792_v9, 0.0 }
 0x26c   :  { %2331 = vperm.xlu2 %2579, %v4599_v62  }
 0x26d   :  { %v752_v35 = vpop.f32.mrf.mxu2 }
 0x26e   :  { %v5013_v58 = vadd.f32 %v752_v35, %v5391_v59  ;;  %v795_v35 = vmul.f32 %v5018_v29, %v5018_v29 }
 0x271   :  { %2356 = vperm.xlu0 %2577, %v4727_v22  }
 0x274   :  { %2346 = vperm.xlu2 %2579, %v4651_v23  }
 0x275   :  { %v4967_v25 = vpop.f32.mrf.mxu2 }
 0x277   :  { %857 = vadd.xlane.f32.xlu1 %v856_v2  ;;  %v796_v2 = vmul.f32 %v5013_v58, %v5013_v58 }
 0x27a   :  { %v846_v16 = vpop.xlane.xlu0 %845 }
 0x27b   :  { %2798 = vrsqrt.f32 %v846_v16  ;;  %vm1044_vm8 = vweird.f32 %v846_v16 }
 0x27d   :  { %v758_v19 = vpop.f32.mrf.mxu2 }
 0x27e   :  { %v843_v62 = vpop.xlane.xlu2 %842 }
 0x27f   :  { %2800 = vrsqrt.f32 %v843_v62  ;;  %vm1034_vm5 = vweird.f32 %v843_v62 }
 0x281   :  { %v2799_v32 = vpop.eup %2798 }
 0x282   :  { %v1039_v8 = vmul.f32 %v2799_v32, %v846_v16  ;;  %vm1045_vm4 = vweird.f32 %v2799_v32 }
 0x283   :  { %vm1046_vm7 = vmor %vm1044_vm8, %vm1045_vm4 }
 0x284   :  { %v1040_v1 = vmul.f32 %v2799_v32, %v1039_v8 }
 0x285   :  { %v2801_v22 = vpop.eup %2800  ;;  %v761_v6 = vpop.f32.mrf.mxu2 }
 0x286   :  { %v1029_v48 = vmul.f32 %v2801_v22, %v843_v62  ;;  %v1041_v23 = vmul.f32 0.5, %v1040_v1  ;;  %vm1035_vm2 = vweird.f32 %v2801_v22  ;;  %v5026_v20 = vadd.f32 %v761_v6, %v5391_v59 }
 0x287   :  { %vm1036_vm11 = vmor %vm1034_vm5, %vm1035_vm2  ;;  %v5030_v1 = vadd.f32 %v758_v19, %v5391_v59  ;;  %v5064_v19 = vadd.f32 %v4949_v47, %v5391_v59 }
 0x288   :  { %v1030_v40 = vmul.f32 %v2801_v22, %v1029_v48  ;;  %v1042_v38 = vsub.f32 1.5, %v1041_v23  ;;  %v877_v23 = vsel %vm280_vm0, %v795_v35, 0.0 }
 0x289   :  { %v794_v14 = vmul.f32 %v5064_v19, %v5064_v19 }
 0x28a   :  { %v1031_v44 = vmul.f32 0.5, %v1030_v40  ;;  %v1043_v3 = vmul.f32 %v2799_v32, %v1042_v38 }
 0x28b   :  { %v874_v47 = vsel %vm280_vm0, %v794_v14, 0.0 }
 0x28c   :  { %v1032_v37 = vsub.f32 1.5, %v1031_v44  ;;  %v1047_v39 = vsel %vm1046_vm7, %v2799_v32, %v1043_v3  ;;  %v799_v44 = vmul.f32 %v5026_v20, %v5026_v20  ;;  %v798_v3 = vmul.f32 %v5030_v1, %v5030_v1 }
 0x28d   :  { %v1232_v63 = vmul.f32 5.0, %v1047_v39  ;;  %v764_v16 = vpop.f32.mrf.mxu2  ;;  %v5033_v40 = vpop.permute.xlu0 %2296 }
 0x28e   :  { %v1033_v53 = vmul.f32 %v2801_v22, %v1032_v37  ;;  %v2852_v37 = vld [vmem:[%s5287_s1 + $0x78] sm:$0xff] }
 0x28f   :  { %v1264_v30 = vmin.f32 %v1232_v63, 1.0  ;;  %v2389_v39 = vmul.f32 %v2852_v37, %v2292_v50  ;;  %v886_v50 = vsel %vm280_vm0, %v798_v3, 0.0  ;;  %v2854_v37 = vld [vmem:[%s5287_s1 + $0x88] sm:$0xff] }
 0x290   :  { %v1037_v31 = vsel %vm1036_vm11, %v2801_v22, %v1033_v53  ;;  %2351 = vperm.xlu1 %2578, %v4691_v33   ;;  %v790_v33 = vmul.f32 %v4976_v24, %v4976_v24  ;;  %v880_v22 = vsel %vm280_vm0, %v796_v2, 0.0 }
 0x291   :  { %v1231_v15 = vmul.f32 5.0, %v1037_v31  ;;  %v1296_v26 = vmul.f32 %v1264_v30, %v4828_v10  ;;  %v5045_v31 = vadd.f32 %v4919_v12, %v5391_v59 }
 0x292   :  { %v862_v13 = vsel %vm280_vm0, %v790_v33, 0.0  ;;  %v5076_v33 = vadd.f32 %v4967_v25, %v5391_v59 }
 0x293   :  { %v1263_v61 = vmin.f32 %v1231_v15, 1.0  ;;  %v2420_v55 = vadd.f32 %v2388_v21, %v1296_v26  ;;  %v889_v15 = vsel %vm280_vm0, %v799_v44, 0.0  ;;  %v791_v12 = vmul.f32 %v5045_v31, %v5045_v31 }
 0x295   :  { %v1295_v10 = vmul.f32 %v1263_v61, %v4838_v18  ;;  %2452 = vst.msk [vmem:[%s5290_s5 + $0x70] sm:$0xff] %vm280_vm0, %v2420_v55  ;;  %v5000_v18 = vadd.f32 %v4942_v49, %v5391_v59  ;;  %v767_v53 = vpop.f32.mrf.mxu2  ;;  %v5056_v21 = vpop.permute.xlu0 %2311  ;;  %v865_v61 = vsel %vm280_vm0, %v791_v12, 0.0 }
 0x296   :  { %v5049_v34 = vadd.f32 %v767_v53, %v5391_v59 }
 0x297   :  { %v2419_v60 = vadd.f32 %v2387_v45, %v1295_v10  ;;  %v849_v51 = vpop.xlane.xlu1 %848  ;;  %v793_v7 = vmul.f32 %v5000_v18, %v5000_v18 }
 0x298   :  { %2802 = vrsqrt.f32 %v849_v51  ;;  %vm1054_vm10 = vweird.f32 %v849_v51  ;;  %v801_v26 = vmul.f32 %v5049_v34, %v5049_v34 }
 0x299   :  { %2451 = vst.msk [vmem:[%s5290_s5 + $0x68] sm:$0xff] %vm280_vm0, %v2419_v60  ;;  %v871_v36 = vsel %vm280_vm0, %v793_v7, 0.0  ;;  %v797_v60 = vmul.f32 %v5076_v33, %v5076_v33 }
 0x29a   :  { %v895_v55 = vsel %vm280_vm0, %v801_v26, 0.0 }
 0x29b   :  { %863 = vadd.xlane.f32.xlu0 %v862_v13  ;;  %v5083_v13 = vadd.f32 %v764_v16, %v5391_v59 }
 0x29d   :  { %860 = vadd.xlane.f32.xlu2 %v859_v54  ;;  %v5072_v10 = vpop.permute.xlu0 %2326  ;;  %v883_v54 = vsel %vm280_vm0, %v797_v60, 0.0  ;;  %v800_v6 = vmul.f32 %v5083_v13, %v5083_v13 }
 0x29e   :  { %v2803_v4 = vpop.eup %2802 }
 0x29f   :  { %v1049_v49 = vmul.f32 %v2803_v4, %v849_v51  ;;  %vm1055_vm9 = vweird.f32 %v2803_v4 }
 0x2a0   :  { %vm1056_vm1 = vmor %vm1054_vm10, %vm1055_vm9 }
 0x2a1   :  { %v1050_v27 = vmul.f32 %v2803_v4, %v1049_v49 }
 0x2a3   :  { %872 = vadd.xlane.f32.xlu0 %v871_v36  ;;  %v1051_v46 = vmul.f32 0.5, %v1050_v27 }
 0x2a5   :  { %869 = vadd.xlane.f32.xlu2 %v868_v43  ;;  %v1052_v62 = vsub.f32 1.5, %v1051_v46  ;;  %v892_v43 = vsel %vm280_vm0, %v800_v6, 0.0 }
 0x2a7   :  { %v1053_v32 = vmul.f32 %v2803_v4, %v1052_v62 }
 0x2a9   :  { %v1057_v8 = vsel %vm1056_vm1, %v2803_v4, %v1053_v32 }
 0x2aa   :  { %v1233_v48 = vmul.f32 5.0, %v1057_v8 }
 0x2ab   :  { %881 = vadd.xlane.f32.xlu0 %v880_v22 }
 0x2ac   :  { %v1265_v38 = vmin.f32 %v1233_v48, 1.0 }
 0x2ad   :  { %878 = vadd.xlane.f32.xlu2 %v877_v23 }
 0x2ae   :  { %v1297_v63 = vmul.f32 %v1265_v38, %v4880_v0  ;;  %v2302_v0 = vpop.permute.xlu2 %2301  ;;  %v2853_v38 = vld [vmem:[%s5287_s1 + $0x80] sm:$0xff] }
 0x2af   :  { %v2307_v9 = vpop.permute.xlu1 %2306 }
 0x2b0   :  { %v2421_v30 = vadd.f32 %v2389_v39, %v1297_v63  ;;  %v2391_v39 = vmul.f32 %v2854_v37, %v2302_v0 }
 0x2b2   :  { %2453 = vst.msk [vmem:[%s5290_s5 + $0x78] sm:$0xff] %vm280_vm0, %v2421_v30 }
 0x2b3   :  { %890 = vadd.xlane.f32.xlu0 %v889_v15 }
 0x2b5   :  { %887 = vadd.xlane.f32.xlu2 %v886_v50 }
 0x2b6   :  { %v5070_v45 = vpop.permute.xlu2 %2316 }
 0x2b7   :  { %v5090_v32 = vpop.permute.xlu1 %2321 }
 0x2ba   :  { %866 = vadd.xlane.f32.xlu1 %v865_v61 }
 0x2bd   :  { %896 = vadd.xlane.f32.xlu2 %v895_v55 }
 0x2bf   :  { %v5105_v15 = vpop.permute.xlu1 %2336 }
 0x2c2   :  { %875 = vadd.xlane.f32.xlu1 %v874_v47 }
 0x2c7   :  { %v852_v42 = vpop.xlane.xlu2 %851  ;;  %2371 = vperm.xlu0 %2577, %v4739_v5  }
 0x2c8   :  { %2804 = vrsqrt.f32 %v852_v42  ;;  %v855_v51 = vpop.xlane.xlu0 %854  ;;  %vm1064_vm6 = vweird.f32 %v852_v42 }
 0x2c9   :  { %2806 = vrsqrt.f32 %v855_v51  ;;  %vm1074_vm12 = vweird.f32 %v855_v51 }
 0x2ca   :  { %884 = vadd.xlane.f32.xlu1 %v883_v54 }
 0x2ce   :  { %v2805_v25 = vpop.eup %2804 }
 0x2cf   :  { %v1059_v7 = vmul.f32 %v2805_v25, %v852_v42  ;;  %v2807_v4 = vpop.eup %2806  ;;  %vm1065_vm13 = vweird.f32 %v2805_v25  ;;  %v5114_v55 = vpop.permute.xlu2 %2331 }
 0x2d0   :  { %v1069_v27 = vmul.f32 %v2807_v4, %v855_v51  ;;  %vm1075_vm14 = vweird.f32 %v2807_v4  ;;  %vm1066_vm15 = vmor %vm1064_vm6, %vm1065_vm13 }
 0x2d1   :  { %v1060_v49 = vmul.f32 %v2805_v25, %v1059_v7  ;;  %vm1076_vm3 = vmor %vm1074_vm12, %vm1075_vm14 }
 0x2d2   :  { %v1070_v5 = vmul.f32 %v2807_v4, %v1069_v27  ;;  %893 = vadd.xlane.f32.xlu1 %v892_v43 }
 0x2d3   :  { %v1061_v36 = vmul.f32 0.5, %v1060_v49 }
 0x2d4   :  { %v1071_v59 = vmul.f32 0.5, %v1070_v5 }
 0x2d5   :  { %v1062_v46 = vsub.f32 1.5, %v1061_v36  ;;  %2361 = vperm.xlu2 %2579, %v4731_v57   ;;  %v2390_v57 = vmul.f32 %v2853_v38, %v5033_v40 }
 0x2d6   :  { %v1072_v16 = vsub.f32 1.5, %v1071_v59 }
 0x2d7   :  { %v1063_v2 = vmul.f32 %v2805_v25, %v1062_v46  ;;  %v5126_v6 = vpop.permute.xlu2 %2346 }
 0x2d8   :  { %v1073_v35 = vmul.f32 %v2807_v4, %v1072_v16 }
 0x2d9   :  { %v1067_v62 = vsel %vm1066_vm15, %v2805_v25, %v1063_v2 }
 0x2da   :  { %v1234_v8 = vmul.f32 5.0, %v1067_v62  ;;  %v1077_v22 = vsel %vm1076_vm3, %v2807_v4, %v1073_v35 }
 0x2db   :  { %v1235_v23 = vmul.f32 5.0, %v1077_v22  ;;  %v5112_v61 = vpop.permute.xlu0 %2341 }
 0x2dc   :  { %v1266_v48 = vmin.f32 %v1234_v8, 1.0 }
 0x2dd   :  { %v1267_v3 = vmin.f32 %v1235_v23, 1.0 }
 0x2de   :  { %v1298_v44 = vmul.f32 %v1266_v48, %v4910_v52 }
 0x2df   :  { %v1299_v53 = vmul.f32 %v1267_v3, %v4917_v41 }
 0x2e0   :  { %v2422_v63 = vadd.f32 %v2390_v57, %v1298_v44 }
 0x2e1   :  { %v2423_v30 = vadd.f32 %v2391_v39, %v1299_v53 }
 0x2e2   :  { %2454 = vst.msk [vmem:[%s5290_s5 + $0x80] sm:$0xff] %vm280_vm0, %v2422_v63 }
 0x2e3   :  { %2455 = vst.msk [vmem:[%s5290_s5 + $0x88] sm:$0xff] %vm280_vm0, %v2423_v30  ;;  %v5120_v25 = vpop.permute.xlu0 %2356 }
 0x2ea   :  { %v858_v52 = vpop.xlane.xlu1 %857 }
 0x2eb   :  { %2808 = vrsqrt.f32 %v858_v52  ;;  %2366 = vperm.xlu1 %2578, %v4716_v28   ;;  %vm1084_vm8 = vweird.f32 %v858_v52  ;;  %v2855_v28 = vld [vmem:[%s5287_s1 + $0x90] sm:$0xff] }
 0x2ec   :  { %v2392_v42 = vmul.f32 %v2855_v28, %v2307_v9 }
 0x2f1   :  { %v2809_v40 = vpop.eup %2808 }
 0x2f2   :  { %v1079_v50 = vmul.f32 %v2809_v40, %v858_v52  ;;  %vm1085_vm4 = vweird.f32 %v2809_v40 }
 0x2f3   :  { %vm1086_vm7 = vmor %vm1084_vm8, %vm1085_vm4 }
 0x2f4   :  { %v1080_v41 = vmul.f32 %v2809_v40, %v1079_v50 }
 0x2f6   :  { %v1081_v0 = vmul.f32 0.5, %v1080_v41  ;;  %v2856_v41 = vld [vmem:[%s5287_s1 + $0xa0] sm:$0xff] }
 0x2f8   :  { %v1082_v12 = vsub.f32 1.5, %v1081_v0  ;;  %v2394_v0 = vmul.f32 %v2856_v41, %v5070_v45 }
 0x2fa   :  { %v1083_v26 = vmul.f32 %v2809_v40, %v1082_v12 }
 0x2fc   :  { %v1087_v14 = vsel %vm1086_vm7, %v2809_v40, %v1083_v26 }
 0x2fd   :  { %v1236_v47 = vmul.f32 5.0, %v1087_v14 }
 0x2ff   :  { %v1268_v60 = vmin.f32 %v1236_v47, 1.0  ;;  %v2857_v47 = vld [vmem:[%s5287_s1 + $0x98] sm:$0xff] }
 0x301   :  { %v1300_v51 = vmul.f32 %v1268_v60, %v4958_v11  ;;  %v2393_v60 = vmul.f32 %v2857_v47, %v5056_v21 }
 0x303   :  { %v2424_v54 = vadd.f32 %v2392_v42, %v1300_v51 }
 0x305   :  { %2456 = vst.msk [vmem:[%s5290_s5 + $0x90] sm:$0xff] %vm280_vm0, %v2424_v54  ;;  %v5143_v54 = vpop.permute.xlu1 %2351 }
 0x30e   :  { %v864_v7 = vpop.xlane.xlu0 %863 }
 0x30f   :  { %2810 = vrsqrt.f32 %v864_v7  ;;  %vm1104_vm11 = vweird.f32 %v864_v7 }
 0x310   :  { %v861_v4 = vpop.xlane.xlu2 %860 }
 0x311   :  { %2812 = vrsqrt.f32 %v861_v4  ;;  %vm1094_vm10 = vweird.f32 %v861_v4 }
 0x315   :  { %v2811_v49 = vpop.eup %2810 }
 0x316   :  { %v1099_v36 = vmul.f32 %v2811_v49, %v864_v7  ;;  %v873_v9 = vpop.xlane.xlu0 %872  ;;  %vm1105_vm2 = vweird.f32 %v2811_v49 }
 0x317   :  { %v2813_v27 = vpop.eup %2812  ;;  %2814 = vrsqrt.f32 %v873_v9  ;;  %vm1106_vm9 = vmor %vm1104_vm11, %vm1105_vm2  ;;  %vm1134_vm14 = vweird.f32 %v873_v9 }
 0x318   :  { %v1089_v5 = vmul.f32 %v2813_v27, %v861_v4  ;;  %v870_v11 = vpop.xlane.xlu2 %869  ;;  %v1100_v43 = vmul.f32 %v2811_v49, %v1099_v36  ;;  %vm1095_vm5 = vweird.f32 %v2813_v27 }
 0x319   :  { %2816 = vrsqrt.f32 %v870_v11  ;;  %vm1096_vm1 = vmor %vm1094_vm10, %vm1095_vm5  ;;  %vm1124_vm12 = vweird.f32 %v870_v11 }
 0x31a   :  { %v1090_v46 = vmul.f32 %v2813_v27, %v1089_v5  ;;  %v1101_v59 = vmul.f32 0.5, %v1100_v43 }
 0x31c   :  { %v1091_v2 = vmul.f32 0.5, %v1090_v46  ;;  %v1102_v16 = vsub.f32 1.5, %v1101_v59 }
 0x31d   :  { %v2815_v62 = vpop.eup %2814 }
 0x31e   :  { %v1092_v35 = vsub.f32 1.5, %v1091_v2  ;;  %v1103_v22 = vmul.f32 %v2811_v49, %v1102_v16  ;;  %v1129_v48 = vmul.f32 %v2815_v62, %v873_v9  ;;  %v5128_v23 = vpop.xlane.xlu0 %881  ;;  %vm1135_vm13 = vweird.f32 %v2815_v62 }
 0x31f   :  { %v2817_v8 = vpop.eup %2816  ;;  %2818 = vrsqrt.f32 %v5128_v23  ;;  %vm1136_vm15 = vmor %vm1134_vm14, %vm1135_vm13  ;;  %vm1164_vm7 = vweird.f32 %v5128_v23 }
 0x320   :  { %v1093_v38 = vmul.f32 %v2813_v27, %v1092_v35  ;;  %v1119_v57 = vmul.f32 %v2817_v8, %v870_v11  ;;  %v5131_v44 = vpop.xlane.xlu2 %878  ;;  %v1107_v3 = vsel %vm1106_vm9, %v2811_v49, %v1103_v22  ;;  %v1130_v37 = vmul.f32 %v2815_v62, %v1129_v48  ;;  %v2858_v48 = vld [vmem:[%s5287_s1 + $0xb8] sm:$0xff] }
 0x321   :  { %2820 = vrsqrt.f32 %v5131_v44  ;;  %v1238_v39 = vmul.f32 5.0, %v1107_v3  ;;  %vm1125_vm6 = vweird.f32 %v2817_v8  ;;  %vm1154_vm5 = vweird.f32 %v5131_v44 }
 0x322   :  { %v1097_v63 = vsel %vm1096_vm1, %v2813_v27, %v1093_v38  ;;  %v1120_v53 = vmul.f32 %v2817_v8, %v1119_v57  ;;  %v1131_v52 = vmul.f32 0.5, %v1130_v37  ;;  %vm1126_vm3 = vmor %vm1124_vm12, %vm1125_vm6  ;;  %v2859_v37 = vld [vmem:[%s5287_s1 + $0xb0] sm:$0xff] }
 0x323   :  { %v1237_v30 = vmul.f32 5.0, %v1097_v63  ;;  %v1270_v40 = vmin.f32 %v1238_v39, 1.0  ;;  %v2396_v39 = vmul.f32 %v2859_v37, %v5072_v10  ;;  %v2862_v37 = vld [vmem:[%s5287_s1 + $0xe8] sm:$0xff] }
 0x324   :  { %v1121_v50 = vmul.f32 0.5, %v1120_v53  ;;  %v1132_v26 = vsub.f32 1.5, %v1131_v52 }
 0x325   :  { %v1269_v12 = vmin.f32 %v1237_v30, 1.0  ;;  %v2819_v14 = vpop.eup %2818  ;;  %v1302_v28 = vmul.f32 %v1270_v40, %v4976_v24 }
 0x326   :  { %v1122_v42 = vsub.f32 1.5, %v1121_v50  ;;  %v1133_v45 = vmul.f32 %v2815_v62, %v1132_v26  ;;  %v1159_v4 = vmul.f32 %v2819_v14, %v5128_v23  ;;  %v5147_v49 = vpop.xlane.xlu0 %890  ;;  %vm1165_vm4 = vweird.f32 %v2819_v14 }
 0x327   :  { %v2821_v51 = vpop.eup %2820  ;;  %v1301_v7 = vmul.f32 %v1269_v12, %v4980_v17  ;;  %v2426_v27 = vadd.f32 %v2394_v0, %v1302_v28  ;;  %2822 = vrsqrt.f32 %v5147_v49  ;;  %vm1166_vm2 = vmor %vm1164_vm7, %vm1165_vm4  ;;  %vm1194_vm10 = vweird.f32 %v5147_v49 }
 0x328   :  { %v1123_v36 = vmul.f32 %v2817_v8, %v1122_v42  ;;  %v1149_v24 = vmul.f32 %v2821_v51, %v5131_v44  ;;  %v5151_v21 = vpop.xlane.xlu2 %887  ;;  %v1137_v43 = vsel %vm1136_vm15, %v2815_v62, %v1133_v45  ;;  %v1160_v17 = vmul.f32 %v2819_v14, %v1159_v4 }
 0x329   :  { %v2425_v5 = vadd.f32 %v2393_v60, %v1301_v7  ;;  %2458 = vst.msk [vmem:[%s5290_s5 + $0xa0] sm:$0xff] %vm280_vm0, %v2426_v27  ;;  %v1241_v9 = vmul.f32 5.0, %v1137_v43  ;;  %2824 = vrsqrt.f32 %v5151_v21  ;;  %vm1155_vm8 = vweird.f32 %v2821_v51  ;;  %v2860_v60 = vld [vmem:[%s5287_s1 + $0xd0] sm:$0xff]  ;;  %v2861_v27 = vld [vmem:[%s5287_s1 + $0xc8] sm:$0xff] }
 0x32a   :  { %v1127_v46 = vsel %vm1126_vm3, %v2817_v8, %v1123_v36  ;;  %v1150_v59 = vmul.f32 %v2821_v51, %v1149_v24  ;;  %v1161_v2 = vmul.f32 0.5, %v1160_v17  ;;  %v2397_v8 = vmul.f32 %v2858_v48, %v5114_v55  ;;  %vm1156_vm11 = vmor %vm1154_vm5, %vm1155_vm8 }
 0x32b   :  { %2457 = vst.msk [vmem:[%s5290_s5 + $0x98] sm:$0xff] %vm280_vm0, %v2425_v5  ;;  %v1240_v11 = vmul.f32 5.0, %v1127_v46  ;;  %v1273_v16 = vmin.f32 %v1241_v9, 1.0  ;;  %v2400_v28 = vmul.f32 %v2860_v60, %v5126_v6  ;;  %v2399_v36 = vmul.f32 %v2861_v27, %v5112_v61 }
 0x32c   :  { %v1151_v62 = vmul.f32 0.5, %v1150_v59  ;;  %v1162_v22 = vsub.f32 1.5, %v1161_v2  ;;  %vm1184_vm6 = vweird.f32 %v5151_v21 }
 0x32d   :  { %v1272_v35 = vmin.f32 %v1240_v11, 1.0  ;;  %v1305_v38 = vmul.f32 %v1273_v16, %v5000_v18  ;;  %v2823_v3 = vpop.eup %2822  ;;  %v5175_v30 = vpop.xlane.xlu1 %866 }
 0x32e   :  { %v1152_v57 = vsub.f32 1.5, %v1151_v62  ;;  %v1163_v53 = vmul.f32 %v2819_v14, %v1162_v22  ;;  %v1189_v18 = vmul.f32 %v2823_v3, %v5147_v49  ;;  %2826 = vrsqrt.f32 %v5175_v30 }
 0x32f   :  { %v1304_v63 = vmul.f32 %v1272_v35, %v5005_v56  ;;  %v2429_v52 = vadd.f32 %v2397_v8, %v1305_v38  ;;  %v2825_v50 = vpop.eup %2824  ;;  %vm1195_vm9 = vweird.f32 %v2823_v3  ;;  %vm1114_vm12 = vweird.f32 %v5175_v30 }
 0x330   :  { %v1153_v55 = vmul.f32 %v2821_v51, %v1152_v57  ;;  %v5179_v40 = vpop.xlane.xlu2 %896  ;;  %v1167_v0 = vsel %vm1166_vm2, %v2819_v14, %v1163_v53  ;;  %v1190_v23 = vmul.f32 %v2823_v3, %v1189_v18  ;;  %v1179_v44 = vmul.f32 %v2825_v50, %v5151_v21  ;;  %vm1196_vm13 = vmor %vm1194_vm10, %vm1195_vm9  ;;  %v2863_v18 = vld [vmem:[%s5287_s1 + $0xe0] sm:$0xff] }
 0x331   :  { %v2428_v41 = vadd.f32 %v2396_v39, %v1304_v63  ;;  %2461 = vst.msk [vmem:[%s5290_s5 + $0xb8] sm:$0xff] %vm280_vm0, %v2429_v52  ;;  %v1244_v56 = vmul.f32 5.0, %v1167_v0  ;;  %2828 = vrsqrt.f32 %v5179_v40  ;;  %vm1185_vm1 = vweird.f32 %v2825_v50 }
 0x332   :  { %v1157_v10 = vsel %vm1156_vm11, %v2821_v51, %v1153_v55  ;;  %v1191_v14 = vmul.f32 0.5, %v1190_v23  ;;  %v1180_v47 = vmul.f32 %v2825_v50, %v1179_v44  ;;  %vm1186_vm14 = vmor %vm1184_vm6, %vm1185_vm1  ;;  %vm1214_vm8 = vweird.f32 %v5179_v40 }
 0x333   :  { %2460 = vst.msk [vmem:[%s5290_s5 + $0xb0] sm:$0xff] %vm280_vm0, %v2428_v41  ;;  %v1243_v12 = vmul.f32 5.0, %v1157_v10  ;;  %v1276_v26 = vmin.f32 %v1244_v56, 1.0 }
 0x334   :  { %v1192_v7 = vsub.f32 1.5, %v1191_v14  ;;  %v1181_v45 = vmul.f32 0.5, %v1180_v47  ;;  %v2827_v4 = vpop.eup %2826  ;;  %v2864_v47 = vld [vmem:[%s5287_s1 + $0xa8] sm:$0xff] }
 0x335   :  { %v1275_v42 = vmin.f32 %v1243_v12, 1.0  ;;  %v1308_v51 = vmul.f32 %v1276_v26, %v5013_v58  ;;  %v5204_v5 = vpop.xlane.xlu1 %875  ;;  %v1109_v17 = vmul.f32 %v2827_v4, %v5175_v30  ;;  %vm1115_vm15 = vweird.f32 %v2827_v4 }
 0x336   :  { %v1193_v43 = vmul.f32 %v2823_v3, %v1192_v7  ;;  %v1182_v58 = vsub.f32 1.5, %v1181_v45  ;;  %2830 = vrsqrt.f32 %v5204_v5  ;;  %vm1116_vm4 = vmor %vm1114_vm12, %vm1115_vm15  ;;  %v2395_v60 = vmul.f32 %v2864_v47, %v5090_v32 }
 0x337   :  { %v1307_v24 = vmul.f32 %v1275_v42, %v5018_v29  ;;  %v2432_v6 = vadd.f32 %v2400_v28, %v1308_v51  ;;  %v2829_v9 = vpop.eup %2828  ;;  %v1110_v49 = vmul.f32 %v2827_v4, %v1109_v17  ;;  %vm1144_vm5 = vweird.f32 %v5204_v5 }
 0x338   :  { %v1197_v29 = vsel %vm1196_vm13, %v2823_v3, %v1193_v43  ;;  %v1183_v61 = vmul.f32 %v2825_v50, %v1182_v58  ;;  %v1209_v59 = vmul.f32 %v2829_v9, %v5179_v40  ;;  %v2362_v62 = vpop.permute.xlu2 %2361  ;;  %vm1215_vm3 = vweird.f32 %v2829_v9 }
 0x339   :  { %v2431_v46 = vadd.f32 %v2399_v36, %v1307_v24  ;;  %2464 = vst.msk [vmem:[%s5290_s5 + $0xd0] sm:$0xff] %vm280_vm0, %v2432_v6  ;;  %v1247_v21 = vmul.f32 5.0, %v1197_v29  ;;  %v1111_v2 = vmul.f32 0.5, %v1110_v49  ;;  %v2403_v39 = vmul.f32 %v2862_v37, %v2362_v62  ;;  %vm1216_vm7 = vmor %vm1214_vm8, %vm1215_vm3  ;;  %v2372_v40 = vpop.permute.xlu0 %2371  ;;  %v2865_v36 = vld [vmem:[%s5287_s1 + $0xf8] sm:$0xff] }
 0x33a   :  { %v1187_v11 = vsel %vm1186_vm14, %v2825_v50, %v1183_v61  ;;  %v1210_v16 = vmul.f32 %v2829_v9, %v1209_v59  ;;  %v2402_v50 = vmul.f32 %v2863_v18, %v5120_v25  ;;  %v2405_v24 = vmul.f32 %v2865_v36, %v2372_v40 }
 0x33b   :  { %2463 = vst.msk [vmem:[%s5290_s5 + $0xc8] sm:$0xff] %vm280_vm0, %v2431_v46  ;;  %v1246_v35 = vmul.f32 5.0, %v1187_v11  ;;  %v1279_v22 = vmin.f32 %v1247_v21, 1.0  ;;  %v1112_v48 = vsub.f32 1.5, %v1111_v2 }
 0x33c   :  { %v1211_v8 = vmul.f32 0.5, %v1210_v16  ;;  %v2831_v38 = vpop.eup %2830 }
 0x33d   :  { %v1278_v57 = vmin.f32 %v1246_v35, 1.0  ;;  %v1311_v3 = vmul.f32 %v1279_v22, %v5026_v20  ;;  %v885_v63 = vpop.xlane.xlu1 %884  ;;  %v1113_v53 = vmul.f32 %v2827_v4, %v1112_v48  ;;  %v1139_v55 = vmul.f32 %v2831_v38, %v5204_v5 }
 0x33e   :  { %v1212_v52 = vsub.f32 1.5, %v1211_v8  ;;  %2832 = vrsqrt.f32 %v885_v63  ;;  %vm1145_vm2 = vweird.f32 %v2831_v38  ;;  %vm1174_vm10 = vweird.f32 %v885_v63 }
 0x33f   :  { %v1310_v30 = vmul.f32 %v1278_v57, %v5030_v1  ;;  %v2435_v20 = vadd.f32 %v2403_v39, %v1311_v3  ;;  %v1117_v41 = vsel %vm1116_vm4, %v2827_v4, %v1113_v53  ;;  %v1140_v56 = vmul.f32 %v2831_v38, %v1139_v55  ;;  %vm1146_vm11 = vmor %vm1144_vm5, %vm1145_vm2 }
 0x340   :  { %v1213_v0 = vmul.f32 %v2829_v9, %v1212_v52  ;;  %v1239_v23 = vmul.f32 5.0, %v1117_v41 }
 0x341   :  { %v2434_v10 = vadd.f32 %v2402_v50, %v1310_v30  ;;  %2467 = vst.msk [vmem:[%s5290_s5 + $0xe8] sm:$0xff] %vm280_vm0, %v2435_v20  ;;  %v1141_v44 = vmul.f32 0.5, %v1140_v56 }
 0x342   :  { %v1217_v25 = vsel %vm1216_vm7, %v2829_v9, %v1213_v0  ;;  %v1271_v1 = vmin.f32 %v1239_v23, 1.0  ;;  %v2866_v9 = vld [vmem:[%s5287_s1 + $0xc0] sm:$0xff] }
 0x343   :  { %2466 = vst.msk [vmem:[%s5290_s5 + $0xe0] sm:$0xff] %vm280_vm0, %v2434_v10  ;;  %v1249_v12 = vmul.f32 5.0, %v1217_v25  ;;  %v1142_v26 = vsub.f32 1.5, %v1141_v44  ;;  %v2398_v46 = vmul.f32 %v2866_v9, %v5105_v15 }
 0x344   :  { %v2833_v14 = vpop.eup %2832  ;;  %v1303_v28 = vmul.f32 %v1271_v1, %v5045_v31 }
 0x345   :  { %v1281_v42 = vmin.f32 %v1249_v12, 1.0  ;;  %v894_v51 = vpop.xlane.xlu1 %893  ;;  %v1143_v7 = vmul.f32 %v2831_v38, %v1142_v26  ;;  %v1169_v45 = vmul.f32 %v2833_v14, %v885_v63  ;;  %vm1175_vm9 = vweird.f32 %v2833_v14 }
 0x346   :  { %2834 = vrsqrt.f32 %v894_v51  ;;  %v2427_v4 = vadd.f32 %v2395_v60, %v1303_v28  ;;  %vm1176_vm1 = vmor %vm1174_vm10, %vm1175_vm9  ;;  %vm1204_vm6 = vweird.f32 %v894_v51 }
 0x347   :  { %v1313_v27 = vmul.f32 %v1281_v42, %v5049_v34  ;;  %v1147_v6 = vsel %vm1146_vm11, %v2831_v38, %v1143_v7  ;;  %v1170_v32 = vmul.f32 %v2833_v14, %v1169_v45 }
 0x348   :  { %2459 = vst.msk [vmem:[%s5290_s5 + $0xa8] sm:$0xff] %vm280_vm0, %v2427_v4  ;;  %v1242_v31 = vmul.f32 5.0, %v1147_v6 }
 0x349   :  { %v2437_v5 = vadd.f32 %v2405_v24, %v1313_v27  ;;  %v1171_v43 = vmul.f32 0.5, %v1170_v32 }
 0x34a   :  { %v1274_v58 = vmin.f32 %v1242_v31, 1.0 }
 0x34b   :  { %2469 = vst.msk [vmem:[%s5290_s5 + $0xf8] sm:$0xff] %vm280_vm0, %v2437_v5  ;;  %v1172_v17 = vsub.f32 1.5, %v1171_v43 }
 0x34c   :  { %v2835_v34 = vpop.eup %2834  ;;  %v1306_v29 = vmul.f32 %v1274_v58, %v5064_v19  ;;  %v2867_v19 = vld [vmem:[%s5287_s1 + $0xd8] sm:$0xff] }
 0x34d   :  { %v1199_v61 = vmul.f32 %v2835_v34, %v894_v51  ;;  %v1173_v49 = vmul.f32 %v2833_v14, %v1172_v17  ;;  %vm1205_vm13 = vweird.f32 %v2835_v34  ;;  %v2401_v15 = vmul.f32 %v2867_v19, %v5143_v54  ;;  %v2868_v54 = vld [vmem:[%s5287_s1 + $0xf0] sm:$0xff] }
 0x34e   :  { %v2430_v59 = vadd.f32 %v2398_v46, %v1306_v29  ;;  %vm1206_vm14 = vmor %vm1204_vm6, %vm1205_vm13 }
 0x34f   :  { %v1200_v21 = vmul.f32 %v2835_v34, %v1199_v61  ;;  %v1177_v11 = vsel %vm1176_vm1, %v2833_v14, %v1173_v49 }
 0x350   :  { %2462 = vst.msk [vmem:[%s5290_s5 + $0xc0] sm:$0xff] %vm280_vm0, %v2430_v59  ;;  %v1245_v2 = vmul.f32 5.0, %v1177_v11 }
 0x351   :  { %v1201_v16 = vmul.f32 0.5, %v1200_v21 }
 0x352   :  { %v1277_v62 = vmin.f32 %v1245_v2, 1.0 }
 0x353   :  { %v1202_v35 = vsub.f32 1.5, %v1201_v16 }
 0x354   :  { %v1309_v22 = vmul.f32 %v1277_v62, %v5076_v33 }
 0x355   :  { %v1203_v48 = vmul.f32 %v2835_v34, %v1202_v35 }
 0x356   :  { %v2433_v8 = vadd.f32 %v2401_v15, %v1309_v22 }
 0x357   :  { %v1207_v38 = vsel %vm1206_vm14, %v2835_v34, %v1203_v48 }
 0x358   :  { %v1248_v57 = vmul.f32 5.0, %v1207_v38  ;;  %2465 = vst.msk [vmem:[%s5290_s5 + $0xd8] sm:$0xff] %vm280_vm0, %v2433_v8 }
 0x35a   :  { %v1280_v3 = vmin.f32 %v1248_v57, 1.0 }
 0x35c   :  { %v1312_v39 = vmul.f32 %v1280_v3, %v5083_v13 }
 0x35d   :  { %v2367_v37 = vpop.permute.xlu1 %2366 }
 0x35e   :  { %v2404_v33 = vmul.f32 %v2868_v54, %v2367_v37 }
 0x360   :  { %v2436_v63 = vadd.f32 %v2404_v33, %v1312_v39 }
 0x362   :  { %2468 = vst.msk [vmem:[%s5290_s5 + $0xf0] sm:$0xff] %vm280_vm0, %v2436_v63 }

</bundles_post_ra>
